<compile_context>
chip_gen: v5e
topology: v5e:2x2
jax: 0.10.0
libtpu: 0.0.40
codegen_flags: <defaults>
</compile_context>

<pallas_src>
import math
from functools import partial

import jax
import jax.numpy as jnp
from jax import lax
from jax.experimental import pallas as pl
from jax.experimental.pallas import tpu as pltpu


CFG = dict(
    point_latent_dim=32,
    hidden_dim=32,
    intermediate_dim=128,     # hidden_dim * 4
    num_layers=2,
    num_heads=4,
    discrete_bins=125,
    vocab_size=125 + 3,       # = 128
    num_cond_tokens=8,
    max_seq_length=8,
)
CFG["max_pos"] = CFG["max_seq_length"] + CFG["num_cond_tokens"] + 10


# ----------------------------- fused Pallas kernel ------------------------------

def _lmm_fused_kernel(
    # per-batch data blocks
    conds_ref, tokemb_ref, condpos_ref, mask_ref, labels_ref,
    # cond projection / norm weights
    pw_ref, pb_ref, ncg_ref, ncb_ref,
    # stacked decoder-layer weights (leading dim = layer)
    ln1g_ref, ln1b_ref, wqkv_ref, bqkv_ref, wo_ref, bo_ref,
    ln2g_ref, ln2b_ref, fc1w_ref, fc1b_ref, fc2w_ref, fc2b_ref,
    # final LN + LM head
    flng_ref, flnb_ref, lmw_ref,
    # outputs
    logits_ref, loss_ref, valid_ref,
    # scratch
    h_buf,
    *, num_layers, num_heads, num_cond, eps,
):
    S, H = h_buf.shape
    dH = H // num_heads
    scale = 1.0 / math.sqrt(dH)

    def layer_norm(x, g, b):
        mean = jnp.mean(x, axis=-1, keepdims=True)
        var = jnp.mean(jnp.square(x - mean), axis=-1, keepdims=True)
        return (x - mean) * lax.rsqrt(var + eps) * g + b

    # ---- encode_cond (point_latent branch): proj_cond + norm_cond ----
    c = jnp.dot(conds_ref[...], pw_ref[...],
                preferred_element_type=jnp.float32) + pb_ref[...]
    c = layer_norm(c, ncg_ref[...], ncb_ref[...])

    # Assemble the input sequence in VMEM scratch: [cond tokens ; mesh tokens].
    h_buf[0:num_cond, :] = c + condpos_ref[...]
    h_buf[num_cond:S, :] = tokemb_ref[...]
    h = h_buf[...]

    # ---- attention mask (hoisted; shared by all layers & heads) ----
    row = lax.broadcasted_iota(jnp.int32, (S, S), 0)
    col = lax.broadcasted_iota(jnp.int32, (S, S), 1)
    key_valid = mask_ref[0] > 0.5                         # (1, S)
    valid = jnp.logical_and(col <= row, key_valid)        # (S, S)
    # NOTE: fully-padded query rows end up with uniform attention weights
    # (finite -1e30 masking); their logits are garbage but the loss is masked,
    # matching the reference model's behavior at padded positions.

    # ---- OPT-style decoder layers (all weights stay resident in VMEM) ----
    for l in range(num_layers):
        resid = h
        x = layer_norm(h, ln1g_ref[l], ln1b_ref[l])
        qkv = jnp.dot(x, wqkv_ref[l],
                      preferred_element_type=jnp.float32) + bqkv_ref[l]   # (S, 3H)
        wo_l = wo_ref[l]                                                  # (H, H)
        attn = jnp.zeros((S, H), jnp.float32)
        for hd in range(num_heads):
            q = qkv[:, hd * dH:(hd + 1) * dH]                              # (S, dH)
            k = qkv[:, H + hd * dH:H + (hd + 1) * dH]
            v = qkv[:, 2 * H + hd * dH:2 * H + (hd + 1) * dH]
            s = lax.dot_general(q, k, (((1,), (1,)), ((), ())),
                                preferred_element_type=jnp.float32) * scale
            s = jnp.where(valid, s, -1e30)
            m = jnp.max(s, axis=-1, keepdims=True)
            p = jnp.exp(s - m)
            p = p * pl.reciprocal(jnp.sum(p, axis=-1, keepdims=True), approx=True)
            o_h = jnp.dot(p, v, preferred_element_type=jnp.float32)        # (S, dH)
            # Fold the output projection per head -> no head concat/transpose.
            attn = attn + jnp.dot(o_h, wo_l[hd * dH:(hd + 1) * dH, :],
                                  preferred_element_type=jnp.float32)
        h = resid + attn + bo_ref[l]

        resid = h
        x = layer_norm(h, ln2g_ref[l], ln2b_ref[l])
        y = jnp.dot(x, fc1w_ref[l], preferred_element_type=jnp.float32) + fc1b_ref[l]
        y = jnp.maximum(y, 0.0)
        y = jnp.dot(y, fc2w_ref[l], preferred_element_type=jnp.float32) + fc2b_ref[l]
        h = resid + y

    # ---- final LN + LM head (lane-dense V=128 HBM store) ----
    hf = layer_norm(h, flng_ref[...], flnb_ref[...])
    logits = jnp.dot(hf, lmw_ref[...], preferred_element_type=jnp.float32)   # (S, V)
    logits_ref[...] = logits

    # ---- shifted cross-entropy (labels pre-shifted in glue; label<0 => ignore) ----
    lbl = labels_ref[...]                                                    # (S, 1) int32
    mx = jnp.max(logits, axis=-1, keepdims=True)
    lse = jnp.log(jnp.sum(jnp.exp(logits - mx), axis=-1, keepdims=True)) + mx
    vcol = lax.broadcasted_iota(jnp.int32, logits.shape, 1)
    tgt = jnp.sum(jnp.where(vcol == lbl, logits, 0.0), axis=-1, keepdims=True)
    validr = (lbl >= 0).astype(jnp.float32)
    loss_ref[...] = (lse - tgt) * validr
    valid_ref[...] = validr


def _zero_map(ndim):
    zeros = (0,) * ndim
    return lambda b: zeros


def _lmm_pallas_call(params, conds_flat, tok_in, cond_pos, masks_f, labels_shift,
                     B, S, cfg):
    Lc = cfg["num_cond_tokens"]
    T = cfg["max_seq_length"]
    P = cfg["point_latent_dim"]
    H = cfg["hidden_dim"]
    V = cfg["vocab_size"]
    L = cfg["num_layers"]
    nH = cfg["num_heads"]

    weight_names = [
        "proj_cond_w", "proj_cond_b", "norm_cond_g", "norm_cond_b",
        "ln1_g", "ln1_b", "wqkv", "bqkv", "wo", "bo",
        "ln2_g", "ln2_b", "fc1_w", "fc1_b", "fc2_w", "fc2_b",
        "final_ln_g", "final_ln_b", "lm_head_w",
    ]
    weights = [params[n] for n in weight_names]

    in_specs = [
        pl.BlockSpec((Lc, P), lambda b: (b, 0)),        # conds (per batch)
        pl.BlockSpec((T, H), lambda b: (b, 0)),         # token emb + pos emb
        pl.BlockSpec((Lc, H), lambda b: (b, 0)),        # cond pos emb
        pl.BlockSpec((1, 1, S), lambda b: (b, 0, 0)),   # attention mask
        pl.BlockSpec((S, 1), lambda b: (b, 0)),         # shifted labels
    ]
    for w in weights:                                    # full weights, resident
        in_specs.append(pl.BlockSpec(w.shape, _zero_map(w.ndim)))

    out_specs = [
        pl.BlockSpec((S, V), lambda b: (b, 0)),          # logits (lane-dense)
        pl.BlockSpec((S, 1), lambda b: (b, 0)),          # per-row CE loss
        pl.BlockSpec((S, 1), lambda b: (b, 0)),          # per-row valid flag
    ]
    out_shape = [
        jax.ShapeDtypeStruct((B * S, V), jnp.float32),
        jax.ShapeDtypeStruct((B * S, 1), jnp.float32),
        jax.ShapeDtypeStruct((B * S, 1), jnp.float32),
    ]

    kern = partial(_lmm_fused_kernel, num_layers=L, num_heads=nH,
                   num_cond=Lc, eps=1e-5)
    return pl.pallas_call(
        kern,
        grid=(B,),
        in_specs=in_specs,
        out_specs=out_specs,
        out_shape=out_shape,
        scratch_shapes=[pltpu.VMEM((S, H), jnp.float32)],
        compiler_params=pltpu.CompilerParams(dimension_semantics=("parallel",)),
    )(conds_flat, tok_in, cond_pos, masks_f, labels_shift, *weights)


# ------------------------------- params & forward ---------------------------------

def init_params(key, cfg):
    P, H, V = cfg["point_latent_dim"], cfg["hidden_dim"], cfg["vocab_size"]
    I, L = cfg["intermediate_dim"], cfg["num_layers"]
    maxpos = cfg["max_pos"] + 2          # OPT learned-position offset of 2
    ks = jax.random.split(key, 8)
    lk = jax.random.split(ks[4], 4)

    def dense(k, shape):
        return 0.02 * jax.random.normal(k, shape, jnp.float32)

    return {
        "proj_cond_w": dense(ks[0], (P, H)),
        "proj_cond_b": jnp.zeros((1, H), jnp.float32),
        "norm_cond_g": jnp.ones((1, H), jnp.float32),
        "norm_cond_b": jnp.zeros((1, H), jnp.float32),
        "embed_tokens": 0.02 * jax.random.normal(ks[1], (V, H), jnp.float32),
        "embed_positions": 0.02 * jax.random.normal(ks[2], (maxpos, H), jnp.float32),
        # per-layer weights stacked along a leading layer axis
        "ln1_g": jnp.ones((L, 1, H), jnp.float32),
        "ln1_b": jnp.zeros((L, 1, H), jnp.float32),
        "wqkv": dense(lk[0], (L, H, 3 * H)),
        "bqkv": jnp.zeros((L, 1, 3 * H), jnp.float32),
        "wo": dense(lk[1], (L, H, H)),
        "bo": jnp.zeros((L, 1, H), jnp.float32),
        "ln2_g": jnp.ones((L, 1, H), jnp.float32),
        "ln2_b": jnp.zeros((L, 1, H), jnp.float32),
        "fc1_w": dense(lk[2], (L, H, I)),
        "fc1_b": jnp.zeros((L, 1, I), jnp.float32),
        "fc2_w": dense(lk[3], (L, I, H)),
        "fc2_b": jnp.zeros((L, 1, H), jnp.float32),
        "final_ln_g": jnp.ones((1, H), jnp.float32),
        "final_ln_b": jnp.zeros((1, H), jnp.float32),
        "lm_head_w": dense(ks[3], (H, V)),
    }


def lmm_forward(params, conds, tokens, labels, masks, num_tokens):
    """Mirrors LMM.forward for cond_mode='point_latent', use_num_face_cond=False."""
    cfg = CFG
    B, Lc, P = conds.shape
    T = tokens.shape[1]
    H, V = cfg["hidden_dim"], cfg["vocab_size"]
    S = Lc + T
    # TODO(synk): `num_tokens` is consumed inside the custom ShapeOPT (per-sample
    # length bookkeeping); its exact semantics are not public, so it is unused here.

    # ---- cheap gather/bookkeeping glue in plain JAX ----
    positions = jnp.clip(jnp.cumsum(masks, axis=1) * masks - 1, 0, None).astype(jnp.int32) + 2
    pos_emb = params["embed_positions"][positions]                 # (B, S, H)
    tok_emb = params["embed_tokens"][tokens]                       # (B, T, H)
    tok_in = (tok_emb + pos_emb[:, Lc:, :]).reshape(B * T, H).astype(jnp.float32)
    cond_pos = pos_emb[:, :Lc, :].reshape(B * Lc, H).astype(jnp.float32)
    conds_flat = conds.reshape(B * Lc, P).astype(jnp.float32)
    masks_f = masks.astype(jnp.float32).reshape(B, 1, S)
    labels_shift = jnp.concatenate(
        [labels[:, 1:], jnp.full((B, 1), -100, labels.dtype)], axis=1
    ).reshape(B * S, 1).astype(jnp.int32)

    # ---- single fused kernel: cond proj/LN + decoder + final LN + LM head + CE ----
    logits_flat, loss_rows, valid_rows = _lmm_pallas_call(
        params, conds_flat, tok_in, cond_pos, masks_f, labels_shift, B, S, cfg)

    logits = logits_flat.reshape(B, S, V)
    loss_ce = jnp.sum(loss_rows) / jnp.maximum(jnp.sum(valid_rows), 1.0)

    # cond_mode='point_latent' has no posterior -> no KL term.
    return {"loss": loss_ce, "loss_ce": loss_ce, "logits": logits}


# --------------------------------- Driver ------------------------------------

if __name__ == "__main__":
    key = jax.random.PRNGKey(0)
    kp, kc, kt = jax.random.split(key, 3)

    B = 2
    Lc = CFG["num_cond_tokens"]          # 8 cond tokens
    T = CFG["max_seq_length"]            # 8 mesh tokens
    S = Lc + T                           # 16
    P = CFG["point_latent_dim"]
    V = CFG["vocab_size"]

    params = init_params(jax.random.PRNGKey(42), CFG)

    conds = jax.random.normal(kc, (B, Lc, P), jnp.float32)           # point latents
    tokens = jax.random.randint(kt, (B, T), 3, V).astype(jnp.int32)  # mesh token ids
    labels = jnp.concatenate(
        [jnp.full((B, Lc), -100, jnp.int32), tokens], axis=1)        # (B, S), cond masked
    masks = jnp.ones((B, S), jnp.int32)                              # attention mask
    num_tokens = jnp.full((B,), S, jnp.int32)

    fwd = jax.jit(lmm_forward)
    out = fwd(params, conds, tokens, labels, masks, num_tokens)
    jax.block_until_ready(out["loss"])
    jax.block_until_ready(out["logits"])

    assert out["logits"].shape == (B, S, V)
    assert out["loss"].shape == ()
    assert bool(jnp.isfinite(out["loss"]))
    assert bool(jnp.all(jnp.isfinite(out["logits"])))
    print("KERNEL_OK")
</pallas_src>

<mosaic_0001>
module attributes {stable_mosaic.version = 11 : i64} {
  func.func @_lmm_fused_kernel(%arg0: i32, %arg1: memref<8x32xf32, #tpu.memory_space<vmem>>, %arg2: memref<8x32xf32, #tpu.memory_space<vmem>>, %arg3: memref<8x32xf32, #tpu.memory_space<vmem>>, %arg4: memref<1x1x16xf32, #tpu.memory_space<vmem>>, %arg5: memref<16x1xi32, #tpu.memory_space<vmem>>, %arg6: memref<32x32xf32, #tpu.memory_space<vmem>>, %arg7: memref<1x32xf32, #tpu.memory_space<vmem>>, %arg8: memref<1x32xf32, #tpu.memory_space<vmem>>, %arg9: memref<1x32xf32, #tpu.memory_space<vmem>>, %arg10: memref<2x1x32xf32, #tpu.memory_space<vmem>>, %arg11: memref<2x1x32xf32, #tpu.memory_space<vmem>>, %arg12: memref<2x32x96xf32, #tpu.memory_space<vmem>>, %arg13: memref<2x1x96xf32, #tpu.memory_space<vmem>>, %arg14: memref<2x32x32xf32, #tpu.memory_space<vmem>>, %arg15: memref<2x1x32xf32, #tpu.memory_space<vmem>>, %arg16: memref<2x1x32xf32, #tpu.memory_space<vmem>>, %arg17: memref<2x1x32xf32, #tpu.memory_space<vmem>>, %arg18: memref<2x32x128xf32, #tpu.memory_space<vmem>>, %arg19: memref<2x1x128xf32, #tpu.memory_space<vmem>>, %arg20: memref<2x128x32xf32, #tpu.memory_space<vmem>>, %arg21: memref<2x1x32xf32, #tpu.memory_space<vmem>>, %arg22: memref<1x32xf32, #tpu.memory_space<vmem>>, %arg23: memref<1x32xf32, #tpu.memory_space<vmem>>, %arg24: memref<32x128xf32, #tpu.memory_space<vmem>>, %arg25: memref<16x128xf32, #tpu.memory_space<vmem>>, %arg26: memref<16x1xf32, #tpu.memory_space<vmem>>, %arg27: memref<16x1xf32, #tpu.memory_space<vmem>>, %arg28: memref<16x32xf32, #tpu.memory_space<vmem>>) attributes {dimension_semantics = [#tpu.dimension_semantics<parallel>], iteration_bounds = array<i64: 2>, scalar_prefetch = 0 : i64, scratch_operands = 1 : i64, tpu.core_type = #tpu.core_type<tc>, window_params = [{transform_indices = @transform_0, window_bounds = array<i64: 8, 32>}, {transform_indices = @transform_1, window_bounds = array<i64: 8, 32>}, {transform_indices = @transform_2, window_bounds = array<i64: 8, 32>}, {transform_indices = @transform_3, window_bounds = array<i64: 1, 1, 16>}, {transform_indices = @transform_4, window_bounds = array<i64: 16, 1>}, {pipeline_mode = #tpu.pipeline_mode<synchronous>, transform_indices = @transform_5, window_bounds = array<i64: 32, 32>}, {pipeline_mode = #tpu.pipeline_mode<synchronous>, transform_indices = @transform_6, window_bounds = array<i64: 1, 32>}, {pipeline_mode = #tpu.pipeline_mode<synchronous>, transform_indices = @transform_7, window_bounds = array<i64: 1, 32>}, {pipeline_mode = #tpu.pipeline_mode<synchronous>, transform_indices = @transform_8, window_bounds = array<i64: 1, 32>}, {pipeline_mode = #tpu.pipeline_mode<synchronous>, transform_indices = @transform_9, window_bounds = array<i64: 2, 1, 32>}, {pipeline_mode = #tpu.pipeline_mode<synchronous>, transform_indices = @transform_10, window_bounds = array<i64: 2, 1, 32>}, {pipeline_mode = #tpu.pipeline_mode<synchronous>, transform_indices = @transform_11, window_bounds = array<i64: 2, 32, 96>}, {pipeline_mode = #tpu.pipeline_mode<synchronous>, transform_indices = @transform_12, window_bounds = array<i64: 2, 1, 96>}, {pipeline_mode = #tpu.pipeline_mode<synchronous>, transform_indices = @transform_13, window_bounds = array<i64: 2, 32, 32>}, {pipeline_mode = #tpu.pipeline_mode<synchronous>, transform_indices = @transform_14, window_bounds = array<i64: 2, 1, 32>}, {pipeline_mode = #tpu.pipeline_mode<synchronous>, transform_indices = @transform_15, window_bounds = array<i64: 2, 1, 32>}, {pipeline_mode = #tpu.pipeline_mode<synchronous>, transform_indices = @transform_16, window_bounds = array<i64: 2, 1, 32>}, {pipeline_mode = #tpu.pipeline_mode<synchronous>, transform_indices = @transform_17, window_bounds = array<i64: 2, 32, 128>}, {pipeline_mode = #tpu.pipeline_mode<synchronous>, transform_indices = @transform_18, window_bounds = array<i64: 2, 1, 128>}, {pipeline_mode = #tpu.pipeline_mode<synchronous>, transform_indices = @transform_19, window_bounds = array<i64: 2, 128, 32>}, {pipeline_mode = #tpu.pipeline_mode<synchronous>, transform_indices = @transform_20, window_bounds = array<i64: 2, 1, 32>}, {pipeline_mode = #tpu.pipeline_mode<synchronous>, transform_indices = @transform_21, window_bounds = array<i64: 1, 32>}, {pipeline_mode = #tpu.pipeline_mode<synchronous>, transform_indices = @transform_22, window_bounds = array<i64: 1, 32>}, {pipeline_mode = #tpu.pipeline_mode<synchronous>, transform_indices = @transform_23, window_bounds = array<i64: 32, 128>}, {transform_indices = @transform_24, window_bounds = array<i64: 16, 128>}, {transform_indices = @transform_25, window_bounds = array<i64: 16, 1>}, {transform_indices = @transform_26, window_bounds = array<i64: 16, 1>}]} {
    %c0 = arith.constant 0 : index
    %c0_0 = arith.constant 0 : index
    %0 = vector.load %arg1[%c0, %c0_0] : memref<8x32xf32, #tpu.memory_space<vmem>>, vector<8x32xf32>
    %c0_1 = arith.constant 0 : index
    %c0_2 = arith.constant 0 : index
    %1 = vector.load %arg6[%c0_1, %c0_2] : memref<32x32xf32, #tpu.memory_space<vmem>>, vector<32x32xf32>
    %cst = arith.constant dense<0.000000e+00> : vector<8x32xf32>
    %2 = tpu.matmul %0, %1, %cst {dimension_numbers = #tpu.dot_dimension_numbers<[1], [0], [0], [1], [0, 0, 1, 1], [], []>} : vector<8x32xf32>, vector<32x32xf32>, vector<8x32xf32> -> vector<8x32xf32>
    %c0_3 = arith.constant 0 : index
    %c0_4 = arith.constant 0 : index
    %3 = vector.load %arg7[%c0_3, %c0_4] : memref<1x32xf32, #tpu.memory_space<vmem>>, vector<1x32xf32>
    %4 = vector.broadcast %3 : vector<1x32xf32> to vector<8x32xf32>
    %5 = arith.addf %2, %4 : vector<8x32xf32>
    %c0_5 = arith.constant 0 : index
    %c0_6 = arith.constant 0 : index
    %6 = vector.load %arg8[%c0_5, %c0_6] : memref<1x32xf32, #tpu.memory_space<vmem>>, vector<1x32xf32>
    %c0_7 = arith.constant 0 : index
    %c0_8 = arith.constant 0 : index
    %7 = vector.load %arg9[%c0_7, %c0_8] : memref<1x32xf32, #tpu.memory_space<vmem>>, vector<1x32xf32>
    %cst_9 = arith.constant dense<0.000000e+00> : vector<8xf32>
    %8 = vector.multi_reduction <add>, %5, %cst_9 [1] : vector<8x32xf32> to vector<8xf32>
    %9 = vector.shape_cast %8 : vector<8xf32> to vector<8x1xf32>
    %cst_10 = arith.constant 3.200000e+01 : f32
    %10 = vector.broadcast %cst_10 : f32 to vector<8x1xf32>
    %11 = arith.divf %9, %10 : vector<8x1xf32>
    %12 = vector.broadcast %11 : vector<8x1xf32> to vector<8x32xf32>
    %13 = arith.subf %5, %12 : vector<8x32xf32>
    %14 = arith.mulf %13, %13 : vector<8x32xf32>
    %cst_11 = arith.constant dense<0.000000e+00> : vector<8xf32>
    %15 = vector.multi_reduction <add>, %14, %cst_11 [1] : vector<8x32xf32> to vector<8xf32>
    %16 = vector.shape_cast %15 : vector<8xf32> to vector<8x1xf32>
    %cst_12 = arith.constant 3.200000e+01 : f32
    %17 = vector.broadcast %cst_12 : f32 to vector<8x1xf32>
    %18 = arith.divf %16, %17 : vector<8x1xf32>
    %19 = vector.broadcast %11 : vector<8x1xf32> to vector<8x32xf32>
    %20 = arith.subf %5, %19 : vector<8x32xf32>
    %cst_13 = arith.constant 9.99999974E-6 : f32
    %21 = vector.broadcast %cst_13 : f32 to vector<8x1xf32>
    %22 = arith.addf %18, %21 : vector<8x1xf32>
    %23 = math.rsqrt %22 : vector<8x1xf32>
    %24 = vector.broadcast %23 : vector<8x1xf32> to vector<8x32xf32>
    %25 = arith.mulf %20, %24 : vector<8x32xf32>
    %26 = vector.broadcast %6 : vector<1x32xf32> to vector<8x32xf32>
    %27 = arith.mulf %25, %26 : vector<8x32xf32>
    %28 = vector.broadcast %7 : vector<1x32xf32> to vector<8x32xf32>
    %29 = arith.addf %27, %28 : vector<8x32xf32>
    %c0_14 = arith.constant 0 : index
    %c0_15 = arith.constant 0 : index
    %30 = vector.load %arg3[%c0_14, %c0_15] : memref<8x32xf32, #tpu.memory_space<vmem>>, vector<8x32xf32>
    %31 = arith.addf %29, %30 : vector<8x32xf32>
    %c0_16 = arith.constant 0 : index
    %c0_17 = arith.constant 0 : index
    %32 = vector.load %arg28[%c0_16, %c0_17] : memref<16x32xf32, #tpu.memory_space<vmem>>, vector<8x32xf32>
    tpu.vector_store %arg28[%c0_16, %c0_17], %31 {strides = array<i32>} : memref<16x32xf32, #tpu.memory_space<vmem>>, vector<8x32xf32>,
    %c0_18 = arith.constant 0 : index
    %c0_19 = arith.constant 0 : index
    %33 = vector.load %arg2[%c0_18, %c0_19] : memref<8x32xf32, #tpu.memory_space<vmem>>, vector<8x32xf32>
    %c8 = arith.constant 8 : index
    %c0_20 = arith.constant 0 : index
    %34 = vector.load %arg28[%c8, %c0_20] : memref<16x32xf32, #tpu.memory_space<vmem>>, vector<8x32xf32>
    tpu.vector_store %arg28[%c8, %c0_20], %33 {strides = array<i32>} : memref<16x32xf32, #tpu.memory_space<vmem>>, vector<8x32xf32>,
    %c0_21 = arith.constant 0 : index
    %c0_22 = arith.constant 0 : index
    %35 = vector.load %arg28[%c0_21, %c0_22] : memref<16x32xf32, #tpu.memory_space<vmem>>, vector<16x32xf32>
    %36 = tpu.iota {dimensions = array<i32: 0>} : vector<16x16xi32>
    %37 = tpu.iota {dimensions = array<i32: 1>} : vector<16x16xi32>
    %c0_23 = arith.constant 0 : index
    %c0_24 = arith.constant 0 : index
    %c0_25 = arith.constant 0 : index
    %38 = vector.load %arg4[%c0_23, %c0_24, %c0_25] : memref<1x1x16xf32, #tpu.memory_space<vmem>>, vector<1x1x16xf32>
    %39 = vector.shape_cast %38 : vector<1x1x16xf32> to vector<1x16xf32>
    %cst_26 = arith.constant 5.000000e-01 : f32
    %40 = vector.broadcast %cst_26 : f32 to vector<1x16xf32>
    %41 = arith.cmpf ogt, %39, %40 : vector<1x16xf32>
    %42 = arith.cmpi sle, %37, %36 : vector<16x16xi32>
    %43 = vector.broadcast %41 : vector<1x16xi1> to vector<16x16xi1>
    %44 = arith.andi %42, %43 : vector<16x16xi1>
    %c0_27 = arith.constant 0 : index
    %c0_28 = arith.constant 0 : index
    %c0_29 = arith.constant 0 : index
    %45 = vector.load %arg10[%c0_27, %c0_28, %c0_29] : memref<2x1x32xf32, #tpu.memory_space<vmem>>, vector<1x1x32xf32>
    %46 = vector.shape_cast %45 : vector<1x1x32xf32> to vector<1x32xf32>
    %c0_30 = arith.constant 0 : index
    %c0_31 = arith.constant 0 : index
    %c0_32 = arith.constant 0 : index
    %47 = vector.load %arg11[%c0_30, %c0_31, %c0_32] : memref<2x1x32xf32, #tpu.memory_space<vmem>>, vector<1x1x32xf32>
    %48 = vector.shape_cast %47 : vector<1x1x32xf32> to vector<1x32xf32>
    %cst_33 = arith.constant dense<0.000000e+00> : vector<16xf32>
    %49 = vector.multi_reduction <add>, %35, %cst_33 [1] : vector<16x32xf32> to vector<16xf32>
    %50 = vector.shape_cast %49 : vector<16xf32> to vector<16x1xf32>
    %cst_34 = arith.constant 3.200000e+01 : f32
    %51 = vector.broadcast %cst_34 : f32 to vector<16x1xf32>
    %52 = arith.divf %50, %51 : vector<16x1xf32>
    %53 = vector.broadcast %52 : vector<16x1xf32> to vector<16x32xf32>
    %54 = arith.subf %35, %53 : vector<16x32xf32>
    %55 = arith.mulf %54, %54 : vector<16x32xf32>
    %cst_35 = arith.constant dense<0.000000e+00> : vector<16xf32>
    %56 = vector.multi_reduction <add>, %55, %cst_35 [1] : vector<16x32xf32> to vector<16xf32>
    %57 = vector.shape_cast %56 : vector<16xf32> to vector<16x1xf32>
    %cst_36 = arith.constant 3.200000e+01 : f32
    %58 = vector.broadcast %cst_36 : f32 to vector<16x1xf32>
    %59 = arith.divf %57, %58 : vector<16x1xf32>
    %60 = vector.broadcast %52 : vector<16x1xf32> to vector<16x32xf32>
    %61 = arith.subf %35, %60 : vector<16x32xf32>
    %cst_37 = arith.constant 9.99999974E-6 : f32
    %62 = vector.broadcast %cst_37 : f32 to vector<16x1xf32>
    %63 = arith.addf %59, %62 : vector<16x1xf32>
    %64 = math.rsqrt %63 : vector<16x1xf32>
    %65 = vector.broadcast %64 : vector<16x1xf32> to vector<16x32xf32>
    %66 = arith.mulf %61, %65 : vector<16x32xf32>
    %67 = vector.broadcast %46 : vector<1x32xf32> to vector<16x32xf32>
    %68 = arith.mulf %66, %67 : vector<16x32xf32>
    %69 = vector.broadcast %48 : vector<1x32xf32> to vector<16x32xf32>
    %70 = arith.addf %68, %69 : vector<16x32xf32>
    %c0_38 = arith.constant 0 : index
    %c0_39 = arith.constant 0 : index
    %c0_40 = arith.constant 0 : index
    %71 = vector.load %arg12[%c0_38, %c0_39, %c0_40] : memref<2x32x96xf32, #tpu.memory_space<vmem>>, vector<1x32x96xf32>
    %72 = vector.shape_cast %71 : vector<1x32x96xf32> to vector<32x96xf32>
    %cst_41 = arith.constant dense<0.000000e+00> : vector<16x96xf32>
    %73 = tpu.matmul %70, %72, %cst_41 {dimension_numbers = #tpu.dot_dimension_numbers<[1], [0], [0], [1], [0, 0, 1, 1], [], []>} : vector<16x32xf32>, vector<32x96xf32>, vector<16x96xf32> -> vector<16x96xf32>
    %c0_42 = arith.constant 0 : index
    %c0_43 = arith.constant 0 : index
    %c0_44 = arith.constant 0 : index
    %74 = vector.load %arg13[%c0_42, %c0_43, %c0_44] : memref<2x1x96xf32, #tpu.memory_space<vmem>>, vector<1x1x96xf32>
    %75 = vector.shape_cast %74 : vector<1x1x96xf32> to vector<1x96xf32>
    %76 = vector.broadcast %75 : vector<1x96xf32> to vector<16x96xf32>
    %77 = arith.addf %73, %76 : vector<16x96xf32>
    %c0_45 = arith.constant 0 : index
    %c0_46 = arith.constant 0 : index
    %c0_47 = arith.constant 0 : index
    %78 = vector.load %arg14[%c0_45, %c0_46, %c0_47] : memref<2x32x32xf32, #tpu.memory_space<vmem>>, vector<1x32x32xf32>
    %79 = vector.shape_cast %78 : vector<1x32x32xf32> to vector<32x32xf32>
    %cst_48 = arith.constant 0.000000e+00 : f32
    %80 = vector.broadcast %cst_48 : f32 to vector<16x32xf32>
    %81 = vector.extract_strided_slice %77 {offsets = [0, 0], sizes = [16, 8], strides = [1, 1]} : vector<16x96xf32> to vector<16x8xf32>
    %82 = vector.extract_strided_slice %77 {offsets = [0, 32], sizes = [16, 8], strides = [1, 1]} : vector<16x96xf32> to vector<16x8xf32>
    %83 = vector.extract_strided_slice %77 {offsets = [0, 64], sizes = [16, 8], strides = [1, 1]} : vector<16x96xf32> to vector<16x8xf32>
    %cst_49 = arith.constant dense<0.000000e+00> : vector<16x16xf32>
    %84 = tpu.matmul %81, %82, %cst_49 {dimension_numbers = #tpu.dot_dimension_numbers<[1], [1], [0], [0], [0, 0, 1, 0], [], []>} : vector<16x8xf32>, vector<16x8xf32>, vector<16x16xf32> -> vector<16x16xf32>
    %cst_50 = arith.constant 0.353553385 : f32
    %85 = vector.broadcast %cst_50 : f32 to vector<16x16xf32>
    %86 = arith.mulf %84, %85 : vector<16x16xf32>
    %cst_51 = arith.constant -1.000000e+30 : f32
    %87 = vector.broadcast %cst_51 : f32 to vector<16x16xf32>
    %88 = arith.select %44, %86, %87 : vector<16x16xi1>, vector<16x16xf32>
    %cst_52 = arith.constant dense<0xFF800000> : vector<16xf32>
    %89 = vector.multi_reduction <maximumf>, %88, %cst_52 [1] : vector<16x16xf32> to vector<16xf32>
    %90 = vector.shape_cast %89 : vector<16xf32> to vector<16x1xf32>
    %91 = vector.broadcast %90 : vector<16x1xf32> to vector<16x16xf32>
    %92 = arith.subf %88, %91 : vector<16x16xf32>
    %93 = math.exp %92 : vector<16x16xf32>
    %cst_53 = arith.constant dense<0.000000e+00> : vector<16xf32>
    %94 = vector.multi_reduction <add>, %93, %cst_53 [1] : vector<16x16xf32> to vector<16xf32>
    %95 = vector.shape_cast %94 : vector<16xf32> to vector<16x1xf32>
    %96 = tpu.reciprocal %95 {approx = true} : vector<16x1xf32> -> vector<16x1xf32>
    %97 = vector.broadcast %96 : vector<16x1xf32> to vector<16x16xf32>
    %98 = arith.mulf %93, %97 : vector<16x16xf32>
    %cst_54 = arith.constant dense<0.000000e+00> : vector<16x8xf32>
    %99 = tpu.matmul %98, %83, %cst_54 {dimension_numbers = #tpu.dot_dimension_numbers<[1], [0], [0], [1], [0, 0, 1, 1], [], []>} : vector<16x16xf32>, vector<16x8xf32>, vector<16x8xf32> -> vector<16x8xf32>
    %100 = vector.extract_strided_slice %79 {offsets = [0, 0], sizes = [8, 32], strides = [1, 1]} : vector<32x32xf32> to vector<8x32xf32>
    %cst_55 = arith.constant dense<0.000000e+00> : vector<16x32xf32>
    %101 = tpu.matmul %99, %100, %cst_55 {dimension_numbers = #tpu.dot_dimension_numbers<[1], [0], [0], [1], [0, 0, 1, 1], [], []>} : vector<16x8xf32>, vector<8x32xf32>, vector<16x32xf32> -> vector<16x32xf32>
    %102 = arith.addf %80, %101 : vector<16x32xf32>
    %103 = vector.extract_strided_slice %77 {offsets = [0, 8], sizes = [16, 8], strides = [1, 1]} : vector<16x96xf32> to vector<16x8xf32>
    %104 = vector.extract_strided_slice %77 {offsets = [0, 40], sizes = [16, 8], strides = [1, 1]} : vector<16x96xf32> to vector<16x8xf32>
    %105 = vector.extract_strided_slice %77 {offsets = [0, 72], sizes = [16, 8], strides = [1, 1]} : vector<16x96xf32> to vector<16x8xf32>
    %cst_56 = arith.constant dense<0.000000e+00> : vector<16x16xf32>
    %106 = tpu.matmul %103, %104, %cst_56 {dimension_numbers = #tpu.dot_dimension_numbers<[1], [1], [0], [0], [0, 0, 1, 0], [], []>} : vector<16x8xf32>, vector<16x8xf32>, vector<16x16xf32> -> vector<16x16xf32>
    %cst_57 = arith.constant 0.353553385 : f32
    %107 = vector.broadcast %cst_57 : f32 to vector<16x16xf32>
    %108 = arith.mulf %106, %107 : vector<16x16xf32>
    %cst_58 = arith.constant -1.000000e+30 : f32
    %109 = vector.broadcast %cst_58 : f32 to vector<16x16xf32>
    %110 = arith.select %44, %108, %109 : vector<16x16xi1>, vector<16x16xf32>
    %cst_59 = arith.constant dense<0xFF800000> : vector<16xf32>
    %111 = vector.multi_reduction <maximumf>, %110, %cst_59 [1] : vector<16x16xf32> to vector<16xf32>
    %112 = vector.shape_cast %111 : vector<16xf32> to vector<16x1xf32>
    %113 = vector.broadcast %112 : vector<16x1xf32> to vector<16x16xf32>
    %114 = arith.subf %110, %113 : vector<16x16xf32>
    %115 = math.exp %114 : vector<16x16xf32>
    %cst_60 = arith.constant dense<0.000000e+00> : vector<16xf32>
    %116 = vector.multi_reduction <add>, %115, %cst_60 [1] : vector<16x16xf32> to vector<16xf32>
    %117 = vector.shape_cast %116 : vector<16xf32> to vector<16x1xf32>
    %118 = tpu.reciprocal %117 {approx = true} : vector<16x1xf32> -> vector<16x1xf32>
    %119 = vector.broadcast %118 : vector<16x1xf32> to vector<16x16xf32>
    %120 = arith.mulf %115, %119 : vector<16x16xf32>
    %cst_61 = arith.constant dense<0.000000e+00> : vector<16x8xf32>
    %121 = tpu.matmul %120, %105, %cst_61 {dimension_numbers = #tpu.dot_dimension_numbers<[1], [0], [0], [1], [0, 0, 1, 1], [], []>} : vector<16x16xf32>, vector<16x8xf32>, vector<16x8xf32> -> vector<16x8xf32>
    %122 = vector.extract_strided_slice %79 {offsets = [8, 0], sizes = [8, 32], strides = [1, 1]} : vector<32x32xf32> to vector<8x32xf32>
    %cst_62 = arith.constant dense<0.000000e+00> : vector<16x32xf32>
    %123 = tpu.matmul %121, %122, %cst_62 {dimension_numbers = #tpu.dot_dimension_numbers<[1], [0], [0], [1], [0, 0, 1, 1], [], []>} : vector<16x8xf32>, vector<8x32xf32>, vector<16x32xf32> -> vector<16x32xf32>
    %124 = arith.addf %102, %123 : vector<16x32xf32>
    %125 = vector.extract_strided_slice %77 {offsets = [0, 16], sizes = [16, 8], strides = [1, 1]} : vector<16x96xf32> to vector<16x8xf32>
    %126 = vector.extract_strided_slice %77 {offsets = [0, 48], sizes = [16, 8], strides = [1, 1]} : vector<16x96xf32> to vector<16x8xf32>
    %127 = vector.extract_strided_slice %77 {offsets = [0, 80], sizes = [16, 8], strides = [1, 1]} : vector<16x96xf32> to vector<16x8xf32>
    %cst_63 = arith.constant dense<0.000000e+00> : vector<16x16xf32>
    %128 = tpu.matmul %125, %126, %cst_63 {dimension_numbers = #tpu.dot_dimension_numbers<[1], [1], [0], [0], [0, 0, 1, 0], [], []>} : vector<16x8xf32>, vector<16x8xf32>, vector<16x16xf32> -> vector<16x16xf32>
    %cst_64 = arith.constant 0.353553385 : f32
    %129 = vector.broadcast %cst_64 : f32 to vector<16x16xf32>
    %130 = arith.mulf %128, %129 : vector<16x16xf32>
    %cst_65 = arith.constant -1.000000e+30 : f32
    %131 = vector.broadcast %cst_65 : f32 to vector<16x16xf32>
    %132 = arith.select %44, %130, %131 : vector<16x16xi1>, vector<16x16xf32>
    %cst_66 = arith.constant dense<0xFF800000> : vector<16xf32>
    %133 = vector.multi_reduction <maximumf>, %132, %cst_66 [1] : vector<16x16xf32> to vector<16xf32>
    %134 = vector.shape_cast %133 : vector<16xf32> to vector<16x1xf32>
    %135 = vector.broadcast %134 : vector<16x1xf32> to vector<16x16xf32>
    %136 = arith.subf %132, %135 : vector<16x16xf32>
    %137 = math.exp %136 : vector<16x16xf32>
    %cst_67 = arith.constant dense<0.000000e+00> : vector<16xf32>
    %138 = vector.multi_reduction <add>, %137, %cst_67 [1] : vector<16x16xf32> to vector<16xf32>
    %139 = vector.shape_cast %138 : vector<16xf32> to vector<16x1xf32>
    %140 = tpu.reciprocal %139 {approx = true} : vector<16x1xf32> -> vector<16x1xf32>
    %141 = vector.broadcast %140 : vector<16x1xf32> to vector<16x16xf32>
    %142 = arith.mulf %137, %141 : vector<16x16xf32>
    %cst_68 = arith.constant dense<0.000000e+00> : vector<16x8xf32>
    %143 = tpu.matmul %142, %127, %cst_68 {dimension_numbers = #tpu.dot_dimension_numbers<[1], [0], [0], [1], [0, 0, 1, 1], [], []>} : vector<16x16xf32>, vector<16x8xf32>, vector<16x8xf32> -> vector<16x8xf32>
    %144 = vector.extract_strided_slice %79 {offsets = [16, 0], sizes = [8, 32], strides = [1, 1]} : vector<32x32xf32> to vector<8x32xf32>
    %cst_69 = arith.constant dense<0.000000e+00> : vector<16x32xf32>
    %145 = tpu.matmul %143, %144, %cst_69 {dimension_numbers = #tpu.dot_dimension_numbers<[1], [0], [0], [1], [0, 0, 1, 1], [], []>} : vector<16x8xf32>, vector<8x32xf32>, vector<16x32xf32> -> vector<16x32xf32>
    %146 = arith.addf %124, %145 : vector<16x32xf32>
    %147 = vector.extract_strided_slice %77 {offsets = [0, 24], sizes = [16, 8], strides = [1, 1]} : vector<16x96xf32> to vector<16x8xf32>
    %148 = vector.extract_strided_slice %77 {offsets = [0, 56], sizes = [16, 8], strides = [1, 1]} : vector<16x96xf32> to vector<16x8xf32>
    %149 = vector.extract_strided_slice %77 {offsets = [0, 88], sizes = [16, 8], strides = [1, 1]} : vector<16x96xf32> to vector<16x8xf32>
    %cst_70 = arith.constant dense<0.000000e+00> : vector<16x16xf32>
    %150 = tpu.matmul %147, %148, %cst_70 {dimension_numbers = #tpu.dot_dimension_numbers<[1], [1], [0], [0], [0, 0, 1, 0], [], []>} : vector<16x8xf32>, vector<16x8xf32>, vector<16x16xf32> -> vector<16x16xf32>
    %cst_71 = arith.constant 0.353553385 : f32
    %151 = vector.broadcast %cst_71 : f32 to vector<16x16xf32>
    %152 = arith.mulf %150, %151 : vector<16x16xf32>
    %cst_72 = arith.constant -1.000000e+30 : f32
    %153 = vector.broadcast %cst_72 : f32 to vector<16x16xf32>
    %154 = arith.select %44, %152, %153 : vector<16x16xi1>, vector<16x16xf32>
    %cst_73 = arith.constant dense<0xFF800000> : vector<16xf32>
    %155 = vector.multi_reduction <maximumf>, %154, %cst_73 [1] : vector<16x16xf32> to vector<16xf32>
    %156 = vector.shape_cast %155 : vector<16xf32> to vector<16x1xf32>
    %157 = vector.broadcast %156 : vector<16x1xf32> to vector<16x16xf32>
    %158 = arith.subf %154, %157 : vector<16x16xf32>
    %159 = math.exp %158 : vector<16x16xf32>
    %cst_74 = arith.constant dense<0.000000e+00> : vector<16xf32>
    %160 = vector.multi_reduction <add>, %159, %cst_74 [1] : vector<16x16xf32> to vector<16xf32>
    %161 = vector.shape_cast %160 : vector<16xf32> to vector<16x1xf32>
    %162 = tpu.reciprocal %161 {approx = true} : vector<16x1xf32> -> vector<16x1xf32>
    %163 = vector.broadcast %162 : vector<16x1xf32> to vector<16x16xf32>
    %164 = arith.mulf %159, %163 : vector<16x16xf32>
    %cst_75 = arith.constant dense<0.000000e+00> : vector<16x8xf32>
    %165 = tpu.matmul %164, %149, %cst_75 {dimension_numbers = #tpu.dot_dimension_numbers<[1], [0], [0], [1], [0, 0, 1, 1], [], []>} : vector<16x16xf32>, vector<16x8xf32>, vector<16x8xf32> -> vector<16x8xf32>
    %166 = vector.extract_strided_slice %79 {offsets = [24, 0], sizes = [8, 32], strides = [1, 1]} : vector<32x32xf32> to vector<8x32xf32>
    %cst_76 = arith.constant dense<0.000000e+00> : vector<16x32xf32>
    %167 = tpu.matmul %165, %166, %cst_76 {dimension_numbers = #tpu.dot_dimension_numbers<[1], [0], [0], [1], [0, 0, 1, 1], [], []>} : vector<16x8xf32>, vector<8x32xf32>, vector<16x32xf32> -> vector<16x32xf32>
    %168 = arith.addf %146, %167 : vector<16x32xf32>
    %169 = arith.addf %35, %168 : vector<16x32xf32>
    %c0_77 = arith.constant 0 : index
    %c0_78 = arith.constant 0 : index
    %c0_79 = arith.constant 0 : index
    %170 = vector.load %arg15[%c0_77, %c0_78, %c0_79] : memref<2x1x32xf32, #tpu.memory_space<vmem>>, vector<1x1x32xf32>
    %171 = vector.shape_cast %170 : vector<1x1x32xf32> to vector<1x32xf32>
    %172 = vector.broadcast %171 : vector<1x32xf32> to vector<16x32xf32>
    %173 = arith.addf %169, %172 : vector<16x32xf32>
    %c0_80 = arith.constant 0 : index
    %c0_81 = arith.constant 0 : index
    %c0_82 = arith.constant 0 : index
    %174 = vector.load %arg16[%c0_80, %c0_81, %c0_82] : memref<2x1x32xf32, #tpu.memory_space<vmem>>, vector<1x1x32xf32>
    %175 = vector.shape_cast %174 : vector<1x1x32xf32> to vector<1x32xf32>
    %c0_83 = arith.constant 0 : index
    %c0_84 = arith.constant 0 : index
    %c0_85 = arith.constant 0 : index
    %176 = vector.load %arg17[%c0_83, %c0_84, %c0_85] : memref<2x1x32xf32, #tpu.memory_space<vmem>>, vector<1x1x32xf32>
    %177 = vector.shape_cast %176 : vector<1x1x32xf32> to vector<1x32xf32>
    %cst_86 = arith.constant dense<0.000000e+00> : vector<16xf32>
    %178 = vector.multi_reduction <add>, %173, %cst_86 [1] : vector<16x32xf32> to vector<16xf32>
    %179 = vector.shape_cast %178 : vector<16xf32> to vector<16x1xf32>
    %cst_87 = arith.constant 3.200000e+01 : f32
    %180 = vector.broadcast %cst_87 : f32 to vector<16x1xf32>
    %181 = arith.divf %179, %180 : vector<16x1xf32>
    %182 = vector.broadcast %181 : vector<16x1xf32> to vector<16x32xf32>
    %183 = arith.subf %173, %182 : vector<16x32xf32>
    %184 = arith.mulf %183, %183 : vector<16x32xf32>
    %cst_88 = arith.constant dense<0.000000e+00> : vector<16xf32>
    %185 = vector.multi_reduction <add>, %184, %cst_88 [1] : vector<16x32xf32> to vector<16xf32>
    %186 = vector.shape_cast %185 : vector<16xf32> to vector<16x1xf32>
    %cst_89 = arith.constant 3.200000e+01 : f32
    %187 = vector.broadcast %cst_89 : f32 to vector<16x1xf32>
    %188 = arith.divf %186, %187 : vector<16x1xf32>
    %189 = vector.broadcast %181 : vector<16x1xf32> to vector<16x32xf32>
    %190 = arith.subf %173, %189 : vector<16x32xf32>
    %cst_90 = arith.constant 9.99999974E-6 : f32
    %191 = vector.broadcast %cst_90 : f32 to vector<16x1xf32>
    %192 = arith.addf %188, %191 : vector<16x1xf32>
    %193 = math.rsqrt %192 : vector<16x1xf32>
    %194 = vector.broadcast %193 : vector<16x1xf32> to vector<16x32xf32>
    %195 = arith.mulf %190, %194 : vector<16x32xf32>
    %196 = vector.broadcast %175 : vector<1x32xf32> to vector<16x32xf32>
    %197 = arith.mulf %195, %196 : vector<16x32xf32>
    %198 = vector.broadcast %177 : vector<1x32xf32> to vector<16x32xf32>
    %199 = arith.addf %197, %198 : vector<16x32xf32>
    %c0_91 = arith.constant 0 : index
    %c0_92 = arith.constant 0 : index
    %c0_93 = arith.constant 0 : index
    %200 = vector.load %arg18[%c0_91, %c0_92, %c0_93] : memref<2x32x128xf32, #tpu.memory_space<vmem>>, vector<1x32x128xf32>
    %201 = vector.shape_cast %200 : vector<1x32x128xf32> to vector<32x128xf32>
    %cst_94 = arith.constant dense<0.000000e+00> : vector<16x128xf32>
    %202 = tpu.matmul %199, %201, %cst_94 {dimension_numbers = #tpu.dot_dimension_numbers<[1], [0], [0], [1], [0, 0, 1, 1], [], []>} : vector<16x32xf32>, vector<32x128xf32>, vector<16x128xf32> -> vector<16x128xf32>
    %c0_95 = arith.constant 0 : index
    %c0_96 = arith.constant 0 : index
    %c0_97 = arith.constant 0 : index
    %203 = vector.load %arg19[%c0_95, %c0_96, %c0_97] : memref<2x1x128xf32, #tpu.memory_space<vmem>>, vector<1x1x128xf32>
    %204 = vector.shape_cast %203 : vector<1x1x128xf32> to vector<1x128xf32>
    %205 = vector.broadcast %204 : vector<1x128xf32> to vector<16x128xf32>
    %206 = arith.addf %202, %205 : vector<16x128xf32>
    %cst_98 = arith.constant 0.000000e+00 : f32
    %207 = vector.broadcast %cst_98 : f32 to vector<16x128xf32>
    %208 = arith.maximumf %206, %207 : vector<16x128xf32>
    %c0_99 = arith.constant 0 : index
    %c0_100 = arith.constant 0 : index
    %c0_101 = arith.constant 0 : index
    %209 = vector.load %arg20[%c0_99, %c0_100, %c0_101] : memref<2x128x32xf32, #tpu.memory_space<vmem>>, vector<1x128x32xf32>
    %210 = vector.shape_cast %209 : vector<1x128x32xf32> to vector<128x32xf32>
    %cst_102 = arith.constant dense<0.000000e+00> : vector<16x32xf32>
    %211 = tpu.matmul %208, %210, %cst_102 {dimension_numbers = #tpu.dot_dimension_numbers<[1], [0], [0], [1], [0, 0, 1, 1], [], []>} : vector<16x128xf32>, vector<128x32xf32>, vector<16x32xf32> -> vector<16x32xf32>
    %c0_103 = arith.constant 0 : index
    %c0_104 = arith.constant 0 : index
    %c0_105 = arith.constant 0 : index
    %212 = vector.load %arg21[%c0_103, %c0_104, %c0_105] : memref<2x1x32xf32, #tpu.memory_space<vmem>>, vector<1x1x32xf32>
    %213 = vector.shape_cast %212 : vector<1x1x32xf32> to vector<1x32xf32>
    %214 = vector.broadcast %213 : vector<1x32xf32> to vector<16x32xf32>
    %215 = arith.addf %211, %214 : vector<16x32xf32>
    %216 = arith.addf %173, %215 : vector<16x32xf32>
    %c1 = arith.constant 1 : index
    %c0_106 = arith.constant 0 : index
    %c0_107 = arith.constant 0 : index
    %217 = vector.load %arg10[%c1, %c0_106, %c0_107] : memref<2x1x32xf32, #tpu.memory_space<vmem>>, vector<1x1x32xf32>
    %218 = vector.shape_cast %217 : vector<1x1x32xf32> to vector<1x32xf32>
    %c1_108 = arith.constant 1 : index
    %c0_109 = arith.constant 0 : index
    %c0_110 = arith.constant 0 : index
    %219 = vector.load %arg11[%c1_108, %c0_109, %c0_110] : memref<2x1x32xf32, #tpu.memory_space<vmem>>, vector<1x1x32xf32>
    %220 = vector.shape_cast %219 : vector<1x1x32xf32> to vector<1x32xf32>
    %cst_111 = arith.constant dense<0.000000e+00> : vector<16xf32>
    %221 = vector.multi_reduction <add>, %216, %cst_111 [1] : vector<16x32xf32> to vector<16xf32>
    %222 = vector.shape_cast %221 : vector<16xf32> to vector<16x1xf32>
    %cst_112 = arith.constant 3.200000e+01 : f32
    %223 = vector.broadcast %cst_112 : f32 to vector<16x1xf32>
    %224 = arith.divf %222, %223 : vector<16x1xf32>
    %225 = vector.broadcast %224 : vector<16x1xf32> to vector<16x32xf32>
    %226 = arith.subf %216, %225 : vector<16x32xf32>
    %227 = arith.mulf %226, %226 : vector<16x32xf32>
    %cst_113 = arith.constant dense<0.000000e+00> : vector<16xf32>
    %228 = vector.multi_reduction <add>, %227, %cst_113 [1] : vector<16x32xf32> to vector<16xf32>
    %229 = vector.shape_cast %228 : vector<16xf32> to vector<16x1xf32>
    %cst_114 = arith.constant 3.200000e+01 : f32
    %230 = vector.broadcast %cst_114 : f32 to vector<16x1xf32>
    %231 = arith.divf %229, %230 : vector<16x1xf32>
    %232 = vector.broadcast %224 : vector<16x1xf32> to vector<16x32xf32>
    %233 = arith.subf %216, %232 : vector<16x32xf32>
    %cst_115 = arith.constant 9.99999974E-6 : f32
    %234 = vector.broadcast %cst_115 : f32 to vector<16x1xf32>
    %235 = arith.addf %231, %234 : vector<16x1xf32>
    %236 = math.rsqrt %235 : vector<16x1xf32>
    %237 = vector.broadcast %236 : vector<16x1xf32> to vector<16x32xf32>
    %238 = arith.mulf %233, %237 : vector<16x32xf32>
    %239 = vector.broadcast %218 : vector<1x32xf32> to vector<16x32xf32>
    %240 = arith.mulf %238, %239 : vector<16x32xf32>
    %241 = vector.broadcast %220 : vector<1x32xf32> to vector<16x32xf32>
    %242 = arith.addf %240, %241 : vector<16x32xf32>
    %c1_116 = arith.constant 1 : index
    %c0_117 = arith.constant 0 : index
    %c0_118 = arith.constant 0 : index
    %243 = vector.load %arg12[%c1_116, %c0_117, %c0_118] : memref<2x32x96xf32, #tpu.memory_space<vmem>>, vector<1x32x96xf32>
    %244 = vector.shape_cast %243 : vector<1x32x96xf32> to vector<32x96xf32>
    %cst_119 = arith.constant dense<0.000000e+00> : vector<16x96xf32>
    %245 = tpu.matmul %242, %244, %cst_119 {dimension_numbers = #tpu.dot_dimension_numbers<[1], [0], [0], [1], [0, 0, 1, 1], [], []>} : vector<16x32xf32>, vector<32x96xf32>, vector<16x96xf32> -> vector<16x96xf32>
    %c1_120 = arith.constant 1 : index
    %c0_121 = arith.constant 0 : index
    %c0_122 = arith.constant 0 : index
    %246 = vector.load %arg13[%c1_120, %c0_121, %c0_122] : memref<2x1x96xf32, #tpu.memory_space<vmem>>, vector<1x1x96xf32>
    %247 = vector.shape_cast %246 : vector<1x1x96xf32> to vector<1x96xf32>
    %248 = vector.broadcast %247 : vector<1x96xf32> to vector<16x96xf32>
    %249 = arith.addf %245, %248 : vector<16x96xf32>
    %c1_123 = arith.constant 1 : index
    %c0_124 = arith.constant 0 : index
    %c0_125 = arith.constant 0 : index
    %250 = vector.load %arg14[%c1_123, %c0_124, %c0_125] : memref<2x32x32xf32, #tpu.memory_space<vmem>>, vector<1x32x32xf32>
    %251 = vector.shape_cast %250 : vector<1x32x32xf32> to vector<32x32xf32>
    %cst_126 = arith.constant 0.000000e+00 : f32
    %252 = vector.broadcast %cst_126 : f32 to vector<16x32xf32>
    %253 = vector.extract_strided_slice %249 {offsets = [0, 0], sizes = [16, 8], strides = [1, 1]} : vector<16x96xf32> to vector<16x8xf32>
    %254 = vector.extract_strided_slice %249 {offsets = [0, 32], sizes = [16, 8], strides = [1, 1]} : vector<16x96xf32> to vector<16x8xf32>
    %255 = vector.extract_strided_slice %249 {offsets = [0, 64], sizes = [16, 8], strides = [1, 1]} : vector<16x96xf32> to vector<16x8xf32>
    %cst_127 = arith.constant dense<0.000000e+00> : vector<16x16xf32>
    %256 = tpu.matmul %253, %254, %cst_127 {dimension_numbers = #tpu.dot_dimension_numbers<[1], [1], [0], [0], [0, 0, 1, 0], [], []>} : vector<16x8xf32>, vector<16x8xf32>, vector<16x16xf32> -> vector<16x16xf32>
    %cst_128 = arith.constant 0.353553385 : f32
    %257 = vector.broadcast %cst_128 : f32 to vector<16x16xf32>
    %258 = arith.mulf %256, %257 : vector<16x16xf32>
    %cst_129 = arith.constant -1.000000e+30 : f32
    %259 = vector.broadcast %cst_129 : f32 to vector<16x16xf32>
    %260 = arith.select %44, %258, %259 : vector<16x16xi1>, vector<16x16xf32>
    %cst_130 = arith.constant dense<0xFF800000> : vector<16xf32>
    %261 = vector.multi_reduction <maximumf>, %260, %cst_130 [1] : vector<16x16xf32> to vector<16xf32>
    %262 = vector.shape_cast %261 : vector<16xf32> to vector<16x1xf32>
    %263 = vector.broadcast %262 : vector<16x1xf32> to vector<16x16xf32>
    %264 = arith.subf %260, %263 : vector<16x16xf32>
    %265 = math.exp %264 : vector<16x16xf32>
    %cst_131 = arith.constant dense<0.000000e+00> : vector<16xf32>
    %266 = vector.multi_reduction <add>, %265, %cst_131 [1] : vector<16x16xf32> to vector<16xf32>
    %267 = vector.shape_cast %266 : vector<16xf32> to vector<16x1xf32>
    %268 = tpu.reciprocal %267 {approx = true} : vector<16x1xf32> -> vector<16x1xf32>
    %269 = vector.broadcast %268 : vector<16x1xf32> to vector<16x16xf32>
    %270 = arith.mulf %265, %269 : vector<16x16xf32>
    %cst_132 = arith.constant dense<0.000000e+00> : vector<16x8xf32>
    %271 = tpu.matmul %270, %255, %cst_132 {dimension_numbers = #tpu.dot_dimension_numbers<[1], [0], [0], [1], [0, 0, 1, 1], [], []>} : vector<16x16xf32>, vector<16x8xf32>, vector<16x8xf32> -> vector<16x8xf32>
    %272 = vector.extract_strided_slice %251 {offsets = [0, 0], sizes = [8, 32], strides = [1, 1]} : vector<32x32xf32> to vector<8x32xf32>
    %cst_133 = arith.constant dense<0.000000e+00> : vector<16x32xf32>
    %273 = tpu.matmul %271, %272, %cst_133 {dimension_numbers = #tpu.dot_dimension_numbers<[1], [0], [0], [1], [0, 0, 1, 1], [], []>} : vector<16x8xf32>, vector<8x32xf32>, vector<16x32xf32> -> vector<16x32xf32>
    %274 = arith.addf %252, %273 : vector<16x32xf32>
    %275 = vector.extract_strided_slice %249 {offsets = [0, 8], sizes = [16, 8], strides = [1, 1]} : vector<16x96xf32> to vector<16x8xf32>
    %276 = vector.extract_strided_slice %249 {offsets = [0, 40], sizes = [16, 8], strides = [1, 1]} : vector<16x96xf32> to vector<16x8xf32>
    %277 = vector.extract_strided_slice %249 {offsets = [0, 72], sizes = [16, 8], strides = [1, 1]} : vector<16x96xf32> to vector<16x8xf32>
    %cst_134 = arith.constant dense<0.000000e+00> : vector<16x16xf32>
    %278 = tpu.matmul %275, %276, %cst_134 {dimension_numbers = #tpu.dot_dimension_numbers<[1], [1], [0], [0], [0, 0, 1, 0], [], []>} : vector<16x8xf32>, vector<16x8xf32>, vector<16x16xf32> -> vector<16x16xf32>
    %cst_135 = arith.constant 0.353553385 : f32
    %279 = vector.broadcast %cst_135 : f32 to vector<16x16xf32>
    %280 = arith.mulf %278, %279 : vector<16x16xf32>
    %cst_136 = arith.constant -1.000000e+30 : f32
    %281 = vector.broadcast %cst_136 : f32 to vector<16x16xf32>
    %282 = arith.select %44, %280, %281 : vector<16x16xi1>, vector<16x16xf32>
    %cst_137 = arith.constant dense<0xFF800000> : vector<16xf32>
    %283 = vector.multi_reduction <maximumf>, %282, %cst_137 [1] : vector<16x16xf32> to vector<16xf32>
    %284 = vector.shape_cast %283 : vector<16xf32> to vector<16x1xf32>
    %285 = vector.broadcast %284 : vector<16x1xf32> to vector<16x16xf32>
    %286 = arith.subf %282, %285 : vector<16x16xf32>
    %287 = math.exp %286 : vector<16x16xf32>
    %cst_138 = arith.constant dense<0.000000e+00> : vector<16xf32>
    %288 = vector.multi_reduction <add>, %287, %cst_138 [1] : vector<16x16xf32> to vector<16xf32>
    %289 = vector.shape_cast %288 : vector<16xf32> to vector<16x1xf32>
    %290 = tpu.reciprocal %289 {approx = true} : vector<16x1xf32> -> vector<16x1xf32>
    %291 = vector.broadcast %290 : vector<16x1xf32> to vector<16x16xf32>
    %292 = arith.mulf %287, %291 : vector<16x16xf32>
    %cst_139 = arith.constant dense<0.000000e+00> : vector<16x8xf32>
    %293 = tpu.matmul %292, %277, %cst_139 {dimension_numbers = #tpu.dot_dimension_numbers<[1], [0], [0], [1], [0, 0, 1, 1], [], []>} : vector<16x16xf32>, vector<16x8xf32>, vector<16x8xf32> -> vector<16x8xf32>
    %294 = vector.extract_strided_slice %251 {offsets = [8, 0], sizes = [8, 32], strides = [1, 1]} : vector<32x32xf32> to vector<8x32xf32>
    %cst_140 = arith.constant dense<0.000000e+00> : vector<16x32xf32>
    %295 = tpu.matmul %293, %294, %cst_140 {dimension_numbers = #tpu.dot_dimension_numbers<[1], [0], [0], [1], [0, 0, 1, 1], [], []>} : vector<16x8xf32>, vector<8x32xf32>, vector<16x32xf32> -> vector<16x32xf32>
    %296 = arith.addf %274, %295 : vector<16x32xf32>
    %297 = vector.extract_strided_slice %249 {offsets = [0, 16], sizes = [16, 8], strides = [1, 1]} : vector<16x96xf32> to vector<16x8xf32>
    %298 = vector.extract_strided_slice %249 {offsets = [0, 48], sizes = [16, 8], strides = [1, 1]} : vector<16x96xf32> to vector<16x8xf32>
    %299 = vector.extract_strided_slice %249 {offsets = [0, 80], sizes = [16, 8], strides = [1, 1]} : vector<16x96xf32> to vector<16x8xf32>
    %cst_141 = arith.constant dense<0.000000e+00> : vector<16x16xf32>
    %300 = tpu.matmul %297, %298, %cst_141 {dimension_numbers = #tpu.dot_dimension_numbers<[1], [1], [0], [0], [0, 0, 1, 0], [], []>} : vector<16x8xf32>, vector<16x8xf32>, vector<16x16xf32> -> vector<16x16xf32>
    %cst_142 = arith.constant 0.353553385 : f32
    %301 = vector.broadcast %cst_142 : f32 to vector<16x16xf32>
    %302 = arith.mulf %300, %301 : vector<16x16xf32>
    %cst_143 = arith.constant -1.000000e+30 : f32
    %303 = vector.broadcast %cst_143 : f32 to vector<16x16xf32>
    %304 = arith.select %44, %302, %303 : vector<16x16xi1>, vector<16x16xf32>
    %cst_144 = arith.constant dense<0xFF800000> : vector<16xf32>
    %305 = vector.multi_reduction <maximumf>, %304, %cst_144 [1] : vector<16x16xf32> to vector<16xf32>
    %306 = vector.shape_cast %305 : vector<16xf32> to vector<16x1xf32>
    %307 = vector.broadcast %306 : vector<16x1xf32> to vector<16x16xf32>
    %308 = arith.subf %304, %307 : vector<16x16xf32>
    %309 = math.exp %308 : vector<16x16xf32>
    %cst_145 = arith.constant dense<0.000000e+00> : vector<16xf32>
    %310 = vector.multi_reduction <add>, %309, %cst_145 [1] : vector<16x16xf32> to vector<16xf32>
    %311 = vector.shape_cast %310 : vector<16xf32> to vector<16x1xf32>
    %312 = tpu.reciprocal %311 {approx = true} : vector<16x1xf32> -> vector<16x1xf32>
    %313 = vector.broadcast %312 : vector<16x1xf32> to vector<16x16xf32>
    %314 = arith.mulf %309, %313 : vector<16x16xf32>
    %cst_146 = arith.constant dense<0.000000e+00> : vector<16x8xf32>
    %315 = tpu.matmul %314, %299, %cst_146 {dimension_numbers = #tpu.dot_dimension_numbers<[1], [0], [0], [1], [0, 0, 1, 1], [], []>} : vector<16x16xf32>, vector<16x8xf32>, vector<16x8xf32> -> vector<16x8xf32>
    %316 = vector.extract_strided_slice %251 {offsets = [16, 0], sizes = [8, 32], strides = [1, 1]} : vector<32x32xf32> to vector<8x32xf32>
    %cst_147 = arith.constant dense<0.000000e+00> : vector<16x32xf32>
    %317 = tpu.matmul %315, %316, %cst_147 {dimension_numbers = #tpu.dot_dimension_numbers<[1], [0], [0], [1], [0, 0, 1, 1], [], []>} : vector<16x8xf32>, vector<8x32xf32>, vector<16x32xf32> -> vector<16x32xf32>
    %318 = arith.addf %296, %317 : vector<16x32xf32>
    %319 = vector.extract_strided_slice %249 {offsets = [0, 24], sizes = [16, 8], strides = [1, 1]} : vector<16x96xf32> to vector<16x8xf32>
    %320 = vector.extract_strided_slice %249 {offsets = [0, 56], sizes = [16, 8], strides = [1, 1]} : vector<16x96xf32> to vector<16x8xf32>
    %321 = vector.extract_strided_slice %249 {offsets = [0, 88], sizes = [16, 8], strides = [1, 1]} : vector<16x96xf32> to vector<16x8xf32>
    %cst_148 = arith.constant dense<0.000000e+00> : vector<16x16xf32>
    %322 = tpu.matmul %319, %320, %cst_148 {dimension_numbers = #tpu.dot_dimension_numbers<[1], [1], [0], [0], [0, 0, 1, 0], [], []>} : vector<16x8xf32>, vector<16x8xf32>, vector<16x16xf32> -> vector<16x16xf32>
    %cst_149 = arith.constant 0.353553385 : f32
    %323 = vector.broadcast %cst_149 : f32 to vector<16x16xf32>
    %324 = arith.mulf %322, %323 : vector<16x16xf32>
    %cst_150 = arith.constant -1.000000e+30 : f32
    %325 = vector.broadcast %cst_150 : f32 to vector<16x16xf32>
    %326 = arith.select %44, %324, %325 : vector<16x16xi1>, vector<16x16xf32>
    %cst_151 = arith.constant dense<0xFF800000> : vector<16xf32>
    %327 = vector.multi_reduction <maximumf>, %326, %cst_151 [1] : vector<16x16xf32> to vector<16xf32>
    %328 = vector.shape_cast %327 : vector<16xf32> to vector<16x1xf32>
    %329 = vector.broadcast %328 : vector<16x1xf32> to vector<16x16xf32>
    %330 = arith.subf %326, %329 : vector<16x16xf32>
    %331 = math.exp %330 : vector<16x16xf32>
    %cst_152 = arith.constant dense<0.000000e+00> : vector<16xf32>
    %332 = vector.multi_reduction <add>, %331, %cst_152 [1] : vector<16x16xf32> to vector<16xf32>
    %333 = vector.shape_cast %332 : vector<16xf32> to vector<16x1xf32>
    %334 = tpu.reciprocal %333 {approx = true} : vector<16x1xf32> -> vector<16x1xf32>
    %335 = vector.broadcast %334 : vector<16x1xf32> to vector<16x16xf32>
    %336 = arith.mulf %331, %335 : vector<16x16xf32>
    %cst_153 = arith.constant dense<0.000000e+00> : vector<16x8xf32>
    %337 = tpu.matmul %336, %321, %cst_153 {dimension_numbers = #tpu.dot_dimension_numbers<[1], [0], [0], [1], [0, 0, 1, 1], [], []>} : vector<16x16xf32>, vector<16x8xf32>, vector<16x8xf32> -> vector<16x8xf32>
    %338 = vector.extract_strided_slice %251 {offsets = [24, 0], sizes = [8, 32], strides = [1, 1]} : vector<32x32xf32> to vector<8x32xf32>
    %cst_154 = arith.constant dense<0.000000e+00> : vector<16x32xf32>
    %339 = tpu.matmul %337, %338, %cst_154 {dimension_numbers = #tpu.dot_dimension_numbers<[1], [0], [0], [1], [0, 0, 1, 1], [], []>} : vector<16x8xf32>, vector<8x32xf32>, vector<16x32xf32> -> vector<16x32xf32>
    %340 = arith.addf %318, %339 : vector<16x32xf32>
    %341 = arith.addf %216, %340 : vector<16x32xf32>
    %c1_155 = arith.constant 1 : index
    %c0_156 = arith.constant 0 : index
    %c0_157 = arith.constant 0 : index
    %342 = vector.load %arg15[%c1_155, %c0_156, %c0_157] : memref<2x1x32xf32, #tpu.memory_space<vmem>>, vector<1x1x32xf32>
    %343 = vector.shape_cast %342 : vector<1x1x32xf32> to vector<1x32xf32>
    %344 = vector.broadcast %343 : vector<1x32xf32> to vector<16x32xf32>
    %345 = arith.addf %341, %344 : vector<16x32xf32>
    %c1_158 = arith.constant 1 : index
    %c0_159 = arith.constant 0 : index
    %c0_160 = arith.constant 0 : index
    %346 = vector.load %arg16[%c1_158, %c0_159, %c0_160] : memref<2x1x32xf32, #tpu.memory_space<vmem>>, vector<1x1x32xf32>
    %347 = vector.shape_cast %346 : vector<1x1x32xf32> to vector<1x32xf32>
    %c1_161 = arith.constant 1 : index
    %c0_162 = arith.constant 0 : index
    %c0_163 = arith.constant 0 : index
    %348 = vector.load %arg17[%c1_161, %c0_162, %c0_163] : memref<2x1x32xf32, #tpu.memory_space<vmem>>, vector<1x1x32xf32>
    %349 = vector.shape_cast %348 : vector<1x1x32xf32> to vector<1x32xf32>
    %cst_164 = arith.constant dense<0.000000e+00> : vector<16xf32>
    %350 = vector.multi_reduction <add>, %345, %cst_164 [1] : vector<16x32xf32> to vector<16xf32>
    %351 = vector.shape_cast %350 : vector<16xf32> to vector<16x1xf32>
    %cst_165 = arith.constant 3.200000e+01 : f32
    %352 = vector.broadcast %cst_165 : f32 to vector<16x1xf32>
    %353 = arith.divf %351, %352 : vector<16x1xf32>
    %354 = vector.broadcast %353 : vector<16x1xf32> to vector<16x32xf32>
    %355 = arith.subf %345, %354 : vector<16x32xf32>
    %356 = arith.mulf %355, %355 : vector<16x32xf32>
    %cst_166 = arith.constant dense<0.000000e+00> : vector<16xf32>
    %357 = vector.multi_reduction <add>, %356, %cst_166 [1] : vector<16x32xf32> to vector<16xf32>
    %358 = vector.shape_cast %357 : vector<16xf32> to vector<16x1xf32>
    %cst_167 = arith.constant 3.200000e+01 : f32
    %359 = vector.broadcast %cst_167 : f32 to vector<16x1xf32>
    %360 = arith.divf %358, %359 : vector<16x1xf32>
    %361 = vector.broadcast %353 : vector<16x1xf32> to vector<16x32xf32>
    %362 = arith.subf %345, %361 : vector<16x32xf32>
    %cst_168 = arith.constant 9.99999974E-6 : f32
    %363 = vector.broadcast %cst_168 : f32 to vector<16x1xf32>
    %364 = arith.addf %360, %363 : vector<16x1xf32>
    %365 = math.rsqrt %364 : vector<16x1xf32>
    %366 = vector.broadcast %365 : vector<16x1xf32> to vector<16x32xf32>
    %367 = arith.mulf %362, %366 : vector<16x32xf32>
    %368 = vector.broadcast %347 : vector<1x32xf32> to vector<16x32xf32>
    %369 = arith.mulf %367, %368 : vector<16x32xf32>
    %370 = vector.broadcast %349 : vector<1x32xf32> to vector<16x32xf32>
    %371 = arith.addf %369, %370 : vector<16x32xf32>
    %c1_169 = arith.constant 1 : index
    %c0_170 = arith.constant 0 : index
    %c0_171 = arith.constant 0 : index
    %372 = vector.load %arg18[%c1_169, %c0_170, %c0_171] : memref<2x32x128xf32, #tpu.memory_space<vmem>>, vector<1x32x128xf32>
    %373 = vector.shape_cast %372 : vector<1x32x128xf32> to vector<32x128xf32>
    %cst_172 = arith.constant dense<0.000000e+00> : vector<16x128xf32>
    %374 = tpu.matmul %371, %373, %cst_172 {dimension_numbers = #tpu.dot_dimension_numbers<[1], [0], [0], [1], [0, 0, 1, 1], [], []>} : vector<16x32xf32>, vector<32x128xf32>, vector<16x128xf32> -> vector<16x128xf32>
    %c1_173 = arith.constant 1 : index
    %c0_174 = arith.constant 0 : index
    %c0_175 = arith.constant 0 : index
    %375 = vector.load %arg19[%c1_173, %c0_174, %c0_175] : memref<2x1x128xf32, #tpu.memory_space<vmem>>, vector<1x1x128xf32>
    %376 = vector.shape_cast %375 : vector<1x1x128xf32> to vector<1x128xf32>
    %377 = vector.broadcast %376 : vector<1x128xf32> to vector<16x128xf32>
    %378 = arith.addf %374, %377 : vector<16x128xf32>
    %cst_176 = arith.constant 0.000000e+00 : f32
    %379 = vector.broadcast %cst_176 : f32 to vector<16x128xf32>
    %380 = arith.maximumf %378, %379 : vector<16x128xf32>
    %c1_177 = arith.constant 1 : index
    %c0_178 = arith.constant 0 : index
    %c0_179 = arith.constant 0 : index
    %381 = vector.load %arg20[%c1_177, %c0_178, %c0_179] : memref<2x128x32xf32, #tpu.memory_space<vmem>>, vector<1x128x32xf32>
    %382 = vector.shape_cast %381 : vector<1x128x32xf32> to vector<128x32xf32>
    %cst_180 = arith.constant dense<0.000000e+00> : vector<16x32xf32>
    %383 = tpu.matmul %380, %382, %cst_180 {dimension_numbers = #tpu.dot_dimension_numbers<[1], [0], [0], [1], [0, 0, 1, 1], [], []>} : vector<16x128xf32>, vector<128x32xf32>, vector<16x32xf32> -> vector<16x32xf32>
    %c1_181 = arith.constant 1 : index
    %c0_182 = arith.constant 0 : index
    %c0_183 = arith.constant 0 : index
    %384 = vector.load %arg21[%c1_181, %c0_182, %c0_183] : memref<2x1x32xf32, #tpu.memory_space<vmem>>, vector<1x1x32xf32>
    %385 = vector.shape_cast %384 : vector<1x1x32xf32> to vector<1x32xf32>
    %386 = vector.broadcast %385 : vector<1x32xf32> to vector<16x32xf32>
    %387 = arith.addf %383, %386 : vector<16x32xf32>
    %388 = arith.addf %345, %387 : vector<16x32xf32>
    %c0_184 = arith.constant 0 : index
    %c0_185 = arith.constant 0 : index
    %389 = vector.load %arg22[%c0_184, %c0_185] : memref<1x32xf32, #tpu.memory_space<vmem>>, vector<1x32xf32>
    %c0_186 = arith.constant 0 : index
    %c0_187 = arith.constant 0 : index
    %390 = vector.load %arg23[%c0_186, %c0_187] : memref<1x32xf32, #tpu.memory_space<vmem>>, vector<1x32xf32>
    %cst_188 = arith.constant dense<0.000000e+00> : vector<16xf32>
    %391 = vector.multi_reduction <add>, %388, %cst_188 [1] : vector<16x32xf32> to vector<16xf32>
    %392 = vector.shape_cast %391 : vector<16xf32> to vector<16x1xf32>
    %cst_189 = arith.constant 3.200000e+01 : f32
    %393 = vector.broadcast %cst_189 : f32 to vector<16x1xf32>
    %394 = arith.divf %392, %393 : vector<16x1xf32>
    %395 = vector.broadcast %394 : vector<16x1xf32> to vector<16x32xf32>
    %396 = arith.subf %388, %395 : vector<16x32xf32>
    %397 = arith.mulf %396, %396 : vector<16x32xf32>
    %cst_190 = arith.constant dense<0.000000e+00> : vector<16xf32>
    %398 = vector.multi_reduction <add>, %397, %cst_190 [1] : vector<16x32xf32> to vector<16xf32>
    %399 = vector.shape_cast %398 : vector<16xf32> to vector<16x1xf32>
    %cst_191 = arith.constant 3.200000e+01 : f32
    %400 = vector.broadcast %cst_191 : f32 to vector<16x1xf32>
    %401 = arith.divf %399, %400 : vector<16x1xf32>
    %402 = vector.broadcast %394 : vector<16x1xf32> to vector<16x32xf32>
    %403 = arith.subf %388, %402 : vector<16x32xf32>
    %cst_192 = arith.constant 9.99999974E-6 : f32
    %404 = vector.broadcast %cst_192 : f32 to vector<16x1xf32>
    %405 = arith.addf %401, %404 : vector<16x1xf32>
    %406 = math.rsqrt %405 : vector<16x1xf32>
    %407 = vector.broadcast %406 : vector<16x1xf32> to vector<16x32xf32>
    %408 = arith.mulf %403, %407 : vector<16x32xf32>
    %409 = vector.broadcast %389 : vector<1x32xf32> to vector<16x32xf32>
    %410 = arith.mulf %408, %409 : vector<16x32xf32>
    %411 = vector.broadcast %390 : vector<1x32xf32> to vector<16x32xf32>
    %412 = arith.addf %410, %411 : vector<16x32xf32>
    %c0_193 = arith.constant 0 : index
    %c0_194 = arith.constant 0 : index
    %413 = vector.load %arg24[%c0_193, %c0_194] : memref<32x128xf32, #tpu.memory_space<vmem>>, vector<32x128xf32>
    %cst_195 = arith.constant dense<0.000000e+00> : vector<16x128xf32>
    %414 = tpu.matmul %412, %413, %cst_195 {dimension_numbers = #tpu.dot_dimension_numbers<[1], [0], [0], [1], [0, 0, 1, 1], [], []>} : vector<16x32xf32>, vector<32x128xf32>, vector<16x128xf32> -> vector<16x128xf32>
    %c0_196 = arith.constant 0 : index
    %c0_197 = arith.constant 0 : index
    %415 = vector.load %arg25[%c0_196, %c0_197] : memref<16x128xf32, #tpu.memory_space<vmem>>, vector<16x128xf32>
    tpu.vector_store %arg25[%c0_196, %c0_197], %414 {strides = array<i32>} : memref<16x128xf32, #tpu.memory_space<vmem>>, vector<16x128xf32>,
    %c0_198 = arith.constant 0 : index
    %c0_199 = arith.constant 0 : index
    %416 = vector.load %arg5[%c0_198, %c0_199] : memref<16x1xi32, #tpu.memory_space<vmem>>, vector<16x1xi32>
    %cst_200 = arith.constant dense<0xFF800000> : vector<16xf32>
    %417 = vector.multi_reduction <maximumf>, %414, %cst_200 [1] : vector<16x128xf32> to vector<16xf32>
    %418 = vector.shape_cast %417 : vector<16xf32> to vector<16x1xf32>
    %419 = vector.broadcast %418 : vector<16x1xf32> to vector<16x128xf32>
    %420 = arith.subf %414, %419 : vector<16x128xf32>
    %421 = math.exp %420 : vector<16x128xf32>
    %cst_201 = arith.constant dense<0.000000e+00> : vector<16xf32>
    %422 = vector.multi_reduction <add>, %421, %cst_201 [1] : vector<16x128xf32> to vector<16xf32>
    %423 = vector.shape_cast %422 : vector<16xf32> to vector<16x1xf32>
    %424 = math.log %423 : vector<16x1xf32>
    %425 = arith.addf %424, %418 : vector<16x1xf32>
    %426 = tpu.iota {dimensions = array<i32: 1>} : vector<16x128xi32>
    %427 = vector.broadcast %416 : vector<16x1xi32> to vector<16x128xi32>
    %428 = arith.cmpi eq, %426, %427 : vector<16x128xi32>
    %cst_202 = arith.constant 0.000000e+00 : f32
    %429 = vector.broadcast %cst_202 : f32 to vector<16x128xf32>
    %430 = arith.select %428, %414, %429 : vector<16x128xi1>, vector<16x128xf32>
    %cst_203 = arith.constant dense<0.000000e+00> : vector<16xf32>
    %431 = vector.multi_reduction <add>, %430, %cst_203 [1] : vector<16x128xf32> to vector<16xf32>
    %432 = vector.shape_cast %431 : vector<16xf32> to vector<16x1xf32>
    %c0_i32 = arith.constant 0 : i32
    %433 = vector.broadcast %c0_i32 : i32 to vector<16x1xi32>
    %434 = arith.cmpi sge, %416, %433 : vector<16x1xi32>
    %435 = arith.extui %434 : vector<16x1xi1> to vector<16x1xi32>
    %436 = arith.sitofp %435 : vector<16x1xi32> to vector<16x1xf32>
    %437 = arith.subf %425, %432 : vector<16x1xf32>
    %438 = arith.mulf %437, %436 : vector<16x1xf32>
    %c0_204 = arith.constant 0 : index
    %c0_205 = arith.constant 0 : index
    %439 = vector.load %arg26[%c0_204, %c0_205] : memref<16x1xf32, #tpu.memory_space<vmem>>, vector<16x1xf32>
    tpu.vector_store %arg26[%c0_204, %c0_205], %438 {strides = array<i32>} : memref<16x1xf32, #tpu.memory_space<vmem>>, vector<16x1xf32>,
    %c0_206 = arith.constant 0 : index
    %c0_207 = arith.constant 0 : index
    %440 = vector.load %arg27[%c0_206, %c0_207] : memref<16x1xf32, #tpu.memory_space<vmem>>, vector<16x1xf32>
    tpu.vector_store %arg27[%c0_206, %c0_207], %436 {strides = array<i32>} : memref<16x1xf32, #tpu.memory_space<vmem>>, vector<16x1xf32>,
    return
  }
  func.func @transform_0(%arg0: i32) -> (i32, i32) {
    %c0_i32 = arith.constant 0 : i32
    %c0_i32_0 = arith.constant 0 : i32
    return %arg0, %c0_i32 : i32, i32
  }
  func.func @transform_1(%arg0: i32) -> (i32, i32) {
    %c0_i32 = arith.constant 0 : i32
    %c0_i32_0 = arith.constant 0 : i32
    return %arg0, %c0_i32 : i32, i32
  }
  func.func @transform_2(%arg0: i32) -> (i32, i32) {
    %c0_i32 = arith.constant 0 : i32
    %c0_i32_0 = arith.constant 0 : i32
    return %arg0, %c0_i32 : i32, i32
  }
  func.func @transform_3(%arg0: i32) -> (i32, i32, i32) {
    %c0_i32 = arith.constant 0 : i32
    %c0_i32_0 = arith.constant 0 : i32
    %c0_i32_1 = arith.constant 0 : i32
    return %arg0, %c0_i32, %c0_i32_0 : i32, i32, i32
  }
  func.func @transform_4(%arg0: i32) -> (i32, i32) {
    %c0_i32 = arith.constant 0 : i32
    %c0_i32_0 = arith.constant 0 : i32
    return %arg0, %c0_i32 : i32, i32
  }
  func.func @transform_5(%arg0: i32) -> (i32, i32) {
    %c0_i32 = arith.constant 0 : i32
    %c0_i32_0 = arith.constant 0 : i32
    %c0_i32_1 = arith.constant 0 : i32
    return %c0_i32, %c0_i32_0 : i32, i32
  }
  func.func @transform_6(%arg0: i32) -> (i32, i32) {
    %c0_i32 = arith.constant 0 : i32
    %c0_i32_0 = arith.constant 0 : i32
    %c0_i32_1 = arith.constant 0 : i32
    return %c0_i32, %c0_i32_0 : i32, i32
  }
  func.func @transform_7(%arg0: i32) -> (i32, i32) {
    %c0_i32 = arith.constant 0 : i32
    %c0_i32_0 = arith.constant 0 : i32
    %c0_i32_1 = arith.constant 0 : i32
    return %c0_i32, %c0_i32_0 : i32, i32
  }
  func.func @transform_8(%arg0: i32) -> (i32, i32) {
    %c0_i32 = arith.constant 0 : i32
    %c0_i32_0 = arith.constant 0 : i32
    %c0_i32_1 = arith.constant 0 : i32
    return %c0_i32, %c0_i32_0 : i32, i32
  }
  func.func @transform_9(%arg0: i32) -> (i32, i32, i32) {
    %c0_i32 = arith.constant 0 : i32
    %c0_i32_0 = arith.constant 0 : i32
    %c0_i32_1 = arith.constant 0 : i32
    %c0_i32_2 = arith.constant 0 : i32
    return %c0_i32, %c0_i32_0, %c0_i32_1 : i32, i32, i32
  }
  func.func @transform_10(%arg0: i32) -> (i32, i32, i32) {
    %c0_i32 = arith.constant 0 : i32
    %c0_i32_0 = arith.constant 0 : i32
    %c0_i32_1 = arith.constant 0 : i32
    %c0_i32_2 = arith.constant 0 : i32
    return %c0_i32, %c0_i32_0, %c0_i32_1 : i32, i32, i32
  }
  func.func @transform_11(%arg0: i32) -> (i32, i32, i32) {
    %c0_i32 = arith.constant 0 : i32
    %c0_i32_0 = arith.constant 0 : i32
    %c0_i32_1 = arith.constant 0 : i32
    %c0_i32_2 = arith.constant 0 : i32
    return %c0_i32, %c0_i32_0, %c0_i32_1 : i32, i32, i32
  }
  func.func @transform_12(%arg0: i32) -> (i32, i32, i32) {
    %c0_i32 = arith.constant 0 : i32
    %c0_i32_0 = arith.constant 0 : i32
    %c0_i32_1 = arith.constant 0 : i32
    %c0_i32_2 = arith.constant 0 : i32
    return %c0_i32, %c0_i32_0, %c0_i32_1 : i32, i32, i32
  }
  func.func @transform_13(%arg0: i32) -> (i32, i32, i32) {
    %c0_i32 = arith.constant 0 : i32
    %c0_i32_0 = arith.constant 0 : i32
    %c0_i32_1 = arith.constant 0 : i32
    %c0_i32_2 = arith.constant 0 : i32
    return %c0_i32, %c0_i32_0, %c0_i32_1 : i32, i32, i32
  }
  func.func @transform_14(%arg0: i32) -> (i32, i32, i32) {
    %c0_i32 = arith.constant 0 : i32
    %c0_i32_0 = arith.constant 0 : i32
    %c0_i32_1 = arith.constant 0 : i32
    %c0_i32_2 = arith.constant 0 : i32
    return %c0_i32, %c0_i32_0, %c0_i32_1 : i32, i32, i32
  }
  func.func @transform_15(%arg0: i32) -> (i32, i32, i32) {
    %c0_i32 = arith.constant 0 : i32
    %c0_i32_0 = arith.constant 0 : i32
    %c0_i32_1 = arith.constant 0 : i32
    %c0_i32_2 = arith.constant 0 : i32
    return %c0_i32, %c0_i32_0, %c0_i32_1 : i32, i32, i32
  }
  func.func @transform_16(%arg0: i32) -> (i32, i32, i32) {
    %c0_i32 = arith.constant 0 : i32
    %c0_i32_0 = arith.constant 0 : i32
    %c0_i32_1 = arith.constant 0 : i32
    %c0_i32_2 = arith.constant 0 : i32
    return %c0_i32, %c0_i32_0, %c0_i32_1 : i32, i32, i32
  }
  func.func @transform_17(%arg0: i32) -> (i32, i32, i32) {
    %c0_i32 = arith.constant 0 : i32
    %c0_i32_0 = arith.constant 0 : i32
    %c0_i32_1 = arith.constant 0 : i32
    %c0_i32_2 = arith.constant 0 : i32
    return %c0_i32, %c0_i32_0, %c0_i32_1 : i32, i32, i32
  }
  func.func @transform_18(%arg0: i32) -> (i32, i32, i32) {
    %c0_i32 = arith.constant 0 : i32
    %c0_i32_0 = arith.constant 0 : i32
    %c0_i32_1 = arith.constant 0 : i32
    %c0_i32_2 = arith.constant 0 : i32
    return %c0_i32, %c0_i32_0, %c0_i32_1 : i32, i32, i32
  }
  func.func @transform_19(%arg0: i32) -> (i32, i32, i32) {
    %c0_i32 = arith.constant 0 : i32
    %c0_i32_0 = arith.constant 0 : i32
    %c0_i32_1 = arith.constant 0 : i32
    %c0_i32_2 = arith.constant 0 : i32
    return %c0_i32, %c0_i32_0, %c0_i32_1 : i32, i32, i32
  }
  func.func @transform_20(%arg0: i32) -> (i32, i32, i32) {
    %c0_i32 = arith.constant 0 : i32
    %c0_i32_0 = arith.constant 0 : i32
    %c0_i32_1 = arith.constant 0 : i32
    %c0_i32_2 = arith.constant 0 : i32
    return %c0_i32, %c0_i32_0, %c0_i32_1 : i32, i32, i32
  }
  func.func @transform_21(%arg0: i32) -> (i32, i32) {
    %c0_i32 = arith.constant 0 : i32
    %c0_i32_0 = arith.constant 0 : i32
    %c0_i32_1 = arith.constant 0 : i32
    return %c0_i32, %c0_i32_0 : i32, i32
  }
  func.func @transform_22(%arg0: i32) -> (i32, i32) {
    %c0_i32 = arith.constant 0 : i32
    %c0_i32_0 = arith.constant 0 : i32
    %c0_i32_1 = arith.constant 0 : i32
    return %c0_i32, %c0_i32_0 : i32, i32
  }
  func.func @transform_23(%arg0: i32) -> (i32, i32) {
    %c0_i32 = arith.constant 0 : i32
    %c0_i32_0 = arith.constant 0 : i32
    %c0_i32_1 = arith.constant 0 : i32
    return %c0_i32, %c0_i32_0 : i32, i32
  }
  func.func @transform_24(%arg0: i32) -> (i32, i32) {
    %c0_i32 = arith.constant 0 : i32
    %c0_i32_0 = arith.constant 0 : i32
    return %arg0, %c0_i32 : i32, i32
  }
  func.func @transform_25(%arg0: i32) -> (i32, i32) {
    %c0_i32 = arith.constant 0 : i32
    %c0_i32_0 = arith.constant 0 : i32
    return %arg0, %c0_i32 : i32, i32
  }
  func.func @transform_26(%arg0: i32) -> (i32, i32) {
    %c0_i32 = arith.constant 0 : i32
    %c0_i32_0 = arith.constant 0 : i32
    return %arg0, %c0_i32 : i32, i32
  }
}

</mosaic_0001>

<bundles_post_ra>
// kernel: lmm_forward.1
= control target key start
LH: loop header
LB: loop body
LE: loop exit
PB: predicated region body
PF: predicated region fallthrough
CT: control target
= control target key end

     0   :  { %s4132_s0 = inlined_call_operand.vmem [shape: f32[16,32], index: 0, kind: input, shape index: {}]   ;;  %s4133_s1 = inlined_call_operand.vmem [shape: f32[16,32], index: 1, kind: input, shape index: {}]   ;;  %s4134_s2 = inlined_call_operand.vmem [shape: f32[16,32], index: 2, kind: input, shape index: {}]   ;;  %s4135_s3 = inlined_call_operand.vmem [shape: f32[2,1,16], index: 3, kind: input, shape index: {}]   ;;  %s4136_s4 = inlined_call_operand.vmem [shape: s32[32,1], index: 4, kind: input, shape index: {}]   ;;  %s4137_s5 = inlined_call_operand.vmem [shape: f32[32,32], index: 5, kind: input, shape index: {}]   ;;  %s4138_s6 = inlined_call_operand.vmem [shape: f32[1,32], index: 6, kind: input, shape index: {}]   ;;  %s4139_s7 = inlined_call_operand.vmem [shape: f32[1,32], index: 7, kind: input, shape index: {}]   ;;  %s4140_s8 = inlined_call_operand.vmem [shape: f32[1,32], index: 8, kind: input, shape index: {}]   ;;  %s4141_s9 = inlined_call_operand.vmem [shape: f32[2,1,32], index: 9, kind: input, shape index: {}]   ;;  %s4142_s10 = inlined_call_operand.vmem [shape: f32[2,1,32], index: 10, kind: input, shape index: {}]   ;;  %s4143_s11 = inlined_call_operand.vmem [shape: f32[2,32,96], index: 11, kind: input, shape index: {}]   ;;  %s4144_s12 = inlined_call_operand.vmem [shape: f32[2,1,96], index: 12, kind: input, shape index: {}]   ;;  %s4145_s13 = inlined_call_operand.vmem [shape: f32[2,32,32], index: 13, kind: input, shape index: {}]   ;;  %s4146_s14 = inlined_call_operand.vmem [shape: f32[2,1,32], index: 14, kind: input, shape index: {}]   ;;  %s4147_s15 = inlined_call_operand.vmem [shape: f32[2,1,32], index: 15, kind: input, shape index: {}]   ;;  %s4148_s16 = inlined_call_operand.vmem [shape: f32[2,1,32], index: 16, kind: input, shape index: {}]   ;;  %s4149_s17 = inlined_call_operand.vmem [shape: f32[2,32,128], index: 17, kind: input, shape index: {}]   ;;  %s4150_s18 = inlined_call_operand.vmem [shape: f32[2,1,128], index: 18, kind: input, shape index: {}]   ;;  %s4151_s19 = inlined_call_operand.vmem [shape: f32[2,128,32], index: 19, kind: input, shape index: {}]   ;;  %s4152_s20 = inlined_call_operand.vmem [shape: f32[2,1,32], index: 20, kind: input, shape index: {}]   ;;  %s4153_s21 = inlined_call_operand.vmem [shape: f32[1,32], index: 21, kind: input, shape index: {}]   ;;  %s4154_s22 = inlined_call_operand.vmem [shape: f32[1,32], index: 22, kind: input, shape index: {}]   ;;  %s4155_s23 = inlined_call_operand.vmem [shape: f32[32,128], index: 23, kind: input, shape index: {}]   ;;  %s4156_s24 = inlined_call_operand.hbm [shape: f32[32,128], index: 24, kind: output, shape index: {0}]   ;;  %s4157_s25 = inlined_call_operand.vmem [shape: f32[32,1], index: 25, kind: output, shape index: {1}]   ;;  %s4158_s26 = inlined_call_operand.vmem [shape: f32[32,1], index: 26, kind: output, shape index: {2}]  }
   0x1   :  { %4180 = sst [smem:[#allocation14_spill]] %s4132_s0 }
   0x2   :  { %4181 = sst [smem:[#allocation15_spill]] %s4133_s1 }
   0x3   :  { %4182 = sst [smem:[#allocation16_spill]] %s4134_s2 }
   0x4   :  { %4183 = sst [smem:[#allocation17_spill]] %s4135_s3 }
   0x5   :  { %4184 = sst [smem:[#allocation18_spill]] %s4136_s4 }
   0x6   :  { %4185 = sst [smem:[#allocation19_spill]] %s4137_s5 }
   0x7   :  { %4186 = sst [smem:[#allocation20_spill]] %s4138_s6 }
   0x8   :  { %4187 = sst [smem:[#allocation21_spill]] %s4139_s7 }
   0x9   :  { %4188 = sst [smem:[#allocation22_spill]] %s4140_s8 }
   0xa   :  { %4189 = sst [smem:[#allocation23_spill]] %s4141_s9 }
   0xb   :  { %4190 = sst [smem:[#allocation24_spill]] %s4142_s10 }
   0xc   :  { %4191 = sst [smem:[#allocation25_spill]] %s4156_s24 }
   0xd   :  { %4192 = sst [smem:[#allocation26_spill]] %s4157_s25 }
   0xe   :  { %4193 = sst [smem:[#allocation27_spill]] %s4158_s26 }
   0xf   :  { %32 = vsyncpa [#allocation4], 0 }
  0x10   :  { %34 = vsyncpa [#allocation4 + $0x1], 0  ;;  %s3416_s27 = smov 0   ;;  %s3418_s3 = smov 0  }
  0x11   :  { %s3420_s7 = smov 0   ;;  %s3422_s28 = smov 0  }
  0x12 LB: > { %4194 = sst [smem:[#allocation6_spill]] %s3251_s27  ;;  %s3437_s8 = sadd.s32 4294967295, %s3263_s28   ;;  %s3263_s28 = sphi %s3422_s28, %s4233_s28   ;;  %s3259_s7 = sphi %s3420_s7, %s4236_s7   ;;  %s3255_s3 = sphi %s3418_s3, %s4235_s3   ;;  %s3251_s27 = sphi %s3416_s27, %s4234_s27  }
  0x13   : > { %4195 = sst [smem:[#allocation7_spill]] %s3255_s3  ;;  %s2851_s4 = sadd.s32 4294967294, %s3263_s28  }
  0x14   : > { %4196 = sst [smem:[#allocation8_spill]] %s3259_s7  ;;  %s3441_s29 = sadd.s32 1, %s3263_s28  }
  0x15   : > { %4197 = sst [smem:[#allocation9_spill]] %s3263_s28  ;;  %s576_s0 = sadd.s32 1, %s3259_s7 }
  0x16   : > { %4198 = sst [smem:[#allocation10_spill]] %s3441_s29  ;;  %s573_s9 = ssub.s32 %s3263_s28, %s3441_s29 }
  0x17   : > { %p586_p0 = scmp.ne.s32.totalorder %s3259_s7, %s3255_s3  ;;  %p574_p1 = scmp.eq.s32.totalorder %s573_s9, 0 }
  0x18   : > { %p587_p2 = scmp.eq.s32.totalorder %s3437_s8, 1  ;;  %p592_p3 = scmp.ne.s32.totalorder %s3255_s3, %s3251_s27 }
  0x19   : > { %p593_p4 = scmp.eq.s32.totalorder %s2851_s4, 1  ;;  %p2854_p7 = scmp.ge.s32.totalorder %s3263_s28, 1 }
  0x1a   : > { %s3452_s30 = scalar_select %p574_p1, %s3259_s7, %s576_s0  }
  0x1b   : > { %p3454_p5 = por %p587_p2, %p586_p0  ;;  %p3458_p6 = por %p593_p4, %p592_p3 }
  0x1c   : > { %4199 = sst [smem:[#allocation11_spill]] %s3452_s30  ;;  %p756_p8 = scmp.lt.s32.totalorder %s3263_s28, 3 }
  0x1d   : > { %s4200_s2 = scalar_select %p3454_p5, 1, 0 }
  0x1e   : > { %s4202_s5 = scalar_select %p3458_p6, 1, 0 }
  0x1f   : > { %4201 = sst [smem:[#allocation12_spill]] %s4200_s2  ;;  %p757_p9 = pnand %p2854_p7, %p756_p8 }
  0x20   : > { %4203 = sst [smem:[#allocation13_spill]] %s4202_s5  ;;  %p851_p10 = scmp.lt.s32.totalorder (!%p757_p9), %s3437_s8, 1 }
  0x21   : > { %760 = sbr.rel (%p757_p9) target bundleno = 5608 (0x15e8), region = 116  ;;  %s4204_s1 = sld [smem:[#allocation19_spill]] (!%p757_p9) }
  0x22   : > { %s4205_s5 = sld [smem:[#allocation17_spill]] (!%p757_p9)  ;;  %s3267_s30 = smov (!%p757_p9), 96  }
  0x23   : > { %s4206_s28 = sld [smem:[#allocation14_spill]] (!%p757_p9)  ;;  %s3268_s9 = smov (!%p757_p9), 88  }
  0x24   : > { %s4207_s2 = sld [smem:[#allocation15_spill]] (!%p757_p9)  ;;  %s4178_s24 = smov (!%p757_p9), 104  }
  0x25   : > { %s4208_s10 = sld [smem:[#allocation20_spill]] (!%p757_p9)  ;;  %s4174_s6 = smov (!%p757_p9), 40  }
  0x26   : > { %v3265_v2 = vmov 0   ;;  %s852_s7 = scalar_select %p851_p10, %s3437_s8, 1  ;;  %vm894_vm0 = vcmask 261120   ;;  %v3266_v13 = vmov 32.0   ;;  %v1037_v56 = vld [vmem:[%s4143_s11 + $0x18] sm:$0xff]  ;;  %v1036_v57 = vld [vmem:[%s4143_s11 + $0x10] sm:$0xff] }
  0x27   : > { %v889_v0 = vld [vmem:[%s4204_s1 + $0x18] sm:$0xff]  ;;  %v888_v1 = vld [vmem:[%s4204_s1 + $0x10] sm:$0xff]  ;;  %3081 = vset.pattern.permute.xlu2 %v3265_v2  ;;  %v887_v3 = vld [vmem:[%s4204_s1 + $0x8] sm:$0xff]  ;;  %3082 = vset.pattern.permute.xlu1 %v3265_v2  ;;  %3105 = vrcp.f32 %v3266_v13  ;;  %s4209_s26 = sld [smem:[#allocation21_spill]]  ;;  %vm1081_vm12 = vcmask 64512  }
  0x28   : > { %910 = vmatpush.msra.mxu0 %v889_v0  ;;  %3083 = vset.pattern.permute.xlu0 %v3265_v2  ;;  %v886_v4 = vld [vmem:[%s4204_s1] sm:$0xff]  ;;  %s3478_s29 = sshll.u32 %s852_s7, 3  ;;  %s865_s27 = scalar_lea.vmem %s4205_s5, %s852_s7  ;;  %v1035_v58 = vld [vmem:[%s4143_s11 + $0x8] sm:$0xff] }
  0x29   : > { %s854_s25 = scalar_lea.vmem %s4206_s28, %s3478_s29  ;;  %v969_v5 = vld [vmem:[%s865_s27] sm:$0x1]  ;;  %s4210_s28 = sld [smem:[#allocation16_spill]]  ;;  %1060 = vmatpush.msra.mxu1 %v1037_v56 }
  0x2a   : > { %911 = vmatpush.msra.mxu0 %v888_v1  ;;  %s858_s3 = scalar_lea.vmem %s4207_s2, %s3478_s29  ;;  %v885_v6 = vld [vmem:[%s854_s25] sm:$0xff]  ;;  %vm970_vm1 = vcmp.gt.f32.partialorder %v969_v5, 0.5  ;;  %s4211_s0 = sld [smem:[#allocation22_spill]] }
  0x2b   : > { %v960_v7 = vld [vmem:[%s858_s3] sm:$0xff]  ;;  %v3492_v8 = vsel %vm970_vm1, 1, %v3265_v2  ;;  %1061 = vmatpush.msra.mxu1 %v1036_v57  ;;  %s4212_s3 = sld [smem:[#allocation23_spill]]  ;;  %s3269_s7 = smov 72   ;;  %vm1117_vm1 = vcmask 130048  }
  0x2c   : > { %912 = vmatpush.msra.mxu0 %v887_v3  ;;  %961 = vst.msk [vmem:[#allocation2 + $0x8] sm:$0xff] %vm894_vm0, %v960_v7  ;;  %v3084_v9 = vld [vmem:[%s4208_s10] ss:$0 sm:$0xff]  ;;  %s4214_s4 = sld [smem:[#allocation24_spill]]  ;;  %s3270_s5 = smov 64  }
  0x2d   : > { %v3106_v14 = vpop.eup %3105  ;;  %v3085_v34 = vld [vmem:[%s4209_s26] ss:$0 sm:$0xff]  ;;  %1062 = vmatpush.msra.mxu1 %v1035_v58  ;;  %s3271_s10 = smov 80   ;;  %s3273_s25 = smov 120  }
  0x2e   : > { %913 = vmatpush.msra.mxu0 %v886_v4  ;;  %v924_v15 = vmul.f32 32.0, %v3106_v14  ;;  %vm928_vm2 = vweird.f32 %v3106_v14  ;;  %v1034_v59 = vld [vmem:[%s4143_s11] sm:$0xff]  ;;  %s4176_s26 = smov 112  }
  0x2f   : > { %2865 = vmatmul.msk.f32.vlgmr.msra.gmra.mxu0 %vm894_vm0, %v885_v6  ;;  %s862_s2 = scalar_lea.vmem %s4210_s28, %s3478_s29  ;;  %1063 = vmatpush.msra.mxu1 %v1034_v59  ;;  %s4175_s28 = smov 56  }
  0x30   : > { %v925_v16 = vsub.f32 1.0, %v924_v15  ;;  %v3086_v36 = vld [vmem:[%s4211_s0] ss:$0 sm:$0xff]  ;;  %s4173_s0 = smov 48  }
  0x31   : > { %v957_v39 = vld [vmem:[%s862_s2] sm:$0xff]  ;;  %s4213_s2 = smov %s4212_s3 }
  0x32   : > { %v926_v17 = vmul.f32 %v3106_v14, %v925_v16  ;;  %v3088_v15 = vld [vmem:[%s4214_s4] ss:$0 sm:$0xff] }
  0x33   : > { %v3519_v44 = vld [vmem:[#allocation2 + $0x8] sm:$0xff] }
  0x34   : > { %v927_v18 = vadd.f32 %v3106_v14, %v926_v17  ;;  %v983_v45 = vsel %vm894_vm0, %v3519_v44, 0.0 }
  0x36   : > { %v3499_v19 = vsel %vm928_vm2, %v3106_v14, %v927_v18 }
  0xac   : > { %v915_v10 = vpop.f32.mrf.mxu0 }
  0xad   : > { %v916_v11 = vadd.f32 %v3084_v9, %v915_v10 }
  0xaf   : > { %v920_v12 = vsel %vm894_vm0, %v916_v11, 0.0 }
  0xb0   : > { %921 = vadd.xlane.f32.xlu0 %v920_v12 }
 0x123   : > { %v922_v20 = vpop.xlane.xlu0 %921 }
 0x124   : > { %v930_v21 = vmul.f32 %v3499_v19, %v922_v20 }
 0x126   : > { %v931_v22 = vsub.f32 %v916_v11, %v930_v21  ;;  %v3087_v11 = vld [vmem:[%s4212_s3] ss:$0 sm:$0xff]  ;;  %s4225_s3 = sld [smem:[#allocation7_spill]] }
 0x128   : > { %v932_v23 = vmul.f32 %v931_v22, %v931_v22 }
 0x12a   : > { %v933_v24 = vsel %vm894_vm0, %v932_v23, 0.0 }
 0x12b   : > { %934 = vadd.xlane.f32.xlu0 %v933_v24 }
 0x19e   : > { %v935_v25 = vpop.xlane.xlu0 %934 }
 0x19f   : > { %v936_v26 = vmul.f32 %v935_v25, %v3499_v19 }
 0x1a1   : > { %v937_v27 = vadd.f32 1e-05, %v936_v26  ;;  %v3089_v26 = vld [vmem:[%s4144_s12] ss:$0 sm:$0xff] }
 0x1a3   : > { %3107 = vrsqrt.f32 %v937_v27  ;;  %vm944_vm4 = vweird.f32 %v937_v27 }
 0x1a9   : > { %v3108_v28 = vpop.eup %3107 }
 0x1aa   : > { %v939_v29 = vmul.f32 %v3108_v28, %v937_v27  ;;  %vm945_vm3 = vweird.f32 %v3108_v28 }
 0x1ab   : > { %vm946_vm5 = vmor %vm944_vm4, %vm945_vm3 }
 0x1ac   : > { %v940_v30 = vmul.f32 %v3108_v28, %v939_v29 }
 0x1ae   : > { %v941_v31 = vmul.f32 0.5, %v940_v30 }
 0x1b0   : > { %v942_v32 = vsub.f32 1.5, %v941_v31 }
 0x1b2   : > { %v943_v33 = vmul.f32 %v3108_v28, %v942_v32 }
 0x1b4   : > { %v947_v35 = vsel %vm946_vm5, %v3108_v28, %v943_v33 }
 0x1b5   : > { %v948_v37 = vmul.f32 %v947_v35, %v931_v22  ;;  %v1071_v35 = vld [vmem:[%s4145_s13] sm:$0xff] }
 0x1b7   : > { %v952_v38 = vmul.f32 %v3085_v34, %v948_v37 }
 0x1b9   : > { %v956_v40 = vadd.f32 %v3086_v36, %v952_v38 }
 0x1bb   : > { %v958_v41 = vadd.f32 %v957_v39, %v956_v40 }
 0x1bd   : > { %959 = vst.msk [vmem:[#allocation2] sm:$0xff] %vm894_vm0, %v958_v41 }
 0x1c4   : > { %v3515_v42 = vld [vmem:[#allocation2] sm:$0xff] }
 0x1c5   : > { %v980_v43 = vsel %vm894_vm0, %v3515_v42, 0.0 }
 0x1c6   : > { %981 = vadd.xlane.f32.xlu1 %v980_v43 }
 0x1ce   : > { %984 = vadd.xlane.f32.xlu1 %v983_v45 }
 0x239   : > { %v982_v46 = vpop.xlane.xlu1 %981 }
 0x23a   : > { %v986_v47 = vmul.f32 %v982_v46, %v3499_v19 }
 0x23c   : > { %v988_v48 = vsub.f32 %v3515_v42, %v986_v47  ;;  %v964_v47 = vlaneseq }
 0x23e   : > { %v990_v49 = vmul.f32 %v988_v48, %v988_v48 }
 0x240   : > { %v992_v50 = vsel %vm894_vm0, %v990_v49, 0.0  ;;  %v974_v49 = vperm.slane %v3492_v8, 0 }
 0x241   : > { %993 = vadd.xlane.f32.xlu2 %v992_v50  ;;  %v985_v51 = vpop.xlane.xlu1 %984  ;;  %v965_v50 = vshrl.u32 %v964_v47, 7 }
 0x242   : > { %v987_v52 = vmul.f32 %v985_v51, %v3499_v19  ;;  %vm975_vm14 = vcmp.eq.s32.totalorder %v974_v49, 1 }
 0x243   : > { %v966_v51 = vadd.s32 8, %v965_v50 }
 0x244   : > { %v989_v53 = vsub.f32 %v3519_v44, %v987_v52 }
 0x246   : > { %v991_v54 = vmul.f32 %v989_v53, %v989_v53 }
 0x248   : > { %v995_v55 = vsel %vm894_vm0, %v991_v54, 0.0 }
 0x249   : > { %996 = vadd.xlane.f32.xlu2 %v995_v55 }
 0x2b4   : > { %v994_v60 = vpop.xlane.xlu2 %993 }
 0x2b5   : > { %v998_v61 = vmul.f32 %v994_v60, %v3499_v19 }
 0x2b7   : > { %v1000_v62 = vadd.f32 1e-05, %v998_v61 }
 0x2b9   : > { %3109 = vrsqrt.f32 %v1000_v62  ;;  %vm1008_vm7 = vweird.f32 %v1000_v62 }
 0x2bc   : > { %v997_v63 = vpop.xlane.xlu2 %996 }
 0x2bd   : > { %v999_v0 = vmul.f32 %v997_v63, %v3499_v19 }
 0x2bf   : > { %v3110_v1 = vpop.eup %3109  ;;  %v1001_v2 = vadd.f32 1e-05, %v999_v0 }
 0x2c0   : > { %v1003_v3 = vmul.f32 %v3110_v1, %v1000_v62  ;;  %vm1009_vm6 = vweird.f32 %v3110_v1 }
 0x2c1   : > { %3111 = vrsqrt.f32 %v1001_v2  ;;  %vm1010_vm8 = vmor %vm1008_vm7, %vm1009_vm6  ;;  %vm1018_vm10 = vweird.f32 %v1001_v2 }
 0x2c2   : > { %v1004_v4 = vmul.f32 %v3110_v1, %v1003_v3 }
 0x2c4   : > { %v1005_v5 = vmul.f32 0.5, %v1004_v4 }
 0x2c6   : > { %v1006_v6 = vsub.f32 1.5, %v1005_v5 }
 0x2c7   : > { %v3112_v7 = vpop.eup %3111 }
 0x2c8   : > { %v1007_v9 = vmul.f32 %v3110_v1, %v1006_v6  ;;  %v1013_v10 = vmul.f32 %v3112_v7, %v1001_v2  ;;  %vm1019_vm9 = vweird.f32 %v3112_v7 }
 0x2c9   : > { %vm1020_vm11 = vmor %vm1018_vm10, %vm1019_vm9 }
 0x2ca   : > { %v1011_v12 = vsel %vm1010_vm8, %v3110_v1, %v1007_v9  ;;  %v1014_v13 = vmul.f32 %v3112_v7, %v1013_v10 }
 0x2cb   : > { %v1022_v14 = vmul.f32 %v1011_v12, %v988_v48  ;;  %v3594_v48 = vand.u32 127, %v964_v47 }
 0x2cc   : > { %v1015_v16 = vmul.f32 0.5, %v1014_v13 }
 0x2cd   : > { %v1027_v17 = vmul.f32 %v3087_v11, %v1022_v14  ;;  %vm971_vm13 = vcmp.le.s32.totalorder %v3594_v48, %v965_v50  ;;  %vm972_vm2 = vcmp.le.s32.totalorder %v3594_v48, %v966_v51 }
 0x2ce   : > { %v1016_v18 = vsub.f32 1.5, %v1015_v16  ;;  %vm3598_vm15 = vmand %vm971_vm13, %vm975_vm14 }
 0x2cf   : > { %v1032_v20 = vadd.f32 %v3088_v15, %v1027_v17  ;;  %vm3606_vm3 = vmand %vm972_vm2, %vm975_vm14 }
 0x2d0   : > { %v1017_v21 = vmul.f32 %v3112_v7, %v1016_v18 }
 0x2d1   : > { %2866 = vmatmul.msk.f32.vlgmr.msra.gmra.mxu1 %vm894_vm0, %v1032_v20 }
 0x2d2   : > { %v1021_v22 = vsel %vm1020_vm11, %v3112_v7, %v1017_v21 }
 0x2d3   : > { %v1023_v23 = vmul.f32 %v1021_v22, %v989_v53 }
 0x2d5   : > { %v1028_v24 = vmul.f32 %v3087_v11, %v1023_v23 }
 0x2d7   : > { %v1033_v25 = vadd.f32 %v3088_v15, %v1028_v24 }
 0x2d9   : > { %2867 = vmatmul.msk.f32.gmra.mxu1 %vm894_vm0, %v1033_v25 }
 0x34e   : > { %v1065_v27 = vpop.f32.mrf.mxu1 }
 0x34f   : > { %v3554_v28 = vadd.f32 %v3089_v26, %v1065_v27 }
 0x351   : > { %1077 = vrot.lane.b32.xlu1 %v3554_v28, %s3267_s30 }
 0x356   : > { %v1068_v29 = vpop.f32.mrf.mxu1 }
 0x357   : > { %v1069_v30 = vadd.f32 %v3089_v26, %v1068_v29 }
 0x359   : > { %1181 = vrot.lane.b32.xlu1 %v1069_v30, %s3268_s9  ;;  %1079 = vrot.lane.b32.xlu0 %v1069_v30, %s3267_s30  ;;  %v3561_v31 = vpack.i.bf16 %v3554_v28, %v1069_v30 }
 0x361   : > { %1470 = vrot.lane.b32.xlu1 %v1069_v30, %s3269_s7  ;;  %3042 = vrot.lane.b32.xlu0 %v3561_v31, %s3270_s5 }
 0x369   : > { %1339 = vrot.lane.b32.xlu1 %v1069_v30, %s3271_s10  ;;  %1179 = vrot.lane.b32.xlu0 %v3554_v28, %s3268_s9 }
 0x371   : > { %1464 = vrot.lane.b32.xlu1 %v3554_v28, %s4178_s24  ;;  %1177 = vrot.lane.b32.xlu0 %v1069_v30, %s3273_s25 }
 0x379   : > { %1466 = vrot.lane.b32.xlu1 %v1069_v30, %s4178_s24  ;;  %1468 = vrot.lane.b32.xlu0 %v3554_v28, %s3269_s7  ;;  %s4219_s24 = smov 104  }
 0x381   : > { %1337 = vrot.lane.b32.xlu0 %v3554_v28, %s3271_s10 }
 0x389   : > { %1335 = vrot.lane.b32.xlu0 %v1069_v30, %s4176_s26 }
 0x3c3   : > { %v1078_v32 = vpop.permute.xlu1 %1077 }
 0x3cb   : > { %v1080_v33 = vpop.permute.xlu0 %1079  ;;  %v1182_v34 = vpop.permute.xlu1 %1181 }
 0x3cc   : > { %2868 = vmatpush.xpose.msk.msra.mxu2 %vm1081_vm12, %v1080_v33  ;;  %2984 = vmatpush.xpose.msk.msra.mxu3 %vm1081_vm12, %v1080_v33 }
 0x3cd   : > { %2874 = vmatpush.xpose.msk.msrb.mxu0 %vm1081_vm12, %v1182_v34 }
 0x3d0   : > { %2869 = vmatpush.xpose.msk.msra.mxu2 %vm1081_vm12, %v1078_v32  ;;  %2985 = vmatpush.xpose.msk.msra.mxu3 %vm1081_vm12, %v1078_v32 }
 0x3d3   : > { %v3043_v36 = vpop.permute.xlu0 %3042  ;;  %2870 = vmatmul.msk.f32.vlgmr.msra.gmra.mxu2 %vm1081_vm12, %v3554_v28  ;;  %2871 = vmatmul.msk.f32.vlgmr.msra.gmra.mxu3 %vm1081_vm12, %v1069_v30  ;;  %v1471_v37 = vpop.permute.xlu1 %1470 }
 0x3d4   : > { %1325 = vmatpush.msrb.mxu2 %v1071_v35  ;;  %v3044_v38 = vunpack.i.l.bf16 %v3043_v36  ;;  %v3045_v39 = vunpack.i.h.bf16 %v3043_v36 }
 0x3d6   : > { %2892 = vmatpush.xpose.msk.msra.mxu2 %vm1081_vm12, %v1471_v37  ;;  %1166 = vmatpush.msrb.mxu3 %v3044_v38 }
 0x3d8   : > { %1167 = vmatpush.msrb.mxu3 %v3045_v39 }
 0x3db   : > { %v1180_v40 = vpop.permute.xlu0 %1179  ;;  %v1340_v41 = vpop.permute.xlu1 %1339 }
 0x3dc   : > { %2875 = vmatpush.xpose.msk.msrb.mxu0 %vm1081_vm12, %v1180_v40 }
 0x3e0   : > { %2884 = vmatpush.xpose.msk.msra.mxu0 %vm1081_vm12, %v1340_v41 }
 0x3e3   : > { %v1178_v43 = vpop.permute.xlu0 %1177 }
 0x3eb   : > { %v1469_v45 = vpop.permute.xlu0 %1468 }
 0x3ec   : > { %2893 = vmatpush.xpose.msk.msra.mxu2 %vm1081_vm12, %v1469_v45 }
 0x3f3   : > { %v1338_v46 = vpop.permute.xlu0 %1337 }
 0x3f4   : > { %2885 = vmatpush.xpose.msk.msra.mxu0 %vm1081_vm12, %v1338_v46 }
 0x3fb   : > { %v1336_v16 = vpop.permute.xlu0 %1335 }
 0x456   : > { %v1107_v53 = vpop.f32.mrf.mxu2  ;;  %v1110_v55 = vpop.f32.mrf.mxu3 }
 0x457   : > { %v1113_v54 = vmul.f32 0.35355338, %v1107_v53  ;;  %v1114_v57 = vmul.f32 0.35355338, %v1110_v55 }
 0x459   : > { %v1115_v56 = vsel %vm3598_vm15, %v1113_v54, -1e+30  ;;  %v1116_v59 = vsel %vm3606_vm3, %v1114_v57, -1e+30 }
 0x45a   : > { %v1118_v8 = vsel %vm1117_vm1, %v1115_v56, -inf  ;;  %v1121_v60 = vsel %vm1117_vm1, %v1116_v59, -inf }
 0x45b   : > { %1119 = vmax.xlane.f32.xlu2 %v1118_v8 }
 0x463   : > { %1122 = vmax.xlane.f32.xlu2 %v1121_v60 }
 0x4ce   : > { %v1120_v61 = vpop.xlane.xlu2 %1119 }
 0x4cf   : > { %v1124_v62 = vsub.f32 %v1115_v56, %v1120_v61 }
 0x4d1   : > { %v1126_v63 = vmul.f32 1.442695, %v1124_v62 }
 0x4d3   : > { %3113 = vpow2.f32 %v1126_v63 }
 0x4d6   : > { %v1123_v0 = vpop.xlane.xlu2 %1122 }
 0x4d7   : > { %v1125_v1 = vsub.f32 %v1116_v59, %v1123_v0 }
 0x4d9   : > { %v3114_v2 = vpop.eup %3113  ;;  %v1128_v3 = vmul.f32 1.442695, %v1125_v1 }
 0x4da   : > { %v1130_v4 = vsel %vm1117_vm1, %v3114_v2, 0.0 }
 0x4db   : > { %3115 = vpow2.f32 %v1128_v3  ;;  %1131 = vadd.xlane.f32.xlu2 %v1130_v4 }
 0x4e1   : > { %v3116_v5 = vpop.eup %3115 }
 0x4e2   : > { %v1133_v6 = vsel %vm1117_vm1, %v3116_v5, 0.0 }
 0x4e3   : > { %1134 = vadd.xlane.f32.xlu2 %v1133_v6 }
 0x4fb   : > { %1175 = vrot.lane.b32.xlu2 %v3554_v28, %s3273_s25 }
 0x503   : > { %1333 = vrot.lane.b32.xlu2 %v3554_v28, %s4176_s26  ;;  %v1465_v28 = vpop.permute.xlu1 %1464 }
 0x50b   : > { %v1467_v34 = vpop.permute.xlu1 %1466 }
 0x54e   : > { %v1132_v7 = vpop.xlane.xlu2 %1131 }
 0x54f   : > { %3117 = vrcp.f32 %v1132_v7 }
 0x555   : > { %v3118_v9 = vpop.eup %3117 }
 0x556   : > { %v1135_v10 = vpop.xlane.xlu2 %1134  ;;  %v1138_v11 = vmul.f32 %v3118_v9, %v3114_v2 }
 0x557   : > { %3119 = vrcp.f32 %v1135_v10 }
 0x558   : > { %2872 = vmatmul.msk.f32.vlgmr.msrb.gmra.mxu3 %vm1117_vm1, %v1138_v11 }
 0x55d   : > { %v3120_v12 = vpop.eup %3119 }
 0x55e   : > { %v1176_v13 = vpop.permute.xlu2 %1175  ;;  %v1139_v14 = vmul.f32 %v3120_v12, %v3116_v5 }
 0x55f   : > { %2876 = vmatmul.msk.f32.vlgmr.msrb.gmra.mxu0 %vm1081_vm12, %v1176_v13 }
 0x560   : > { %2873 = vmatmul.msk.f32.gmra.mxu3 %vm1117_vm1, %v1139_v14 }
 0x566   : > { %v1334_v15 = vpop.permute.xlu2 %1333 }
 0x567   : > { %2877 = vmatmul.msk.f32.gmra.mxu0 %vm1081_vm12, %v1178_v43 }
 0x56f   : > { %2886 = vmatmul.msk.f32.vlgmr.msra.gmra.mxu0 %vm1081_vm12, %v1334_v15 }
 0x577   : > { %2887 = vmatmul.msk.f32.gmra.mxu0 %vm1081_vm12, %v1336_v16 }
 0x5db   : > { %v1169_v17 = vpop.f32.mrf.mxu3 }
 0x5dc   : > { %v1208_v18 = vpop.f32.mrf.mxu0  ;;  %2882 = vmatmul.msk.f32.vlgmr.msrb.gmra.mxu2 %vm1081_vm12, %v1169_v17 }
 0x5dd   : > { %v1214_v20 = vmul.f32 0.35355338, %v1208_v18 }
 0x5df   : > { %v1216_v21 = vsel %vm3598_vm15, %v1214_v20, -1e+30 }
 0x5e0   : > { %v1218_v22 = vsel %vm1117_vm1, %v1216_v21, -inf }
 0x5e1   : > { %1219 = vmax.xlane.f32.xlu2 %v1218_v22 }
 0x5e3   : > { %v1172_v23 = vpop.f32.mrf.mxu3 }
 0x5e4   : > { %v1211_v24 = vpop.f32.mrf.mxu0  ;;  %2883 = vmatmul.msk.f32.gmra.mxu2 %vm1081_vm12, %v1172_v23 }
 0x5e5   : > { %v1215_v25 = vmul.f32 0.35355338, %v1211_v24 }
 0x5e7   : > { %v1217_v26 = vsel %vm3606_vm3, %v1215_v25, -1e+30 }
 0x5e8   : > { %v1221_v27 = vsel %vm1117_vm1, %v1217_v26, -inf }
 0x5e9   : > { %1222 = vmax.xlane.f32.xlu1 %v1221_v27 }
 0x5ec   : > { %v1366_v29 = vpop.f32.mrf.mxu0  ;;  %2894 = vmatmul.msk.f32.vlgmr.msra.gmra.mxu2 %vm1081_vm12, %v1465_v28 }
 0x5ed   : > { %v1372_v30 = vmul.f32 0.35355338, %v1366_v29 }
 0x5ef   : > { %v1374_v32 = vsel %vm3598_vm15, %v1372_v30, -1e+30 }
 0x5f0   : > { %v1376_v33 = vsel %vm1117_vm1, %v1374_v32, -inf }
 0x5f1   : > { %1377 = vmax.xlane.f32.xlu0 %v1376_v33 }
 0x5f4   : > { %v1369_v35 = vpop.f32.mrf.mxu0  ;;  %2895 = vmatmul.msk.f32.gmra.mxu2 %vm1081_vm12, %v1467_v34 }
 0x5f5   : > { %v1373_v36 = vmul.f32 0.35355338, %v1369_v35 }
 0x5f7   : > { %v1375_v37 = vsel %vm3606_vm3, %v1373_v36, -1e+30 }
 0x5f8   : > { %v1379_v38 = vsel %vm1117_vm1, %v1375_v37, -inf }
 0x5f9   : > { %1380 = vmax.xlane.f32.xlu1 %v1379_v38 }
 0x612   : > { %3047 = vrot.lane.b32.xlu1 %v3561_v31, %s4175_s28  ;;  %s834_s28 = sand.u32 1, %s4225_s3  }
 0x613   : > { %s2661_s27 = scalar_lea.sflag [#allocation4], %s834_s28 }
 0x61a   : > { %3057 = vrot.lane.b32.xlu1 %v3561_v31, %s4174_s6  ;;  %s2855_s6 = sshll.u32 %s834_s28, 4 }
 0x654   : > { %v1220_v40 = vpop.xlane.xlu2 %1219 }
 0x655   : > { %v1224_v43 = vsub.f32 %v1216_v21, %v1220_v40 }
 0x657   : > { %v1226_v45 = vmul.f32 1.442695, %v1224_v43 }
 0x659   : > { %3121 = vpow2.f32 %v1226_v45 }
 0x65c   : > { %v1223_v46 = vpop.xlane.xlu1 %1222 }
 0x65d   : > { %v1225_v51 = vsub.f32 %v1217_v26, %v1223_v46  ;;  %v1072_v46 = vld [vmem:[%s4145_s13 + $0x8] sm:$0xff] }
 0x65e   : > { %1296 = vmatpush.msrb.mxu1 %v1072_v46 }
 0x65f   : > { %v3645_v39 = vpop.f32.mrf.mxu2  ;;  %v1228_v56 = vmul.f32 1.442695, %v1225_v51  ;;  %v3122_v60 = vpop.eup %3121 }
 0x660   : > { %v1230_v0 = vsel %vm1117_vm1, %v3122_v60, 0.0 }
 0x661   : > { %3123 = vpow2.f32 %v1228_v56 }
 0x664   : > { %v1378_v47 = vpop.xlane.xlu0 %1377 }
 0x665   : > { %v1382_v53 = vsub.f32 %v1374_v32, %v1378_v47 }
 0x667   : > { %v3647_v41 = vpop.f32.mrf.mxu2  ;;  %v1384_v8 = vmul.f32 1.442695, %v1382_v53  ;;  %v3124_v3 = vpop.eup %3123 }
 0x668   : > { %v1233_v6 = vsel %vm1117_vm1, %v3124_v3, 0.0 }
 0x669   : > { %3125 = vpow2.f32 %v1384_v8 }
 0x66c   : > { %v1381_v57 = vpop.xlane.xlu1 %1380 }
 0x66d   : > { %v1383_v62 = vsub.f32 %v1375_v37, %v1381_v57 }
 0x66f   : > { %v1497_v49 = vpop.f32.mrf.mxu2  ;;  %v1386_v2 = vmul.f32 1.442695, %v1383_v62  ;;  %v3126_v4 = vpop.eup %3125 }
 0x670   : > { %v1503_v50 = vmul.f32 0.35355338, %v1497_v49  ;;  %v1388_v5 = vsel %vm1117_vm1, %v3126_v4, 0.0  ;;  %v1073_v49 = vld [vmem:[%s4145_s13 + $0x10] sm:$0xff] }
 0x671   : > { %3127 = vpow2.f32 %v1386_v2  ;;  %1454 = vmatpush.msra.mxu1 %v1073_v49 }
 0x672   : > { %v1505_v54 = vsel %vm3598_vm15, %v1503_v50, -1e+30 }
 0x673   : > { %v1507_v55 = vsel %vm1117_vm1, %v1505_v54, -inf }
 0x674   : > { %1508 = vmax.xlane.f32.xlu2 %v1507_v55  ;;  %v1074_v55 = vld [vmem:[%s4145_s13 + $0x18] sm:$0xff] }
 0x677   : > { %v1500_v59 = vpop.f32.mrf.mxu2  ;;  %v3128_v11 = vpop.eup %3127 }
 0x678   : > { %v1504_v61 = vmul.f32 0.35355338, %v1500_v59  ;;  %v1391_v12 = vsel %vm1117_vm1, %v3128_v11, 0.0 }
 0x67a   : > { %v1506_v63 = vsel %vm3606_vm3, %v1504_v61, -1e+30 }
 0x67b   : > { %v1510_v1 = vsel %vm1117_vm1, %v1506_v63, -inf }
 0x67c   : > { %1231 = vadd.xlane.f32.xlu2 %v1230_v0  ;;  %1511 = vmax.xlane.f32.xlu0 %v1510_v1 }
 0x684   : > { %1389 = vadd.xlane.f32.xlu2 %v1388_v5  ;;  %1234 = vadd.xlane.f32.xlu0 %v1233_v6  ;;  %v3048_v7 = vpop.permute.xlu1 %3047  ;;  %v3090_v6 = vld [vmem:[%s4146_s14] ss:$0 sm:$0xff] }
 0x685   : > { %v3049_v9 = vunpack.i.l.bf16 %v3048_v7  ;;  %v3050_v10 = vunpack.i.h.bf16 %v3048_v7 }
 0x687   : > { %1266 = vmatpush.msra.mxu3 %v3049_v9 }
 0x689   : > { %1267 = vmatpush.msra.mxu3 %v3050_v10 }
 0x68c   : > { %1392 = vadd.xlane.f32.xlu0 %v1391_v12  ;;  %v3058_v13 = vpop.permute.xlu1 %3057 }
 0x68d   : > { %v3059_v14 = vunpack.i.l.bf16 %v3058_v13  ;;  %v3060_v15 = vunpack.i.h.bf16 %v3058_v13 }
 0x68f   : > { %1555 = vmatpush.msrb.mxu0 %v3059_v14 }
 0x691   : > { %1556 = vmatpush.msrb.mxu0 %v3060_v15 }
 0x69c   : > { %3052 = vrot.lane.b32.xlu2 %v3561_v31, %s4173_s0 }
 0x6e7   : > { %v1509_v16 = vpop.xlane.xlu2 %1508 }
 0x6e8   : > { %v1513_v17 = vsub.f32 %v1505_v54, %v1509_v16 }
 0x6ea   : > { %v1515_v18 = vmul.f32 1.442695, %v1513_v17 }
 0x6ec   : > { %3129 = vpow2.f32 %v1515_v18 }
 0x6ef   : > { %v1232_v20 = vpop.xlane.xlu2 %1231  ;;  %v1512_v21 = vpop.xlane.xlu0 %1511 }
 0x6f0   : > { %3131 = vrcp.f32 %v1232_v20  ;;  %v1514_v22 = vsub.f32 %v1506_v63, %v1512_v21 }
 0x6f2   : > { %v3130_v23 = vpop.eup %3129  ;;  %v1517_v24 = vmul.f32 1.442695, %v1514_v22 }
 0x6f3   : > { %v1519_v25 = vsel %vm1117_vm1, %v3130_v23, 0.0 }
 0x6f4   : > { %3133 = vpow2.f32 %v1517_v24  ;;  %1520 = vadd.xlane.f32.xlu0 %v1519_v25 }
 0x6f6   : > { %v3132_v26 = vpop.eup %3131 }
 0x6f7   : > { %v1238_v27 = vmul.f32 %v3132_v26, %v3122_v60  ;;  %v1390_v28 = vpop.xlane.xlu2 %1389  ;;  %v1235_v29 = vpop.xlane.xlu0 %1234  ;;  %v1662_v26 = vld [vmem:[%s4149_s17 + $0x18] sm:$0xff] }
 0x6f8   : > { %3135 = vrcp.f32 %v1235_v29  ;;  %v1659_v29 = vld [vmem:[%s4149_s17] sm:$0xff] }
 0x6f9   : > { %2878 = vmatmul.msk.f32.vlgmr.msra.gmra.mxu3 %vm1117_vm1, %v1238_v27  ;;  %3137 = vrcp.f32 %v1390_v28  ;;  %v1661_v27 = vld [vmem:[%s4149_s17 + $0x10] sm:$0xff]  ;;  %v1660_v28 = vld [vmem:[%s4149_s17 + $0x8] sm:$0xff] }
 0x6fa   : > { %v3134_v31 = vpop.eup %3133 }
 0x6fb   : > { %v1522_v30 = vsel %vm1117_vm1, %v3134_v31, 0.0 }
 0x6fc   : > { %1523 = vadd.xlane.f32.xlu0 %v1522_v30 }
 0x6fe   : > { %v3136_v32 = vpop.eup %3135 }
 0x6ff   : > { %v3053_v33 = vpop.permute.xlu2 %3052  ;;  %v1239_v35 = vmul.f32 %v3136_v32, %v3124_v3  ;;  %v1393_v37 = vpop.xlane.xlu0 %1392 }
 0x700   : > { %v3054_v34 = vunpack.i.l.bf16 %v3053_v33  ;;  %v3055_v36 = vunpack.i.h.bf16 %v3053_v33  ;;  %v3138_v38 = vpop.eup %3137  ;;  %3139 = vrcp.f32 %v1393_v37  ;;  %v1713_v33 = vld [vmem:[%s4151_s19 + $0x78] sm:$0xff] }
 0x701   : > { %2879 = vmatmul.msk.f32.gmra.mxu3 %vm1117_vm1, %v1239_v35  ;;  %v1396_v40 = vmul.f32 %v3138_v38, %v3126_v4  ;;  %1718 = vmatpush.msrb.mxu2 %v1713_v33  ;;  %v1711_v35 = vld [vmem:[%s4151_s19 + $0x68] sm:$0xff]  ;;  %v1710_v38 = vld [vmem:[%s4151_s19 + $0x60] sm:$0xff] }
 0x702   : > { %1424 = vmatpush.msrb.mxu3 %v3054_v34  ;;  %v1712_v34 = vld [vmem:[%s4151_s19 + $0x70] sm:$0xff] }
 0x703   : > { %1719 = vmatpush.msrb.mxu2 %v1712_v34 }
 0x704   : > { %1425 = vmatpush.msrb.mxu3 %v3055_v36 }
 0x705   : > { %1720 = vmatpush.msrb.mxu2 %v1711_v35 }
 0x706   : > { %v3140_v43 = vpop.eup %3139  ;;  %1585 = vmatpush.msra.mxu3 %v1074_v55 }
 0x707   : > { %v1397_v45 = vmul.f32 %v3140_v43, %v3128_v11  ;;  %1721 = vmatpush.msrb.mxu2 %v1710_v38 }
 0x709   : > { %2888 = vmatmul.msk.f32.vlgmr.msrb.gmra.mxu3 %vm1117_vm1, %v1396_v40 }
 0x711   : > { %2889 = vmatmul.msk.f32.gmra.mxu3 %vm1117_vm1, %v1397_v45  ;;  %v1709_v45 = vld [vmem:[%s4151_s19 + $0x58] sm:$0xff] }
 0x712   : > { %1722 = vmatpush.msrb.mxu2 %v1709_v45  ;;  %v2906_v45 = vld [vmem:[%s4143_s11 + $0x30] sm:$0xff] }
 0x767   : > { %v1521_v47 = vpop.xlane.xlu0 %1520 }
 0x768   : > { %3141 = vrcp.f32 %v1521_v47  ;;  %v1708_v47 = vld [vmem:[%s4151_s19 + $0x50] sm:$0xff] }
 0x769   : > { %1723 = vmatpush.msrb.mxu2 %v1708_v47  ;;  %v2904_v47 = vld [vmem:[%s4143_s11 + $0x20] sm:$0xff] }
 0x76e   : > { %v3142_v50 = vpop.eup %3141 }
 0x76f   : > { %v1527_v51 = vmul.f32 %v3142_v50, %v3130_v23  ;;  %v1524_v53 = vpop.xlane.xlu0 %1523  ;;  %v1707_v50 = vld [vmem:[%s4151_s19 + $0x48] sm:$0xff] }
 0x770   : > { %3143 = vrcp.f32 %v1524_v53  ;;  %v1706_v53 = vld [vmem:[%s4151_s19 + $0x40] sm:$0xff]  ;;  %1724 = vmatpush.msrb.mxu2 %v1707_v50 }
 0x771   : > { %2896 = vmatmul.msk.f32.vlgmr.msrb.gmra.mxu0 %vm1117_vm1, %v1527_v51 }
 0x772   : > { %1725 = vmatpush.msrb.mxu2 %v1706_v53 }
 0x776   : > { %v3144_v54 = vpop.eup %3143 }
 0x777   : > { %v1528_v56 = vmul.f32 %v3144_v54, %v3134_v31 }
 0x779   : > { %2897 = vmatmul.msk.f32.gmra.mxu0 %vm1117_vm1, %v1528_v56  ;;  %v1705_v56 = vld [vmem:[%s4151_s19 + $0x38] sm:$0xff] }
 0x77a   : > { %1726 = vmatpush.msrb.mxu2 %v1705_v56 }
 0x77c   : > { %v1269_v8 = vpop.f32.mrf.mxu3 }
 0x77d   : > { %2880 = vmatmul.msk.f32.vlgmr.msrb.gmra.mxu1 %vm1081_vm12, %v1269_v8 }
 0x77e   : > { %1685 = vmatpush.msrb.mxu1 %v1662_v26 }
 0x780   : > { %1686 = vmatpush.msrb.mxu1 %v1661_v27 }
 0x782   : > { %1687 = vmatpush.msrb.mxu1 %v1660_v28 }
 0x784   : > { %v1272_v57 = vpop.f32.mrf.mxu3  ;;  %1688 = vmatpush.msrb.mxu1 %v1659_v29 }
 0x785   : > { %2881 = vmatmul.msk.f32.gmra.mxu1 %vm1081_vm12, %v1272_v57 }
 0x78c   : > { %v1427_v59 = vpop.f32.mrf.mxu3 }
 0x78d   : > { %2890 = vmatmul.msk.f32.vlgmr.msra.gmra.mxu1 %vm1081_vm12, %v1427_v59  ;;  %v3091_v59 = vld [vmem:[%s4147_s15] ss:$0 sm:$0xff] }
 0x794   : > { %v1430_v60 = vpop.f32.mrf.mxu3 }
 0x795   : > { %2891 = vmatmul.msk.f32.gmra.mxu1 %vm1081_vm12, %v1430_v60  ;;  %v1704_v60 = vld [vmem:[%s4151_s19 + $0x30] sm:$0xff] }
 0x796   : > { %1727 = vmatpush.msrb.mxu2 %v1704_v60 }
 0x7ee   : > { %v1558_v61 = vpop.f32.mrf.mxu0 }
 0x7ef   : > { %2898 = vmatmul.msk.f32.vlgmr.msra.gmra.mxu3 %vm1081_vm12, %v1558_v61 }
 0x7f6   : > { %v1561_v62 = vpop.f32.mrf.mxu0 }
 0x7f7   : > { %2899 = vmatmul.msk.f32.gmra.mxu3 %vm1081_vm12, %v1561_v62 }
 0x7fa   : > { %v1298_v63 = vpop.f32.mrf.mxu1 }
 0x7fb   : > { %v1328_v2 = vadd.f32 %v3645_v39, %v1298_v63 }
 0x802   : > { %v1301_v0 = vpop.f32.mrf.mxu1 }
 0x803   : > { %v1331_v10 = vadd.f32 %v3647_v41, %v1301_v0  ;;  %v3092_v0 = vld [vmem:[%s4148_s16] ss:$0 sm:$0xff] }
 0x80a   : > { %v1456_v1 = vpop.f32.mrf.mxu1 }
 0x80b   : > { %v1462_v3 = vadd.f32 %v1456_v1, %v1328_v2  ;;  %v1703_v1 = vld [vmem:[%s4151_s19 + $0x28] sm:$0xff] }
 0x80c   : > { %1728 = vmatpush.msrb.mxu2 %v1703_v1 }
 0x812   : > { %v1459_v9 = vpop.f32.mrf.mxu1 }
 0x813   : > { %v1463_v12 = vadd.f32 %v1459_v9, %v1331_v10 }
 0x872   : > { %v1587_v4 = vpop.f32.mrf.mxu3 }
 0x873   : > { %v1593_v5 = vadd.f32 %v1587_v4, %v1462_v3  ;;  %v1702_v4 = vld [vmem:[%s4151_s19 + $0x20] sm:$0xff] }
 0x874   : > { %1729 = vmatpush.msrb.mxu2 %v1702_v4  ;;  %v3096_v4 = vld [vmem:[%s4214_s4 + $0x1] ss:$0 sm:$0xff] }
 0x875   : > { %v1595_v7 = vadd.f32 %v1593_v5, %v3515_v42 }
 0x877   : > { %v3690_v11 = vadd.f32 %v3090_v6, %v1595_v7  ;;  %v1701_v7 = vld [vmem:[%s4151_s19 + $0x18] sm:$0xff] }
 0x878   : > { %1730 = vmatpush.msrb.mxu2 %v1701_v7 }
 0x879   : > { %v1605_v13 = vsel %vm894_vm0, %v3690_v11, 0.0 }
 0x87a   : > { %v1590_v14 = vpop.f32.mrf.mxu3  ;;  %1606 = vadd.xlane.f32.xlu1 %v1605_v13 }
 0x87b   : > { %v1594_v39 = vadd.f32 %v1590_v14, %v1463_v12 }
 0x87d   : > { %v1596_v15 = vadd.f32 %v1594_v39, %v3519_v44  ;;  %v1700_v39 = vld [vmem:[%s4151_s19 + $0x10] sm:$0xff] }
 0x87e   : > { %1731 = vmatpush.msrb.mxu2 %v1700_v39 }
 0x87f   : > { %v3695_v16 = vadd.f32 %v3090_v6, %v1596_v15  ;;  %v1699_v15 = vld [vmem:[%s4151_s19 + $0x8] sm:$0xff] }
 0x880   : > { %1732 = vmatpush.msrb.mxu2 %v1699_v15  ;;  %v3097_v15 = vld [vmem:[%s4144_s12 + $0x1] ss:$0 sm:$0xff] }
 0x881   : > { %v1608_v17 = vsel %vm894_vm0, %v3695_v16, 0.0 }
 0x882   : > { %1609 = vadd.xlane.f32.xlu0 %v1608_v17  ;;  %v1698_v17 = vld [vmem:[%s4151_s19] sm:$0xff] }
 0x883   : > { %1733 = vmatpush.msrb.mxu2 %v1698_v17 }
 0x8ed   : > { %v1607_v42 = vpop.xlane.xlu1 %1606 }
 0x8ee   : > { %v1611_v41 = vmul.f32 %v1607_v42, %v3499_v19  ;;  %v3093_v42 = vld [vmem:[%s4150_s18] ss:$0 sm:$0xff] }
 0x8f0   : > { %v1613_v18 = vsub.f32 %v3690_v11, %v1611_v41 }
 0x8f2   : > { %v1615_v20 = vmul.f32 %v1613_v18, %v1613_v18 }
 0x8f4   : > { %v1617_v21 = vsel %vm894_vm0, %v1615_v20, 0.0 }
 0x8f5   : > { %1618 = vadd.xlane.f32.xlu2 %v1617_v21  ;;  %v1610_v22 = vpop.xlane.xlu0 %1609 }
 0x8f6   : > { %v1612_v23 = vmul.f32 %v1610_v22, %v3499_v19 }
 0x8f8   : > { %v3704_v44 = vsub.f32 %v3695_v16, %v1612_v23 }
 0x8fa   : > { %v1616_v24 = vmul.f32 %v3704_v44, %v3704_v44 }
 0x8fc   : > { %v1620_v25 = vsel %vm894_vm0, %v1616_v24, 0.0 }
 0x8fd   : > { %1621 = vadd.xlane.f32.xlu0 %v1620_v25 }
 0x968   : > { %v1619_v31 = vpop.xlane.xlu2 %1618 }
 0x969   : > { %v1623_v30 = vmul.f32 %v1619_v31, %v3499_v19 }
 0x96b   : > { %v1625_v32 = vadd.f32 1e-05, %v1623_v30 }
 0x96d   : > { %3145 = vrsqrt.f32 %v1625_v32  ;;  %vm1633_vm5 = vweird.f32 %v1625_v32 }
 0x970   : > { %v1622_v36 = vpop.xlane.xlu0 %1621 }
 0x971   : > { %v1624_v37 = vmul.f32 %v1622_v36, %v3499_v19 }
 0x973   : > { %v3146_v40 = vpop.eup %3145  ;;  %v1626_v43 = vadd.f32 1e-05, %v1624_v37 }
 0x974   : > { %v1628_v46 = vmul.f32 %v3146_v40, %v1625_v32  ;;  %vm1634_vm4 = vweird.f32 %v3146_v40 }
 0x975   : > { %3147 = vrsqrt.f32 %v1626_v43  ;;  %vm1635_vm6 = vmor %vm1633_vm5, %vm1634_vm4  ;;  %vm1643_vm8 = vweird.f32 %v1626_v43 }
 0x976   : > { %v1629_v49 = vmul.f32 %v3146_v40, %v1628_v46  ;;  %v2905_v46 = vld [vmem:[%s4143_s11 + $0x28] sm:$0xff] }
 0x978   : > { %v1630_v51 = vmul.f32 0.5, %v1629_v49 }
 0x97a   : > { %v1631_v54 = vsub.f32 1.5, %v1630_v51 }
 0x97b   : > { %v3148_v55 = vpop.eup %3147 }
 0x97c   : > { %v1632_v8 = vmul.f32 %v3146_v40, %v1631_v54  ;;  %v1638_v57 = vmul.f32 %v3148_v55, %v1626_v43  ;;  %vm1644_vm7 = vweird.f32 %v3148_v55  ;;  %v2907_v43 = vld [vmem:[%s4143_s11 + $0x38] sm:$0xff] }
 0x97d   : > { %vm1645_vm9 = vmor %vm1643_vm8, %vm1644_vm7  ;;  %1829 = vmatpush.msra.mxu0 %v2907_v43 }
 0x97e   : > { %v1636_v61 = vsel %vm1635_vm6, %v3146_v40, %v1632_v8  ;;  %v1639_v62 = vmul.f32 %v3148_v55, %v1638_v57 }
 0x97f   : > { %v1647_v63 = vmul.f32 %v1636_v61, %v1613_v18  ;;  %1830 = vmatpush.msra.mxu0 %v2906_v45 }
 0x980   : > { %v1640_v2 = vmul.f32 0.5, %v1639_v62 }
 0x981   : > { %v1652_v3 = vmul.f32 %v3091_v59, %v1647_v63  ;;  %1831 = vmatpush.msra.mxu0 %v2905_v46 }
 0x982   : > { %v1641_v5 = vsub.f32 1.5, %v1640_v2 }
 0x983   : > { %v1657_v6 = vadd.f32 %v3092_v0, %v1652_v3  ;;  %1832 = vmatpush.msra.mxu0 %v2904_v47 }
 0x984   : > { %v1642_v9 = vmul.f32 %v3148_v55, %v1641_v5 }
 0x985   : > { %2900 = vmatmul.msk.f32.vlgmr.msrb.gmra.mxu1 %vm894_vm0, %v1657_v6 }
 0x986   : > { %v1646_v10 = vsel %vm1645_vm9, %v3148_v55, %v1642_v9 }
 0x987   : > { %v1648_v12 = vmul.f32 %v1646_v10, %v3704_v44  ;;  %v3094_v44 = vld [vmem:[%s4152_s20] ss:$0 sm:$0xff] }
 0x989   : > { %v1653_v13 = vmul.f32 %v3091_v59, %v1648_v12 }
 0x98b   : > { %v1658_v14 = vadd.f32 %v3092_v0, %v1653_v13  ;;  %v3095_v0 = vld [vmem:[%s4213_s2 + $0x1] ss:$0 sm:$0xff] }
 0x98d   : > { %2901 = vmatmul.msk.f32.gmra.mxu1 %vm894_vm0, %v1658_v14 }
 0xa02   : > { %v1690_v41 = vpop.f32.mrf.mxu1 }
 0xa03   : > { %v1691_v18 = vadd.f32 %v3093_v42, %v1690_v41 }
 0xa05   : > { %v1696_v20 = vmax.f32 %v1691_v18, 0.0 }
 0xa07   : > { %1734 = vmatmul.f32.vlgmr.msrb.gmra.mxu2 %v1696_v20 }
 0xa0a   : > { %v1693_v21 = vpop.f32.mrf.mxu1 }
 0xa0b   : > { %v1694_v22 = vadd.f32 %v3093_v42, %v1693_v21  ;;  %v2911_v21 = vld [vmem:[%s4145_s13 + $0x20] sm:$0xff] }
 0xa0c   : > { %2093 = vmatpush.msra.mxu2 %v2911_v21 }
 0xa0d   : > { %v1697_v23 = vmax.f32 %v1694_v22, 0.0 }
 0xa0f   : > { %1737 = vmatmul.f32.gmra.mxu2 %v1697_v23 }
 0xa8a   : > { %v1735_v24 = vpop.f32.mrf.mxu2 }
 0xa8b   : > { %v1736_v25 = vadd.f32 %v3094_v44, %v1735_v24 }
 0xa8d   : > { %v3787_v26 = vadd.f32 %v1736_v25, %v3690_v11 }
 0xa8f   : > { %v1747_v27 = vsel %vm894_vm0, %v3787_v26, 0.0 }
 0xa90   : > { %1748 = vadd.xlane.f32.xlu0 %v1747_v27 }
 0xa92   : > { %v1738_v28 = vpop.f32.mrf.mxu2 }
 0xa93   : > { %v1739_v29 = vadd.f32 %v3094_v44, %v1738_v28 }
 0xa95   : > { %v3792_v31 = vadd.f32 %v1739_v29, %v3695_v16 }
 0xa97   : > { %v1750_v30 = vsel %vm894_vm0, %v3792_v31, 0.0 }
 0xa98   : > { %1751 = vadd.xlane.f32.xlu0 %v1750_v30 }
 0xb03   : > { %v1749_v32 = vpop.xlane.xlu0 %1748 }
 0xb04   : > { %v1753_v33 = vmul.f32 %v1749_v32, %v3499_v19 }
 0xb06   : > { %v1755_v34 = vsub.f32 %v3787_v26, %v1753_v33 }
 0xb08   : > { %v1757_v11 = vmul.f32 %v1755_v34, %v1755_v34 }
 0xb0a   : > { %v1759_v35 = vsel %vm894_vm0, %v1757_v11, 0.0 }
 0xb0b   : > { %1760 = vadd.xlane.f32.xlu0 %v1759_v35  ;;  %v1752_v36 = vpop.xlane.xlu0 %1751 }
 0xb0c   : > { %v1754_v37 = vmul.f32 %v1752_v36, %v3499_v19 }
 0xb0e   : > { %v1756_v38 = vsub.f32 %v3792_v31, %v1754_v37 }
 0xb10   : > { %v1758_v16 = vmul.f32 %v1756_v38, %v1756_v38 }
 0xb12   : > { %v1762_v40 = vsel %vm894_vm0, %v1758_v16, 0.0 }
 0xb13   : > { %1763 = vadd.xlane.f32.xlu0 %v1762_v40 }
 0xb7e   : > { %v1761_v49 = vpop.xlane.xlu0 %1760 }
 0xb7f   : > { %v1765_v50 = vmul.f32 %v1761_v49, %v3499_v19 }
 0xb81   : > { %v1767_v51 = vadd.f32 1e-05, %v1765_v50 }
 0xb83   : > { %3149 = vrsqrt.f32 %v1767_v51  ;;  %vm1775_vm11 = vweird.f32 %v1767_v51 }
 0xb86   : > { %v1764_v53 = vpop.xlane.xlu0 %1763 }
 0xb87   : > { %v1766_v54 = vmul.f32 %v1764_v53, %v3499_v19 }
 0xb89   : > { %v3150_v55 = vpop.eup %3149  ;;  %v1768_v56 = vadd.f32 1e-05, %v1766_v54 }
 0xb8a   : > { %v1770_v8 = vmul.f32 %v3150_v55, %v1767_v51  ;;  %vm1776_vm10 = vweird.f32 %v3150_v55 }
 0xb8b   : > { %3151 = vrsqrt.f32 %v1768_v56  ;;  %vm1777_vm13 = vmor %vm1775_vm11, %vm1776_vm10  ;;  %vm1785_vm2 = vweird.f32 %v1768_v56 }
 0xb8c   : > { %v1771_v57 = vmul.f32 %v3150_v55, %v1770_v8 }
 0xb8e   : > { %v1772_v59 = vmul.f32 0.5, %v1771_v57 }
 0xb90   : > { %v1773_v60 = vsub.f32 1.5, %v1772_v59 }
 0xb91   : > { %v3152_v61 = vpop.eup %3151 }
 0xb92   : > { %v1774_v62 = vmul.f32 %v3150_v55, %v1773_v60  ;;  %v1780_v63 = vmul.f32 %v3152_v61, %v1768_v56  ;;  %vm1786_vm14 = vweird.f32 %v3152_v61 }
 0xb93   : > { %vm1787_vm4 = vmor %vm1785_vm2, %vm1786_vm14 }
 0xb94   : > { %v1778_v1 = vsel %vm1777_vm13, %v3150_v55, %v1774_v62  ;;  %v1781_v2 = vmul.f32 %v3152_v61, %v1780_v63 }
 0xb95   : > { %v1789_v3 = vmul.f32 %v1778_v1, %v1755_v34 }
 0xb96   : > { %v1782_v5 = vmul.f32 0.5, %v1781_v2 }
 0xb97   : > { %v1794_v6 = vmul.f32 %v3095_v0, %v1789_v3 }
 0xb98   : > { %v1783_v7 = vsub.f32 1.5, %v1782_v5 }
 0xb99   : > { %v1799_v9 = vadd.f32 %v3096_v4, %v1794_v6 }
 0xb9a   : > { %v1784_v10 = vmul.f32 %v3152_v61, %v1783_v7 }
 0xb9b   : > { %2909 = vmatmul.msk.f32.vlgmr.msra.gmra.mxu0 %vm894_vm0, %v1799_v9 }
 0xb9c   : > { %v1788_v12 = vsel %vm1787_vm4, %v3152_v61, %v1784_v10 }
 0xb9d   : > { %v1790_v13 = vmul.f32 %v1788_v12, %v1756_v38 }
 0xb9f   : > { %v1795_v14 = vmul.f32 %v3095_v0, %v1790_v13 }
 0xba1   : > { %v1800_v39 = vadd.f32 %v3096_v4, %v1795_v14 }
 0xba3   : > { %2910 = vmatmul.msk.f32.gmra.mxu0 %vm894_vm0, %v1800_v39 }
 0xc18   : > { %v1834_v17 = vpop.f32.mrf.mxu0 }
 0xc19   : > { %v1835_v42 = vadd.f32 %v3097_v15, %v1834_v17 }
 0xc1b   : > { %1847 = vrot.lane.b32.xlu2 %v1835_v42, %s3267_s30 }
 0xc20   : > { %v1837_v41 = vpop.f32.mrf.mxu0 }
 0xc21   : > { %v1838_v18 = vadd.f32 %v3097_v15, %v1837_v41 }
 0xc23   : > { %1849 = vrot.lane.b32.xlu1 %v1838_v18, %s3267_s30  ;;  %v3829_v20 = vpack.i.bf16 %v1835_v42, %v1838_v18  ;;  %s4220_s30 = smov 112  }
 0xc2b   : > { %3062 = vrot.lane.b32.xlu1 %v3829_v20, %s3270_s5  ;;  %s4223_s5 = smov 48  }
 0xc33   : > { %1947 = vrot.lane.b32.xlu1 %v1835_v42, %s3268_s9 }
 0xc3b   : > { %1943 = vrot.lane.b32.xlu1 %v1835_v42, %s3273_s25 }
 0xc43   : > { %2238 = vrot.lane.b32.xlu1 %v1838_v18, %s3269_s7 }
 0xc4b   : > { %2107 = vrot.lane.b32.xlu1 %v1838_v18, %s3271_s10 }
 0xc53   : > { %2232 = vrot.lane.b32.xlu1 %v1835_v42, %s4219_s24 }
 0xc5b   : > { %2234 = vrot.lane.b32.xlu1 %v1838_v18, %s4219_s24  ;;  %s836_s24 = scalar_lea.vmem [#allocation3], %s2855_s6 }
 0xc5c   : > { %s2683_s26 = sshll.u32 %s836_s24, 4  ;;  %s2684_s26 = int_to_ptr.vmem [resolvable:$true] %s2683_s26 }
 0xc75   : > { %v1848_v23 = vpop.permute.xlu2 %1847 }
 0xc95   : > { %v1850_v22 = vpop.permute.xlu1 %1849 }
 0xc96   : > { %2915 = vmatpush.xpose.msk.msrb.mxu3 %vm1081_vm12, %v1850_v22 }
 0xc9a   : > { %2916 = vmatpush.xpose.msk.msrb.mxu3 %vm1081_vm12, %v1848_v23 }
 0xc9d   : > { %2917 = vmatmul.msk.f32.vlgmr.msrb.gmra.mxu3 %vm1081_vm12, %v1835_v42  ;;  %v3063_v44 = vpop.permute.xlu1 %3062 }
 0xc9e   : > { %v3064_v24 = vunpack.i.l.bf16 %v3063_v44  ;;  %v3065_v25 = vunpack.i.h.bf16 %v3063_v44 }
 0xca0   : > { %1934 = vmatpush.msra.mxu1 %v3064_v24 }
 0xca2   : > { %1935 = vmatpush.msra.mxu1 %v3065_v25 }
 0xca5   : > { %2918 = vmatmul.msk.f32.gmra.mxu3 %vm1081_vm12, %v1838_v18  ;;  %v1948_v27 = vpop.permute.xlu1 %1947 }
 0xcad   : > { %v1944_v28 = vpop.permute.xlu1 %1943 }
 0xcb5   : > { %v2239_v29 = vpop.permute.xlu1 %2238 }
 0xcb6   : > { %2939 = vmatpush.xpose.msk.msrb.mxu2 %vm1081_vm12, %v2239_v29 }
 0xcbd   : > { %v2108_v60 = vpop.permute.xlu1 %2107 }
 0xcc5   : > { %v2233_v4 = vpop.permute.xlu1 %2232 }
 0xccd   : > { %v2235_v10 = vpop.permute.xlu1 %2234 }
 0xd20   : > { %v1876_v30 = vpop.f32.mrf.mxu3 }
 0xd21   : > { %v1882_v32 = vmul.f32 0.35355338, %v1876_v30 }
 0xd23   : > { %v1884_v33 = vsel %vm3598_vm15, %v1882_v32, -1e+30 }
 0xd24   : > { %v1886_v34 = vsel %vm1117_vm1, %v1884_v33, -inf }
 0xd25   : > { %1887 = vmax.xlane.f32.xlu0 %v1886_v34 }
 0xd28   : > { %v1879_v11 = vpop.f32.mrf.mxu3 }
 0xd29   : > { %v1883_v35 = vmul.f32 0.35355338, %v1879_v11 }
 0xd2b   : > { %v1885_v36 = vsel %vm3606_vm3, %v1883_v35, -1e+30 }
 0xd2c   : > { %v1889_v37 = vsel %vm1117_vm1, %v1885_v36, -inf }
 0xd2d   : > { %1890 = vmax.xlane.f32.xlu0 %v1889_v37 }
 0xd98   : > { %v1888_v38 = vpop.xlane.xlu0 %1887 }
 0xd99   : > { %v1892_v16 = vsub.f32 %v1884_v33, %v1888_v38 }
 0xd9b   : > { %v1894_v40 = vmul.f32 1.442695, %v1892_v16 }
 0xd9d   : > { %3153 = vpow2.f32 %v1894_v40 }
 0xda0   : > { %v1891_v43 = vpop.xlane.xlu0 %1890 }
 0xda1   : > { %v1893_v45 = vsub.f32 %v1885_v36, %v1891_v43 }
 0xda3   : > { %v3154_v46 = vpop.eup %3153  ;;  %v1896_v47 = vmul.f32 1.442695, %v1893_v45 }
 0xda4   : > { %v1898_v49 = vsel %vm1117_vm1, %v3154_v46, 0.0 }
 0xda5   : > { %3155 = vpow2.f32 %v1896_v47  ;;  %1899 = vadd.xlane.f32.xlu0 %v1898_v49 }
 0xdab   : > { %v3156_v50 = vpop.eup %3155 }
 0xdac   : > { %v1901_v51 = vsel %vm1117_vm1, %v3156_v50, 0.0 }
 0xdad   : > { %1902 = vadd.xlane.f32.xlu2 %v1901_v51 }
 0xdb9   : > { %1949 = vrot.lane.b32.xlu0 %v1838_v18, %s3268_s9  ;;  %s4221_s9 = smov 56  }
 0xdc1   : > { %1945 = vrot.lane.b32.xlu0 %v1838_v18, %s3273_s25 }
 0xdc5   : > { %2101 = vrot.lane.b32.xlu2 %v1835_v42, %s4220_s30 }
 0xdc9   : > { %2236 = vrot.lane.b32.xlu0 %v1835_v42, %s3269_s7  ;;  %s4222_s7 = smov 40  }
 0xdd1   : > { %2105 = vrot.lane.b32.xlu0 %v1835_v42, %s3271_s10  ;;  %s2859_s10 = sshll.u32 %s3437_s8, 1 }
 0xdd2   : > { %p867_p11 = scmp.lt.s32.totalorder %s2859_s10, 3 }
 0xdd4   : > { %s4238_s10 = smov (!%p867_p11, %s2859_s10), 3 }
 0xdd5   : > { %s4054_s0 = sshll.u32 %s4238_s10, 3  ;;  %s4227_s10 = sld [smem:[#allocation25_spill]] }
 0xdd9   : > { %2103 = vrot.lane.b32.xlu0 %v1838_v18, %s4220_s30 }
 0xe18   : > { %v1900_v53 = vpop.xlane.xlu0 %1899 }
 0xe19   : > { %3157 = vrcp.f32 %v1900_v53 }
 0xe1f   : > { %v3158_v54 = vpop.eup %3157 }
 0xe20   : > { %v1906_v55 = vmul.f32 %v3158_v54, %v3154_v46  ;;  %v1903_v56 = vpop.xlane.xlu2 %1902 }
 0xe21   : > { %3159 = vrcp.f32 %v1903_v56 }
 0xe22   : > { %2919 = vmatmul.msk.f32.vlgmr.msra.gmra.mxu1 %vm1117_vm1, %v1906_v55 }
 0xe27   : > { %v3160_v8 = vpop.eup %3159 }
 0xe28   : > { %v1907_v57 = vmul.f32 %v3160_v8, %v3156_v50  ;;  %v2102_v0 = vpop.permute.xlu2 %2101 }
 0xe2a   : > { %2920 = vmatmul.msk.f32.gmra.mxu1 %vm1117_vm1, %v1907_v57 }
 0xe2b   : > { %v1950_v59 = vpop.permute.xlu0 %1949 }
 0xe2c   : > { %2921 = vmatpush.xpose.msk.msrb.mxu0 %vm1081_vm12, %v1950_v59 }
 0xe30   : > { %2922 = vmatpush.xpose.msk.msrb.mxu0 %vm1081_vm12, %v1948_v27 }
 0xe33   : > { %v1946_v61 = vpop.permute.xlu0 %1945  ;;  %2923 = vmatmul.msk.f32.vlgmr.msrb.gmra.mxu0 %vm1081_vm12, %v1944_v28 }
 0xe34   : > { %2931 = vmatpush.xpose.msk.msra.mxu0 %vm1081_vm12, %v2108_v60 }
 0xe3b   : > { %v2237_v62 = vpop.permute.xlu0 %2236  ;;  %2924 = vmatmul.msk.f32.gmra.mxu0 %vm1081_vm12, %v1946_v61 }
 0xe3c   : > { %2940 = vmatpush.xpose.msk.msrb.mxu2 %vm1081_vm12, %v2237_v62 }
 0xe43   : > { %v2106_v63 = vpop.permute.xlu0 %2105 }
 0xe44   : > { %2932 = vmatpush.xpose.msk.msra.mxu0 %vm1081_vm12, %v2106_v63 }
 0xe47   : > { %2933 = vmatmul.msk.f32.vlgmr.msra.gmra.mxu0 %vm1081_vm12, %v2102_v0 }
 0xe4b   : > { %v2104_v1 = vpop.permute.xlu0 %2103 }
 0xe4f   : > { %2934 = vmatmul.msk.f32.gmra.mxu0 %vm1081_vm12, %v2104_v1 }
 0xe9f   : > { %v1937_v2 = vpop.f32.mrf.mxu1 }
 0xea0   : > { %2929 = vmatmul.msk.f32.vlgmr.msra.gmra.mxu2 %vm1081_vm12, %v1937_v2 }
 0xea7   : > { %v1940_v3 = vpop.f32.mrf.mxu1 }
 0xea8   : > { %2930 = vmatmul.msk.f32.gmra.mxu2 %vm1081_vm12, %v1940_v3 }
 0xeb0   : > { %v1976_v5 = vpop.f32.mrf.mxu0  ;;  %2941 = vmatmul.msk.f32.vlgmr.msrb.gmra.mxu2 %vm1081_vm12, %v2233_v4 }
 0xeb1   : > { %v1982_v6 = vmul.f32 0.35355338, %v1976_v5 }
 0xeb3   : > { %v1984_v7 = vsel %vm3598_vm15, %v1982_v6, -1e+30 }
 0xeb4   : > { %v1986_v9 = vsel %vm1117_vm1, %v1984_v7, -inf }
 0xeb5   : > { %1987 = vmax.xlane.f32.xlu1 %v1986_v9 }
 0xeb8   : > { %v1979_v12 = vpop.f32.mrf.mxu0  ;;  %2942 = vmatmul.msk.f32.gmra.mxu2 %vm1081_vm12, %v2235_v10 }
 0xeb9   : > { %v1983_v13 = vmul.f32 0.35355338, %v1979_v12 }
 0xebb   : > { %v1985_v14 = vsel %vm3606_vm3, %v1983_v13, -1e+30 }
 0xebc   : > { %v1989_v39 = vsel %vm1117_vm1, %v1985_v14, -inf }
 0xebd   : > { %1990 = vmax.xlane.f32.xlu0 %v1989_v39 }
 0xec4   : > { %v2134_v15 = vpop.f32.mrf.mxu0 }
 0xec5   : > { %v2140_v17 = vmul.f32 0.35355338, %v2134_v15 }
 0xec7   : > { %v2142_v42 = vsel %vm3598_vm15, %v2140_v17, -1e+30 }
 0xec8   : > { %v2144_v41 = vsel %vm1117_vm1, %v2142_v42, -inf }
 0xec9   : > { %2145 = vmax.xlane.f32.xlu2 %v2144_v41 }
 0xecc   : > { %v2137_v18 = vpop.f32.mrf.mxu0 }
 0xecd   : > { %v2141_v21 = vmul.f32 0.35355338, %v2137_v18 }
 0xecf   : > { %v2143_v22 = vsel %vm3606_vm3, %v2141_v21, -1e+30 }
 0xed0   : > { %v2147_v23 = vsel %vm1117_vm1, %v2143_v22, -inf }
 0xed1   : > { %2148 = vmax.xlane.f32.xlu0 %v2147_v23 }
 0xee1   : > { %3067 = vrot.lane.b32.xlu2 %v3829_v20, %s4221_s9  ;;  %s2983_s9 = sshll.u32 %s3437_s8, 4 }
 0xee2   : > { %s2682_s25 = scalar_lea.hbm %s4227_s10, %s2983_s9  ;;  %s3221_s9 = scalar_lea.hbm %s4227_s10, 32 }
 0xee3   : > { %s2685_s29 = sshll.u32 %s2682_s25, 4  ;;  %s2686_s29 = int_to_ptr.hbm [resolvable:$true] %s2685_s29 }
 0xee4   : > { %s3215_s6 = sshra.s32 %s2686_s29, 4  ;;  %s3216_s6 = int_to_ptr.hbm [resolvable:$true] %s3215_s6 }
 0xee5   : > { %p3222_p1 = scmp.lt.s32.totalorder %s3216_s6, %s4227_s10 }
 0xee9   : > { %3077 = vrot.lane.b32.xlu2 %v3829_v20, %s4222_s7  ;;  %s4224_s7 = sld [smem:[#allocation18_spill]] }
 0xf23   : > { %v3892_v44 = vpop.f32.mrf.mxu2 }
 0xf28   : > { %v1988_v24 = vpop.xlane.xlu1 %1987 }
 0xf29   : > { %v1992_v25 = vsub.f32 %v1984_v7, %v1988_v24 }
 0xf2b   : > { %v1994_v27 = vmul.f32 1.442695, %v1992_v25  ;;  %v3894_v28 = vpop.f32.mrf.mxu2  ;;  %v2912_v25 = vld [vmem:[%s4145_s13 + $0x28] sm:$0xff] }
 0xf2c   : > { %2064 = vmatpush.msrb.mxu1 %v2912_v25 }
 0xf2d   : > { %3161 = vpow2.f32 %v1994_v27 }
 0xf30   : > { %v1991_v30 = vpop.xlane.xlu0 %1990 }
 0xf31   : > { %v1993_v11 = vsub.f32 %v1985_v14, %v1991_v30 }
 0xf33   : > { %v3162_v29 = vpop.eup %3161  ;;  %v2265_v32 = vpop.f32.mrf.mxu2  ;;  %v1996_v37 = vmul.f32 1.442695, %v1993_v11 }
 0xf34   : > { %v2271_v33 = vmul.f32 0.35355338, %v2265_v32  ;;  %v1998_v34 = vsel %vm1117_vm1, %v3162_v29, 0.0 }
 0xf35   : > { %1999 = vadd.xlane.f32.xlu0 %v1998_v34  ;;  %3163 = vpow2.f32 %v1996_v37  ;;  %v2913_v34 = vld [vmem:[%s4145_s13 + $0x30] sm:$0xff] }
 0xf36   : > { %v2273_v35 = vsel %vm3598_vm15, %v2271_v33, -1e+30  ;;  %2222 = vmatpush.msra.mxu1 %v2913_v34  ;;  %v2964_v34 = vld [vmem:[%s4151_s19 + $0xb8] sm:$0xff] }
 0xf37   : > { %v2275_v36 = vsel %vm1117_vm1, %v2273_v35, -inf }
 0xf38   : > { %2276 = vmax.xlane.f32.xlu1 %v2275_v36  ;;  %v2914_v36 = vld [vmem:[%s4145_s13 + $0x38] sm:$0xff] }
 0xf3b   : > { %v2268_v38 = vpop.f32.mrf.mxu2  ;;  %v3164_v49 = vpop.eup %3163 }
 0xf3c   : > { %v2272_v16 = vmul.f32 0.35355338, %v2268_v38  ;;  %v2146_v40 = vpop.xlane.xlu2 %2145  ;;  %v2001_v8 = vsel %vm1117_vm1, %v3164_v49, 0.0 }
 0xf3d   : > { %v2150_v43 = vsub.f32 %v2142_v42, %v2146_v40 }
 0xf3e   : > { %v2274_v45 = vsel %vm3606_vm3, %v2272_v16, -1e+30 }
 0xf3f   : > { %v2152_v46 = vmul.f32 1.442695, %v2150_v43  ;;  %v2278_v47 = vsel %vm1117_vm1, %v2274_v45, -inf }
 0xf40   : > { %2279 = vmax.xlane.f32.xlu1 %v2278_v47 }
 0xf41   : > { %3165 = vpow2.f32 %v2152_v46 }
 0xf44   : > { %v3068_v52 = vpop.permute.xlu2 %3067  ;;  %v2149_v50 = vpop.xlane.xlu0 %2148 }
 0xf45   : > { %v3069_v51 = vunpack.i.l.bf16 %v3068_v52  ;;  %v2151_v53 = vsub.f32 %v2143_v22, %v2149_v50  ;;  %v3070_v55 = vunpack.i.h.bf16 %v3068_v52 }
 0xf47   : > { %v3166_v54 = vpop.eup %3165  ;;  %v2154_v56 = vmul.f32 1.442695, %v2151_v53  ;;  %2034 = vmatpush.msra.mxu3 %v3069_v51  ;;  %v3098_v53 = vld [vmem:[%s4146_s14 + $0x1] ss:$0 sm:$0xff] }
 0xf48   : > { %2002 = vadd.xlane.f32.xlu1 %v2001_v8  ;;  %v2156_v58 = vsel %vm1117_vm1, %v3166_v54, 0.0 }
 0xf49   : > { %3167 = vpow2.f32 %v2154_v56  ;;  %2035 = vmatpush.msra.mxu3 %v3070_v55  ;;  %2157 = vadd.xlane.f32.xlu0 %v2156_v58 }
 0xf4c   : > { %v3078_v57 = vpop.permute.xlu2 %3077 }
 0xf4d   : > { %v3079_v59 = vunpack.i.l.bf16 %v3078_v57  ;;  %v3080_v61 = vunpack.i.h.bf16 %v3078_v57 }
 0xf4f   : > { %v3168_v60 = vpop.eup %3167  ;;  %2323 = vmatpush.msrb.mxu0 %v3079_v59 }
 0xf50   : > { %v2159_v62 = vsel %vm1117_vm1, %v3168_v60, 0.0 }
 0xf51   : > { %2324 = vmatpush.msrb.mxu0 %v3080_v61  ;;  %2160 = vadd.xlane.f32.xlu1 %v2159_v62 }
 0xf5d   : > { %3072 = vrot.lane.b32.xlu0 %v3829_v20, %s4223_s5  ;;  %s4061_s5 = scalar_lea.vmem %s4224_s7, %s4054_s0 }
 0xfa8   : > { %v2000_v63 = vpop.xlane.xlu0 %1999 }
 0xfa9   : > { %3169 = vrcp.f32 %v2000_v63 }
 0xfab   : > { %v2277_v0 = vpop.xlane.xlu1 %2276 }
 0xfac   : > { %v2281_v1 = vsub.f32 %v2273_v35, %v2277_v0 }
 0xfae   : > { %v2283_v2 = vmul.f32 1.442695, %v2281_v1 }
 0xfaf   : > { %v3170_v3 = vpop.eup %3169 }
 0xfb0   : > { %v2006_v4 = vmul.f32 %v3170_v3, %v3162_v29  ;;  %3171 = vpow2.f32 %v2283_v2 }
 0xfb2   : > { %2925 = vmatmul.msk.f32.vlgmr.msra.gmra.mxu3 %vm1117_vm1, %v2006_v4 }
 0xfb3   : > { %v2280_v5 = vpop.xlane.xlu1 %2279 }
 0xfb4   : > { %v2282_v6 = vsub.f32 %v2274_v45, %v2280_v5 }
 0xfb6   : > { %v3172_v7 = vpop.eup %3171  ;;  %v2285_v9 = vmul.f32 1.442695, %v2282_v6  ;;  %v2953_v6 = vld [vmem:[%s4149_s17 + $0x38] sm:$0xff] }
 0xfb7   : > { %v2287_v10 = vsel %vm1117_vm1, %v3172_v7, 0.0 }
 0xfb8   : > { %3173 = vpow2.f32 %v2285_v9  ;;  %2288 = vadd.xlane.f32.xlu1 %v2287_v10  ;;  %v2951_v9 = vld [vmem:[%s4149_s17 + $0x28] sm:$0xff]  ;;  %v2950_v10 = vld [vmem:[%s4149_s17 + $0x20] sm:$0xff] }
 0xfbb   : > { %v2003_v12 = vpop.xlane.xlu1 %2002 }
 0xfbc   : > { %3175 = vrcp.f32 %v2003_v12  ;;  %v2158_v15 = vpop.xlane.xlu0 %2157 }
 0xfbd   : > { %3177 = vrcp.f32 %v2158_v15  ;;  %v2970_v15 = vld [vmem:[%s4151_s19 + $0xe8] sm:$0xff] }
 0xfbe   : > { %v3174_v20 = vpop.eup %3173 }
 0xfbf   : > { %v2290_v13 = vsel %vm1117_vm1, %v3174_v20, 0.0 }
 0xfc0   : > { %2291 = vadd.xlane.f32.xlu1 %v2290_v13 }
 0xfc2   : > { %v3176_v14 = vpop.eup %3175 }
 0xfc3   : > { %v2007_v39 = vmul.f32 %v3176_v14, %v3164_v49  ;;  %v3178_v41 = vpop.eup %3177  ;;  %v2972_v14 = vld [vmem:[%s4151_s19 + $0xf8] sm:$0xff] }
 0xfc4   : > { %v2161_v17 = vpop.xlane.xlu1 %2160  ;;  %v2164_v22 = vmul.f32 %v3178_v41, %v3166_v54  ;;  %2493 = vmatpush.msra.mxu2 %v2972_v14  ;;  %v2969_v41 = vld [vmem:[%s4151_s19 + $0xe0] sm:$0xff] }
 0xfc5   : > { %2926 = vmatmul.msk.f32.gmra.mxu3 %vm1117_vm1, %v2007_v39  ;;  %3179 = vrcp.f32 %v2161_v17  ;;  %v2971_v39 = vld [vmem:[%s4151_s19 + $0xf0] sm:$0xff] }
 0xfc6   : > { %2494 = vmatpush.msra.mxu2 %v2971_v39 }
 0xfc8   : > { %2495 = vmatpush.msra.mxu2 %v2970_v15 }
 0xfca   : > { %2496 = vmatpush.msra.mxu2 %v2969_v41 }
 0xfcb   : > { %v3180_v23 = vpop.eup %3179 }
 0xfcc   : > { %v2165_v24 = vmul.f32 %v3180_v23, %v3168_v60 }
 0xfcf   : > { %v3073_v42 = vpop.permute.xlu0 %3072 }
 0xfd0   : > { %v3074_v18 = vunpack.i.l.bf16 %v3073_v42  ;;  %v3075_v21 = vunpack.i.h.bf16 %v3073_v42 }
 0xfd2   : > { %2192 = vmatpush.msrb.mxu3 %v3074_v18 }
 0xfd4   : > { %2193 = vmatpush.msrb.mxu3 %v3075_v21 }
 0xfd5   : > { %2935 = vmatmul.msk.f32.vlgmr.msrb.gmra.mxu3 %vm1117_vm1, %v2164_v22  ;;  %v2968_v22 = vld [vmem:[%s4151_s19 + $0xd8] sm:$0xff] }
 0xfd6   : > { %2353 = vmatpush.msra.mxu3 %v2914_v36  ;;  %2497 = vmatpush.msra.mxu2 %v2968_v22  ;;  %v3099_v36 = vld [vmem:[%s4147_s15 + $0x1] ss:$0 sm:$0xff] }
 0xfd7   : > { %v2574_v22 = vld [vmem:[%s4155_s23] sm:$0xff] }
 0xfdd   : > { %2936 = vmatmul.msk.f32.gmra.mxu3 %vm1117_vm1, %v2165_v24  ;;  %v2967_v24 = vld [vmem:[%s4151_s19 + $0xd0] sm:$0xff] }
 0xfde   : > { %2498 = vmatpush.msra.mxu2 %v2967_v24 }
0x102b   : > { %v2289_v27 = vpop.xlane.xlu1 %2288 }
0x102c   : > { %3181 = vrcp.f32 %v2289_v27  ;;  %v2966_v27 = vld [vmem:[%s4151_s19 + $0xc8] sm:$0xff] }
0x102d   : > { %2499 = vmatpush.msra.mxu2 %v2966_v27  ;;  %v4064_v27 = vld [vmem:[%s4061_s5] sm:$0xff] }
0x1032   : > { %v3182_v29 = vpop.eup %3181 }
0x1033   : > { %v2295_v30 = vmul.f32 %v3182_v29, %v3172_v7  ;;  %v2292_v32 = vpop.xlane.xlu1 %2291  ;;  %v2952_v7 = vld [vmem:[%s4149_s17 + $0x30] sm:$0xff] }
0x1034   : > { %3183 = vrcp.f32 %v2292_v32 }
0x1035   : > { %v2037_v33 = vpop.f32.mrf.mxu3  ;;  %2943 = vmatmul.msk.f32.vlgmr.msrb.gmra.mxu0 %vm1117_vm1, %v2295_v30  ;;  %v2965_v30 = vld [vmem:[%s4151_s19 + $0xc0] sm:$0xff] }
0x1036   : > { %2927 = vmatmul.msk.f32.vlgmr.msrb.gmra.mxu1 %vm1081_vm12, %v2037_v33  ;;  %2500 = vmatpush.msra.mxu2 %v2965_v30 }
0x1037   : > { %2458 = vmatpush.msrb.mxu1 %v2953_v6 }
0x1038   : > { %2501 = vmatpush.msra.mxu2 %v2964_v34 }
0x1039   : > { %2459 = vmatpush.msrb.mxu1 %v2952_v7 }
0x103a   : > { %v3184_v11 = vpop.eup %3183 }
0x103b   : > { %v2296_v35 = vmul.f32 %v3184_v11, %v3174_v20  ;;  %2460 = vmatpush.msrb.mxu1 %v2951_v9 }
0x103d   : > { %2944 = vmatmul.msk.f32.gmra.mxu0 %vm1117_vm1, %v2296_v35  ;;  %2461 = vmatpush.msrb.mxu1 %v2950_v10 }
0x1048   : > { %v2040_v37 = vpop.f32.mrf.mxu3 }
0x1049   : > { %2928 = vmatmul.msk.f32.gmra.mxu1 %vm1081_vm12, %v2040_v37  ;;  %v2963_v37 = vld [vmem:[%s4151_s19 + $0xb0] sm:$0xff] }
0x104a   : > { %2502 = vmatpush.msra.mxu2 %v2963_v37 }
0x1058   : > { %v2195_v38 = vpop.f32.mrf.mxu3 }
0x1059   : > { %2937 = vmatmul.msk.f32.vlgmr.msra.gmra.mxu1 %vm1081_vm12, %v2195_v38 }
0x1060   : > { %v2198_v16 = vpop.f32.mrf.mxu3 }
0x1061   : > { %2938 = vmatmul.msk.f32.gmra.mxu1 %vm1081_vm12, %v2198_v16 }
0x10b2   : > { %v2326_v40 = vpop.f32.mrf.mxu0 }
0x10b3   : > { %2945 = vmatmul.msk.f32.vlgmr.msra.gmra.mxu3 %vm1081_vm12, %v2326_v40  ;;  %v2066_v45 = vpop.f32.mrf.mxu1 }
0x10b4   : > { %v2096_v49 = vadd.f32 %v3892_v44, %v2066_v45  ;;  %v2962_v45 = vld [vmem:[%s4151_s19 + $0xa8] sm:$0xff] }
0x10b5   : > { %2503 = vmatpush.msra.mxu2 %v2962_v45 }
0x10ba   : > { %v2329_v43 = vpop.f32.mrf.mxu0 }
0x10bb   : > { %2946 = vmatmul.msk.f32.gmra.mxu3 %vm1081_vm12, %v2329_v43  ;;  %v3100_v43 = vld [vmem:[%s4148_s16 + $0x1] ss:$0 sm:$0xff] }
0x10c6   : > { %v2069_v46 = vpop.f32.mrf.mxu1 }
0x10c7   : > { %v2099_v56 = vadd.f32 %v3894_v28, %v2069_v46 }
0x10d6   : > { %v2224_v47 = vpop.f32.mrf.mxu1 }
0x10d7   : > { %v2230_v52 = vadd.f32 %v2224_v47, %v2096_v49  ;;  %v2961_v49 = vld [vmem:[%s4151_s19 + $0xa0] sm:$0xff] }
0x10d8   : > { %2504 = vmatpush.msra.mxu2 %v2961_v49 }
0x10de   : > { %v2227_v55 = vpop.f32.mrf.mxu1 }
0x10df   : > { %v2231_v58 = vadd.f32 %v2227_v55, %v2099_v56 }
0x1136   : > { %v2355_v50 = vpop.f32.mrf.mxu3 }
0x1137   : > { %v2361_v51 = vadd.f32 %v2355_v50, %v2230_v52 }
0x1139   : > { %v2363_v54 = vadd.f32 %v2361_v51, %v3787_v26  ;;  %v2960_v51 = vld [vmem:[%s4151_s19 + $0x98] sm:$0xff] }
0x113a   : > { %2505 = vmatpush.msra.mxu2 %v2960_v51 }
0x113b   : > { %v3937_v8 = vadd.f32 %v3098_v53, %v2363_v54 }
0x113d   : > { %v2376_v57 = vsel %vm894_vm0, %v3937_v8, 0.0 }
0x113e   : > { %v2358_v59 = vpop.f32.mrf.mxu3  ;;  %2377 = vadd.xlane.f32.xlu2 %v2376_v57  ;;  %v2959_v57 = vld [vmem:[%s4151_s19 + $0x90] sm:$0xff] }
0x113f   : > { %v2362_v44 = vadd.f32 %v2358_v59, %v2231_v58  ;;  %2506 = vmatpush.msra.mxu2 %v2959_v57  ;;  %v2958_v59 = vld [vmem:[%s4151_s19 + $0x88] sm:$0xff] }
0x1141   : > { %v2364_v60 = vadd.f32 %v2362_v44, %v3792_v31  ;;  %2507 = vmatpush.msra.mxu2 %v2958_v59  ;;  %v2957_v44 = vld [vmem:[%s4151_s19 + $0x80] sm:$0xff]  ;;  %v2610_v59 = vld [vmem:[%s4061_s5 + $0x8] sm:$0xff] }
0x1143   : > { %v3942_v61 = vadd.f32 %v3098_v53, %v2364_v60  ;;  %2508 = vmatpush.msra.mxu2 %v2957_v44  ;;  %v3101_v60 = vld [vmem:[%s4150_s18 + $0x1] ss:$0 sm:$0xff] }
0x1145   : > { %v2379_v62 = vsel %vm894_vm0, %v3942_v61, 0.0 }
0x1146   : > { %2380 = vadd.xlane.f32.xlu0 %v2379_v62 }
0x11b1   : > { %v2378_v26 = vpop.xlane.xlu2 %2377 }
0x11b2   : > { %v2382_v28 = vmul.f32 %v2378_v26, %v3499_v19 }
0x11b4   : > { %v2384_v63 = vsub.f32 %v3937_v8, %v2382_v28 }
0x11b6   : > { %v2386_v0 = vmul.f32 %v2384_v63, %v2384_v63 }
0x11b8   : > { %v2388_v1 = vsel %vm894_vm0, %v2386_v0, 0.0 }
0x11b9   : > { %2389 = vadd.xlane.f32.xlu1 %v2388_v1  ;;  %v2381_v2 = vpop.xlane.xlu0 %2380 }
0x11ba   : > { %v2383_v3 = vmul.f32 %v2381_v2, %v3499_v19  ;;  %v3102_v2 = vld [vmem:[%s4152_s20 + $0x1] ss:$0 sm:$0xff] }
0x11bc   : > { %v3951_v31 = vsub.f32 %v3942_v61, %v2383_v3 }
0x11be   : > { %v2387_v4 = vmul.f32 %v3951_v31, %v3951_v31 }
0x11c0   : > { %v2391_v5 = vsel %vm894_vm0, %v2387_v4, 0.0 }
0x11c1   : > { %2392 = vadd.xlane.f32.xlu1 %v2391_v5 }
0x122c   : > { %v2390_v12 = vpop.xlane.xlu1 %2389 }
0x122d   : > { %v2394_v20 = vmul.f32 %v2390_v12, %v3499_v19 }
0x122f   : > { %v2396_v13 = vadd.f32 1e-05, %v2394_v20 }
0x1231   : > { %3185 = vrsqrt.f32 %v2396_v13  ;;  %vm2404_vm15 = vweird.f32 %v2396_v13 }
0x1234   : > { %v2393_v17 = vpop.xlane.xlu1 %2392 }
0x1235   : > { %v2395_v42 = vmul.f32 %v2393_v17, %v3499_v19 }
0x1237   : > { %v3186_v18 = vpop.eup %3185  ;;  %v2397_v21 = vadd.f32 1e-05, %v2395_v42 }
0x1238   : > { %v2399_v23 = vmul.f32 %v3186_v18, %v2396_v13  ;;  %vm2405_vm12 = vweird.f32 %v3186_v18 }
0x1239   : > { %3187 = vrsqrt.f32 %v2397_v21  ;;  %vm2406_vm1 = vmor %vm2404_vm15, %vm2405_vm12  ;;  %vm2414_vm5 = vweird.f32 %v2397_v21 }
0x123a   : > { %v2400_v25 = vmul.f32 %v3186_v18, %v2399_v23 }
0x123c   : > { %v2401_v29 = vmul.f32 0.5, %v2400_v25 }
0x123e   : > { %v2402_v32 = vsub.f32 1.5, %v2401_v29 }
0x123f   : > { %v3188_v33 = vpop.eup %3187 }
0x1240   : > { %v2403_v11 = vmul.f32 %v3186_v18, %v2402_v32  ;;  %v2409_v35 = vmul.f32 %v3188_v33, %v2397_v21  ;;  %vm2415_vm3 = vweird.f32 %v3188_v33  ;;  %v2575_v21 = vld [vmem:[%s4155_s23 + $0x8] sm:$0xff] }
0x1241   : > { %vm2416_vm6 = vmor %vm2414_vm5, %vm2415_vm3 }
0x1242   : > { %v2407_v38 = vsel %vm2406_vm1, %v3186_v18, %v2403_v11  ;;  %v2410_v16 = vmul.f32 %v3188_v33, %v2409_v35  ;;  %v2576_v18 = vld [vmem:[%s4155_s23 + $0x10] sm:$0xff] }
0x1243   : > { %v2418_v40 = vmul.f32 %v2407_v38, %v2384_v63 }
0x1244   : > { %v2411_v46 = vmul.f32 0.5, %v2410_v16 }
0x1245   : > { %v2423_v47 = vmul.f32 %v3099_v36, %v2418_v40  ;;  %v3103_v40 = vld [vmem:[%s4153_s21] ss:$0 sm:$0xff] }
0x1246   : > { %v2412_v52 = vsub.f32 1.5, %v2411_v46  ;;  %v3104_v46 = vld [vmem:[%s4154_s22] ss:$0 sm:$0xff] }
0x1247   : > { %v2428_v50 = vadd.f32 %v3100_v43, %v2423_v47 }
0x1248   : > { %v2413_v53 = vmul.f32 %v3188_v33, %v2412_v52 }
0x1249   : > { %2955 = vmatmul.msk.f32.vlgmr.msrb.gmra.mxu1 %vm894_vm0, %v2428_v50 }
0x124a   : > { %v2417_v54 = vsel %vm2416_vm6, %v3188_v33, %v2413_v53 }
0x124b   : > { %v2419_v55 = vmul.f32 %v2417_v54, %v3951_v31 }
0x124d   : > { %v2424_v56 = vmul.f32 %v3099_v36, %v2419_v55 }
0x124f   : > { %v2429_v58 = vadd.f32 %v3100_v43, %v2424_v56 }
0x1251   : > { %2956 = vmatmul.msk.f32.gmra.mxu1 %vm894_vm0, %v2429_v58 }
0x12c6   : > { %v2463_v62 = vpop.f32.mrf.mxu1 }
0x12c7   : > { %v2464_v26 = vadd.f32 %v3101_v60, %v2463_v62 }
0x12c9   : > { %v2469_v28 = vmax.f32 %v2464_v26, 0.0 }
0x12cb   : > { %2509 = vmatmul.f32.vlgmr.msra.gmra.mxu2 %v2469_v28 }
0x12ce   : > { %v2466_v63 = vpop.f32.mrf.mxu1 }
0x12cf   : > { %v2467_v0 = vadd.f32 %v3101_v60, %v2466_v63 }
0x12d1   : > { %v2470_v1 = vmax.f32 %v2467_v0, 0.0 }
0x12d3   : > { %2512 = vmatmul.f32.gmra.mxu2 %v2470_v1 }
0x134e   : > { %v2510_v3 = vpop.f32.mrf.mxu2 }
0x134f   : > { %v2511_v31 = vadd.f32 %v3102_v2, %v2510_v3 }
0x1351   : > { %v2516_v4 = vadd.f32 %v2511_v31, %v3937_v8 }
0x1353   : > { %v2520_v5 = vsel %vm894_vm0, %v2516_v4, 0.0 }
0x1354   : > { %2521 = vadd.xlane.f32.xlu1 %v2520_v5 }
0x1356   : > { %v2513_v6 = vpop.f32.mrf.mxu2 }
0x1357   : > { %v2514_v7 = vadd.f32 %v3102_v2, %v2513_v6 }
0x1359   : > { %v2517_v9 = vadd.f32 %v2514_v7, %v3942_v61  ;;  %v2577_v61 = vld [vmem:[%s4155_s23 + $0x18] sm:$0xff] }
0x135a   : > { %2596 = vmatpush.msra.mxu0 %v2577_v61 }
0x135b   : > { %v2523_v10 = vsel %vm894_vm0, %v2517_v9, 0.0 }
0x135c   : > { %2524 = vadd.xlane.f32.xlu1 %v2523_v10  ;;  %2597 = vmatpush.msra.mxu0 %v2576_v18 }
0x135e   : > { %2598 = vmatpush.msra.mxu0 %v2575_v21 }
0x1360   : > { %2599 = vmatpush.msra.mxu0 %v2574_v22 }
0x13c7   : > { %v2522_v12 = vpop.xlane.xlu1 %2521 }
0x13c8   : > { %v2526_v20 = vmul.f32 %v2522_v12, %v3499_v19 }
0x13ca   : > { %v2528_v13 = vsub.f32 %v2516_v4, %v2526_v20 }
0x13cc   : > { %v2530_v14 = vmul.f32 %v2528_v13, %v2528_v13 }
0x13ce   : > { %v2532_v39 = vsel %vm894_vm0, %v2530_v14, 0.0 }
0x13cf   : > { %2533 = vadd.xlane.f32.xlu1 %v2532_v39  ;;  %v2525_v8 = vpop.xlane.xlu1 %2524 }
0x13d0   : > { %v2527_v15 = vmul.f32 %v2525_v8, %v3499_v19 }
0x13d2   : > { %v2529_v17 = vsub.f32 %v2517_v9, %v2527_v15 }
0x13d4   : > { %v2531_v42 = vmul.f32 %v2529_v17, %v2529_v17 }
0x13d6   : > { %v2535_v41 = vsel %vm894_vm0, %v2531_v42, 0.0 }
0x13d7   : > { %2536 = vadd.xlane.f32.xlu2 %v2535_v41 }
0x13ef   : > { %2632 = vperm.xlu2 %3081, %v4064_v27  }
0x1442   : > { %v2534_v23 = vpop.xlane.xlu1 %2533 }
0x1443   : > { %v2538_v24 = vmul.f32 %v2534_v23, %v3499_v19 }
0x1445   : > { %v2540_v25 = vadd.f32 1e-05, %v2538_v24 }
0x1447   : > { %3189 = vrsqrt.f32 %v2540_v25  ;;  %vm2548_vm8 = vweird.f32 %v2540_v25 }
0x144a   : > { %v2537_v29 = vpop.xlane.xlu2 %2536 }
0x144b   : > { %v2539_v30 = vmul.f32 %v2537_v29, %v3499_v19 }
0x144d   : > { %v3190_v32 = vpop.eup %3189  ;;  %v2541_v33 = vadd.f32 1e-05, %v2539_v30 }
0x144e   : > { %v2543_v34 = vmul.f32 %v3190_v32, %v2540_v25  ;;  %vm2549_vm7 = vweird.f32 %v3190_v32 }
0x144f   : > { %3191 = vrsqrt.f32 %v2541_v33  ;;  %vm2550_vm9 = vmor %vm2548_vm8, %vm2549_vm7  ;;  %vm2558_vm11 = vweird.f32 %v2541_v33 }
0x1450   : > { %v2544_v11 = vmul.f32 %v3190_v32, %v2543_v34 }
0x1452   : > { %v2545_v35 = vmul.f32 0.5, %v2544_v11  ;;  %v2633_v2 = vpop.permute.xlu2 %2632 }
0x1454   : > { %v2546_v36 = vsub.f32 1.5, %v2545_v35 }
0x1455   : > { %v3192_v37 = vpop.eup %3191 }
0x1456   : > { %v2547_v38 = vmul.f32 %v3190_v32, %v2546_v36  ;;  %v2553_v16 = vmul.f32 %v3192_v37, %v2541_v33  ;;  %vm2559_vm10 = vweird.f32 %v3192_v37 }
0x1457   : > { %vm2560_vm13 = vmor %vm2558_vm11, %vm2559_vm10 }
0x1458   : > { %v2551_v43 = vsel %vm2550_vm9, %v3190_v32, %v2547_v38  ;;  %v2554_v45 = vmul.f32 %v3192_v37, %v2553_v16 }
0x1459   : > { %v2562_v19 = vmul.f32 %v2551_v43, %v2528_v13 }
0x145a   : > { %v2555_v47 = vmul.f32 0.5, %v2554_v45 }
0x145b   : > { %v2567_v49 = vmul.f32 %v3103_v40, %v2562_v19 }
0x145c   : > { %v2556_v52 = vsub.f32 1.5, %v2555_v47 }
0x145d   : > { %v2572_v50 = vadd.f32 %v3104_v46, %v2567_v49 }
0x145e   : > { %v2557_v51 = vmul.f32 %v3192_v37, %v2556_v52 }
0x145f   : > { %2974 = vmatmul.msk.f32.vlgmr.msra.gmra.mxu0 %vm894_vm0, %v2572_v50 }
0x1460   : > { %v2561_v53 = vsel %vm2560_vm13, %v3192_v37, %v2557_v51 }
0x1461   : > { %v2563_v54 = vmul.f32 %v2561_v53, %v2529_v17 }
0x1463   : > { %v2568_v55 = vmul.f32 %v3103_v40, %v2563_v54 }
0x1465   : > { %v2573_v56 = vadd.f32 %v3104_v46, %v2568_v55 }
0x1467   : > { %2975 = vmatmul.msk.f32.gmra.mxu0 %vm894_vm0, %v2573_v56  ;;  %vm2637_vm0 = vcmp.eq.s32.totalorder %v3594_v48, %v2633_v2 }
0x14dc   : > { %v2601_v58 = vpop.f32.mrf.mxu0 }
0x14dd   : > { %2607 = vst [vmem:[%s836_s24] sm:$0xff] %v2601_v58  ;;  %2611 = vmax.xlane.f32.xlu1 %v2601_v58 }
0x14e4   : > { %v2604_v57 = vpop.f32.mrf.mxu0 }
0x14e5   : > { %2608 = vst [vmem:[%s836_s24 + $0x8] sm:$0xff] %v2604_v57  ;;  %2613 = vmax.xlane.f32.xlu0 %v2604_v57  ;;  %s3217_s24 = scalar_lea.hbm %s3216_s6, 16 }
0x14e6   : > { %p3218_p12 = scmp.ne.s32.totalorder %s3216_s6, %s3217_s24  ;;  %p3223_p2 = scmp.lt.s32.totalorder %s3221_s9, %s3217_s24 }
0x14e8   : > { %p3219_p13 = pnand %p3218_p12, %p3454_p5  ;;  %p3224_p3 = por %p3223_p2, %p3222_p1 }
0x14ea   : > { %p3220_p0 = pneg %p3219_p13 }
0x14ec   : > { %p3225_p4 = pnand %p3224_p3, %p3220_p0 }
0x14f6   : > { %2635 = vperm.xlu1 %3082, %v2610_v59  }
0x1550   : > { %v2612_v44 = vpop.xlane.xlu1 %2611 }
0x1551   : > { %v2615_v60 = vsub.f32 %v2601_v58, %v2612_v44 }
0x1553   : > { %v2617_v62 = vmul.f32 1.442695, %v2615_v60 }
0x1555   : > { %3193 = vpow2.f32 %v2617_v62 }
0x1558   : > { %v2614_v26 = vpop.xlane.xlu0 %2613 }
0x1559   : > { %v2616_v28 = vsub.f32 %v2604_v57, %v2614_v26 }
0x155b   : > { %v3194_v63 = vpop.eup %3193  ;;  %v2619_v0 = vmul.f32 1.442695, %v2616_v28 }
0x155c   : > { %2621 = vadd.xlane.f32.xlu0 %v3194_v63 }
0x155d   : > { %3195 = vpow2.f32 %v2619_v0 }
0x1563   : > { %v3196_v1 = vpop.eup %3195 }
0x1564   : > { %2623 = vadd.xlane.f32.xlu0 %v3196_v1 }
0x1568   : > { %v2636_v3 = vpop.permute.xlu1 %2635 }
0x1569   : > { %vm2638_vm14 = vcmp.eq.s32.totalorder %v3594_v48, %v2636_v3 }
0x156a   : > { %3228 = shalt.err (!%p3225_p4)
}
0x156b   : > { %s3278_s3 = smov 128   ;;  %s3279_s28 = smov 8   ;;  %v2640_v31 = vsel %vm2638_vm14, %v2604_v57, 0.0  ;;  %v2639_v4 = vsel %vm2637_vm0, %v2601_v58, 0.0  ;;  %vm2645_vm2 = vcmp.ge.s32.totalorder %v4064_v27, 0  ;;  %vm2646_vm4 = vcmp.ge.s32.totalorder %v2610_v59, 0 }
0x156c   : > { %2986 = dma.vmem_to_hbm [thread:$0]  (%p3454_p5), %s2684_s26, 256, %s2686_s29, %s2661_s27, %s3278_s3, %s3278_s3, %s3279_s28   ;;  %2643 = vadd.xlane.f32.xlu2 %v2640_v31  ;;  %2641 = vadd.xlane.f32.xlu0 %v2639_v4  ;;  %v3280_v5 = vmov 0.0   ;;  %vm2655_vm12 = vcmask 7168  }
0x156d   : > { %s4228_s8 = sld [smem:[#allocation27_spill]]  ;;  %v2976_v6 = vsel %vm2645_vm2, 1.0, %v3280_v5  ;;  %v2977_v7 = vsel %vm2646_vm4, 1.0, %v3280_v5 }
0x156e   : > { %s4229_s29 = sld [smem:[#allocation26_spill]] }
0x1573   : > { %s883_s7 = scalar_lea.vmem %s4228_s8, %s4054_s0 }
0x1574   : > { %2658 = vst.msk [vmem:[%s883_s7] sm:$0xff] %vm2655_vm12, %v2976_v6  ;;  %s877_s27 = scalar_lea.vmem %s4229_s29, %s4054_s0 }
0x1575   : > { %2659 = vst.msk [vmem:[%s883_s7 + $0x8] sm:$0xff] %vm2655_vm12, %v2977_v7 }
0x15cf   : > { %v2622_v9 = vpop.xlane.xlu0 %2621 }
0x15d0   : > { %3197 = vlog2.f32 %v2622_v9 }
0x15d6   : > { %v3198_v48 = vpop.eup %3197 }
0x15d7   : > { %v2624_v10 = vpop.xlane.xlu0 %2623  ;;  %v2626_v12 = vmul.f32 0.6931472, %v3198_v48 }
0x15d8   : > { %3199 = vlog2.f32 %v2624_v10 }
0x15d9   : > { %v2629_v13 = vadd.f32 %v2626_v12, %v2612_v44 }
0x15de   : > { %v3200_v20 = vpop.eup %3199 }
0x15df   : > { %v2628_v14 = vmul.f32 0.6931472, %v3200_v20  ;;  %v2642_v39 = vpop.xlane.xlu0 %2641  ;;  %v2644_v17 = vpop.xlane.xlu2 %2643 }
0x15e0   : > { %v2651_v8 = vsub.f32 %v2629_v13, %v2642_v39 }
0x15e1   : > { %v2630_v15 = vadd.f32 %v2628_v14, %v2614_v26 }
0x15e2   : > { %v2653_v42 = vmul.f32 %v2976_v6, %v2651_v8 }
0x15e3   : > { %v2652_v41 = vsub.f32 %v2630_v15, %v2644_v17 }
0x15e4   : > { %2656 = vst.msk [vmem:[%s877_s27] sm:$0xff] %vm2655_vm12, %v2653_v42 }
0x15e5   : > { %v2654_v61 = vmul.f32 %v2977_v7, %v2652_v41 }
0x15e7   : > { %2657 = vst.msk [vmem:[%s877_s27 + $0x8] sm:$0xff] %vm2655_vm12, %v2654_v61 }
0x15e8 PF: > { %s4230_s9 = sld [smem:[#allocation9_spill]] }
0x15e9   : > { %s4231_s5 = sld [smem:[#allocation6_spill]] }
0x15ee   : > { %p2992_p5 = scmp.ge.s32.totalorder %s4230_s9, 2 }
0x15ef   : > { %s2708_s3 = sand.u32 1, %s4231_s5  }
0x15f0   : > { %p2989_p7 = pnand %p2992_p5, %p3458_p6  ;;  %s2709_s28 = scalar_lea.sflag [#allocation4], %s2708_s3 }
0x15f2   : > { %p2990_p8 = pneg %p2989_p7 }
0x15f4   : > { %3246 = dma.done.wait (%p2990_p8), %s2709_s28, 256  }
0x15f5   : > { %3248 = vsyncadd (%p2990_p8), %s2709_s28, 4294967040  ;;  %s4233_s28 = sld [smem:[#allocation10_spill]] }
0x15f6   : > { %s4234_s27 = sld [smem:[#allocation7_spill]] }
0x15f7   : > { %s4235_s3 = sld [smem:[#allocation8_spill]] }
0x15f8   : > { %s4236_s7 = sld [smem:[#allocation11_spill]] }
0x15fb   : > { %p37_p9 = scmp.ge.s32.totalorder %s4233_s28, 4  }
0x15fd   :  { %39 = sbr.rel (!%p37_p9) target bundleno = 18 (0x12), region = 199 }
0x1602   :  { %2731 = vsyncpa [#allocation4], 1 }
0x1603   :  { %2733 = vsyncpa [#allocation4 + $0x1], 1 }

</bundles_post_ra>
